<compile_context>
chip_gen: v5e
topology: v5e:2x2
jax: 0.10.0
libtpu: 0.0.40
codegen_flags: <defaults>
</compile_context>

<pallas_src>
import math
import functools

import jax
import jax.numpy as jnp
from jax.experimental import pallas as pl
from jax.experimental.pallas import tpu as pltpu

LANE = 128                      # lane padding target for the expanded dims
VMEM_LIMIT = 32 * 1024 * 1024   # safe scoped-VMEM request on v5e/v6e/v7x


def _round_up(x, m):
    return (x + m - 1) // m * m


# ----------------------------------------------------------------------------
# Pallas kernels
# ----------------------------------------------------------------------------

def _mm_kernel(x_ref, w_ref, b_ref, o_ref, *, act):
    """One row-tile of Y = act(X @ W + b) (used for the stem conv matmul)."""
    y = jnp.dot(x_ref[...], w_ref[...], preferred_element_type=jnp.float32)
    y = y + b_ref[...]
    if act == "swish":
        y = y * jax.nn.sigmoid(y)
    elif act == "sigmoid":
        y = jax.nn.sigmoid(y)
    o_ref[...] = y.astype(o_ref.dtype)


def matmul_bias_act(x, w, b, *, act="none", out_dtype=jnp.bfloat16, tm=1024):
    """Tiled (over M) matmul + bias + activation.  x:(M,K) w:(K,N) b:(1,N)."""
    M, K = x.shape
    Kw, Np = w.shape
    assert K == Kw
    x = x.astype(jnp.bfloat16)
    tm = min(tm, _round_up(M, 8))
    Mp = _round_up(M, tm)
    if Mp != M:
        x = jnp.pad(x, ((0, Mp - M), (0, 0)))
    out = pl.pallas_call(
        functools.partial(_mm_kernel, act=act),
        out_shape=jax.ShapeDtypeStruct((Mp, Np), out_dtype),
        grid=(Mp // tm,),
        in_specs=[
            pl.BlockSpec((tm, K), lambda i: (i, 0)),
            pl.BlockSpec((K, Np), lambda i: (0, 0)),
            pl.BlockSpec((1, Np), lambda i: (0, 0)),
        ],
        out_specs=pl.BlockSpec((tm, Np), lambda i: (i, 0)),
        compiler_params=pltpu.CompilerParams(
            dimension_semantics=("parallel",),
            vmem_limit_bytes=VMEM_LIMIT),
    )(x, w, b)
    return out[:M] if Mp != M else out


def _mbconv_kernel(x0_ref, ew_ref, eb_ref, dww_ref, dwb_ref,
                   rw_ref, rb_ref, qw_ref, qb_ref, pw_ref, pb_ref,
                   x2_ref, x1p_ref, *, H, W):
    """Whole MBConv block for one image, entirely in VMEM:
       expand 1x1 (+BN+swish) -> 3x3 depthwise (+BN+swish) -> GAP -> SE gate
       -> project 1x1 (+BN) with gated input -> residual add.
       Only x0 (8 real channels) is read from HBM; only x2 is written back."""
    C = ew_ref.shape[1]                     # padded expanded width (128)
    C0 = x0_ref.shape[-1]                   # real narrow width (8)
    HW = H * W

    x0 = x0_ref[...]                        # (H, W, C0) bf16
    x0_flat = x0.reshape(HW, C0)

    # ---- expand 1x1 + folded BN + swish (never leaves VMEM) ----------------
    x1 = jnp.dot(x0_flat, ew_ref[...], preferred_element_type=jnp.float32)
    x1 = x1 + eb_ref[...]
    x1 = x1 * jax.nn.sigmoid(x1)            # (HW, C) f32

    # ---- in-VMEM zero halo: the dw conv zero-pads the *expanded* activation
    x1p_ref[...] = jnp.zeros_like(x1p_ref)
    x1p_ref[1:H + 1, 1:W + 1, :] = x1.reshape(H, W, C)

    # ---- 3x3 depthwise (stride 1) + folded BN + swish ----------------------
    # TODO(synk): use pltpu.roll for the dx (sublane) shifts and add H-tiling
    # with a 1-row halo + two-pass SE for resolutions where H*W*C f32 >> VMEM.
    xp = x1p_ref[...]                       # (H+2, W+2, C) f32
    wdw = dww_ref[...]                      # (3, 3, C), BN scale folded
    acc = jnp.zeros((H, W, C), jnp.float32)
    for dy in range(3):
        for dx in range(3):
            acc = acc + xp[dy:dy + H, dx:dx + W, :] * wdw[dy, dx]
    y = acc + dwb_ref[...]                  # folded-BN shift
    y = y * jax.nn.sigmoid(y)               # swish
    y_flat = y.reshape(HW, C)

    # ---- squeeze-excite: GAP -> FC(swish) -> FC(sigmoid) = channel gate ----
    pooled = jnp.sum(y_flat, axis=0, keepdims=True) * (1.0 / HW)
    s = jnp.dot(pooled.astype(jnp.bfloat16), rw_ref[...],
                preferred_element_type=jnp.float32) + rb_ref[...]
    s = s * jax.nn.sigmoid(s)
    g = jax.nn.sigmoid(jnp.dot(s.astype(jnp.bfloat16), qw_ref[...],
                               preferred_element_type=jnp.float32) + qb_ref[...])

    # ---- project 1x1 + folded BN, SE gate fused in the epilogue, residual --
    yg = (y_flat * g).astype(jnp.bfloat16)
    x2 = jnp.dot(yg, pw_ref[...], preferred_element_type=jnp.float32)
    x2 = x2 + pb_ref[...] + x0_flat.astype(jnp.float32)
    x2_ref[...] = x2.astype(x2_ref.dtype)


def mbconv_block(x0, prep):
    """x0: (N, H, W, C0) bf16 (real channel width).  Returns (N, H*W, C0)."""
    N, H, W, C0 = x0.shape
    C = prep["exp_w"].shape[1]
    return pl.pallas_call(
        functools.partial(_mbconv_kernel, H=H, W=W),
        out_shape=jax.ShapeDtypeStruct((N, H * W, C0), jnp.bfloat16),
        grid=(N,),
        in_specs=[
            pl.BlockSpec((None, H, W, C0), lambda n: (n, 0, 0, 0)),
            pl.BlockSpec((C0, C), lambda n: (0, 0)),
            pl.BlockSpec((1, C), lambda n: (0, 0)),
            pl.BlockSpec((3, 3, C), lambda n: (0, 0, 0)),
            pl.BlockSpec((1, C), lambda n: (0, 0)),
            pl.BlockSpec((C, C), lambda n: (0, 0)),
            pl.BlockSpec((1, C), lambda n: (0, 0)),
            pl.BlockSpec((C, C), lambda n: (0, 0)),
            pl.BlockSpec((1, C), lambda n: (0, 0)),
            pl.BlockSpec((C, C0), lambda n: (0, 0)),
            pl.BlockSpec((1, C0), lambda n: (0, 0)),
        ],
        out_specs=pl.BlockSpec((None, H * W, C0), lambda n: (n, 0, 0)),
        scratch_shapes=[pltpu.VMEM((H + 2, W + 2, C), jnp.float32)],
        compiler_params=pltpu.CompilerParams(
            dimension_semantics=("parallel",),
            vmem_limit_bytes=VMEM_LIMIT),
    )(x0, prep["exp_w"], prep["exp_b"], prep["dw_w"], prep["dw_b"],
      prep["se_r_w"], prep["se_r_b"], prep["se_e_w"], prep["se_e_b"],
      prep["proj_w"], prep["proj_b"])


def _head_pool_fc_kernel(x_ref, wh_ref, bh_ref, wf_ref, bf_ref, o_ref, acc_ref,
                         *, hw_real, apply_sigmoid):
    """Head 1x1 + swish with a running GAP accumulator; on the last spatial
    tile it applies the classifier FC (+ eval sigmoid).  The spatial head
    activation never touches HBM.  Rows past hw_real (tile padding) are
    masked out of the pooled sum."""
    j = pl.program_id(1)
    T = x_ref.shape[0]

    @pl.when(j == 0)
    def _():
        acc_ref[...] = jnp.zeros_like(acc_ref)

    y = jnp.dot(x_ref[...], wh_ref[...], preferred_element_type=jnp.float32)
    y = y + bh_ref[...]
    y = y * jax.nn.sigmoid(y)                               # swish
    row = jax.lax.broadcasted_iota(jnp.int32, y.shape, 0) + j * T
    y = jnp.where(row < hw_real, y, 0.0)                    # mask padded rows
    acc_ref[...] += jnp.sum(y, axis=0, keepdims=True)       # running pool sum

    @pl.when(j == pl.num_programs(1) - 1)
    def _():
        pooled = acc_ref[...] * (1.0 / hw_real)              # (1, Ch)
        logits = jnp.dot(pooled.astype(jnp.bfloat16), wf_ref[...],
                         preferred_element_type=jnp.float32) + bf_ref[...]
        if apply_sigmoid:
            logits = jax.nn.sigmoid(logits)
        o_ref[...] = logits


def head_pool_fc(x2, prep, *, training, t_hw=1024):
    """x2: (N, HW, C0) bf16 (real channel width)."""
    N, HW, C0 = x2.shape
    CH = prep["head_w"].shape[1]
    CLS = prep["fc_w"].shape[1]
    T = min(t_hw, _round_up(HW, 8))
    HWp = _round_up(HW, T)
    if HWp != HW:
        x2 = jnp.pad(x2, ((0, 0), (0, HWp - HW), (0, 0)))
    return pl.pallas_call(
        functools.partial(_head_pool_fc_kernel, hw_real=HW,
                          apply_sigmoid=not training),
        out_shape=jax.ShapeDtypeStruct((N, 1, CLS), jnp.float32),
        grid=(N, HWp // T),
        in_specs=[
            pl.BlockSpec((None, T, C0), lambda n, j: (n, j, 0)),
            pl.BlockSpec((C0, CH), lambda n, j: (0, 0)),
            pl.BlockSpec((1, CH), lambda n, j: (0, 0)),
            pl.BlockSpec((CH, CLS), lambda n, j: (0, 0)),
            pl.BlockSpec((1, CLS), lambda n, j: (0, 0)),
        ],
        out_specs=pl.BlockSpec((None, 1, CLS), lambda n, j: (n, 0, 0)),
        scratch_shapes=[pltpu.VMEM((1, CH), jnp.float32)],
        compiler_params=pltpu.CompilerParams(
            dimension_semantics=("parallel", "arbitrary"),
            vmem_limit_bytes=VMEM_LIMIT),
    )(x2, prep["head_w"], prep["head_b"], prep["fc_w"], prep["fc_b"])


# ----------------------------------------------------------------------------
# Glue: im2col, BN folding, parameter init / preparation (one-time)
# ----------------------------------------------------------------------------

def im2col(x_nchw, k, stride, pad):
    # TODO(synk): fold im2col into the stem kernel (in-kernel strided taps) so
    # the expanded patch tensor is never materialized in HBM.
    N, C, H, W = x_nchw.shape
    xp = jnp.pad(x_nchw, ((0, 0), (0, 0), (pad, pad), (pad, pad)))
    Ho = (H + 2 * pad - k) // stride + 1
    Wo = (W + 2 * pad - k) // stride + 1
    taps = []
    for dy in range(k):
        for dx in range(k):
            taps.append(xp[:, :, dy:dy + stride * Ho:stride,
                               dx:dx + stride * Wo:stride])
    patches = jnp.stack(taps, axis=2)                      # (N, C, k*k, Ho, Wo)
    patches = patches.transpose(0, 3, 4, 1, 2).reshape(N * Ho * Wo, C * k * k)
    return patches, Ho, Wo


def fold_bn(gamma, beta, mean, var, eps=1e-3):
    # EfficientNet BN uses eps=1e-3 (PyTorch BatchNorm2d default is 1e-5).
    scale = gamma / jnp.sqrt(var + eps)
    shift = beta - mean * scale
    return scale, shift


def _pad2(w, rows, cols):
    r, c = w.shape
    return jnp.pad(w, ((0, rows - r), (0, cols - c)))


def _pad_row(b, cols):
    return jnp.pad(b, (0, cols - b.shape[0])).reshape(1, cols)


def init_params(key, cin=3, c0=8, expand=4, c_head=32, num_classes=5):
    ks = jax.random.split(key, 16)
    c_mid = c0 * expand
    c_se = max(1, c0 // 4)

    def bn(k, c):
        k1, k2, k3, k4 = jax.random.split(k, 4)
        return (1.0 + 0.1 * jax.random.normal(k1, (c,)),         # gamma
                0.1 * jax.random.normal(k2, (c,)),               # beta
                0.1 * jax.random.normal(k3, (c,)),               # running_mean
                1.0 + 0.1 * jnp.abs(jax.random.normal(k4, (c,))))  # running_var

    p = {
        "stem_w": 0.1 * jax.random.normal(ks[0], (c0, cin, 3, 3)),
        "stem_bn": bn(ks[1], c0),
        "exp_w": 0.1 * jax.random.normal(ks[2], (c_mid, c0, 1, 1)),
        "exp_bn": bn(ks[3], c_mid),
        "dw_w": 0.1 * jax.random.normal(ks[4], (c_mid, 1, 3, 3)),
        "dw_bn": bn(ks[5], c_mid),
        "se_reduce_w": 0.1 * jax.random.normal(ks[6], (c_se, c_mid)),
        "se_reduce_b": 0.1 * jax.random.normal(ks[7], (c_se,)),
        "se_expand_w": 0.1 * jax.random.normal(ks[8], (c_mid, c_se)),
        "se_expand_b": 0.1 * jax.random.normal(ks[9], (c_mid,)),
        "proj_w": 0.1 * jax.random.normal(ks[10], (c0, c_mid, 1, 1)),
        "proj_bn": bn(ks[11], c0),
        "head_w": 0.1 * jax.random.normal(ks[12], (c_head, c0, 1, 1)),
        "head_bn": bn(ks[13], c_head),
        # replaced FC: nn.Linear(kernel_count, num_classes), focal bias init
        "fc_w": 0.1 * jax.random.normal(ks[14], (num_classes, c_head)),
        "fc_b": jnp.full((num_classes,), -math.log((1 - 0.01) / 0.01),
                         dtype=jnp.float32),
    }
    return jax.tree_util.tree_map(lambda a: jnp.asarray(a, jnp.float32), p)


def prepare_params(p, lane=LANE):
    """Fold BN, transpose to (in, out), cast MXU operands to bf16.
    Only the expanded (in-VMEM) dims are zero-padded to `lane`; narrow HBM
    activations keep their real channel count.  Zero padding keeps padded
    channels exactly zero through swish / SE / residual, so real-channel
    outputs match the unpadded network."""
    c0, cin = p["stem_w"].shape[:2]
    c_mid = p["exp_w"].shape[0]
    c_head = p["head_w"].shape[0]
    k2 = p["stem_w"].shape[2] * p["stem_w"].shape[3]

    out = {}
    s, sh = fold_bn(*p["stem_bn"])
    w = p["stem_w"].reshape(c0, cin * k2).T * s[None, :]            # (27, 8)
    kp = _round_up(cin * k2, 32)                                    # 27 -> 32
    out["stem_w"] = _pad2(w, kp, c0).astype(jnp.bfloat16)
    out["stem_b"] = sh.reshape(1, c0).astype(jnp.float32)

    s, sh = fold_bn(*p["exp_bn"])
    w = p["exp_w"].reshape(c_mid, c0).T * s[None, :]                # (8, 32)
    out["exp_w"] = _pad2(w, c0, lane).astype(jnp.bfloat16)          # (8, 128)
    out["exp_b"] = _pad_row(sh, lane).astype(jnp.float32)

    s, sh = fold_bn(*p["dw_bn"])
    w = jnp.transpose(p["dw_w"][:, 0], (1, 2, 0)) * s[None, None, :]
    out["dw_w"] = jnp.pad(w, ((0, 0), (0, 0), (0, lane - c_mid))).astype(jnp.float32)
    out["dw_b"] = _pad_row(sh, lane).astype(jnp.float32)

    out["se_r_w"] = _pad2(p["se_reduce_w"].T, lane, lane).astype(jnp.bfloat16)
    out["se_r_b"] = _pad_row(p["se_reduce_b"], lane).astype(jnp.float32)
    out["se_e_w"] = _pad2(p["se_expand_w"].T, lane, lane).astype(jnp.bfloat16)
    out["se_e_b"] = _pad_row(p["se_expand_b"], lane).astype(jnp.float32)

    s, sh = fold_bn(*p["proj_bn"])
    w = p["proj_w"].reshape(c0, c_mid).T * s[None, :]               # (32, 8)
    out["proj_w"] = _pad2(w, lane, c0).astype(jnp.bfloat16)         # (128, 8)
    out["proj_b"] = sh.reshape(1, c0).astype(jnp.float32)

    s, sh = fold_bn(*p["head_bn"])
    w = p["head_w"].reshape(c_head, c0).T * s[None, :]              # (8, 32)
    out["head_w"] = _pad2(w, c0, lane).astype(jnp.bfloat16)         # (8, 128)
    out["head_b"] = _pad_row(sh, lane).astype(jnp.float32)

    out["fc_w"] = _pad2(p["fc_w"].T, lane, lane).astype(jnp.bfloat16)
    out["fc_b"] = _pad_row(p["fc_b"], lane).astype(jnp.float32)
    return out


# ----------------------------------------------------------------------------
# Forward pass (CustomEfficientNet.forward, eval mode)
# ----------------------------------------------------------------------------

def custom_efficientnet_forward(prep, x_nchw, num_classes=5, training=False):
    N = x_nchw.shape[0]

    # ---- stem: conv3x3 s2 p1 + BN + swish (im2col + tiled MXU matmul) ------
    patches, Ho, Wo = im2col(x_nchw.astype(jnp.bfloat16), 3, 2, 1)
    Kp = prep["stem_w"].shape[0]
    if patches.shape[1] < Kp:                        # align K: 27 -> 32
        patches = jnp.pad(patches, ((0, 0), (0, Kp - patches.shape[1])))
    x0 = matmul_bias_act(patches, prep["stem_w"], prep["stem_b"], act="swish")
    c0 = x0.shape[-1]                                # real channels (8) in HBM

    # ---- MBConv (expand+dw+SE+project+skip) fused into one kernel ----------
    x2 = mbconv_block(x0.reshape(N, Ho, Wo, c0), prep)    # (N, HW, 8) bf16

    # ---- head 1x1 + swish + GAP + FC (+ eval-mode sigmoid), fused ----------
    logits = head_pool_fc(x2, prep, training=training)    # (N, 1, 128) f32
    return logits.reshape(N, -1)[:, :num_classes]


# ----------------------------------------------------------------------------
if __name__ == "__main__":
    key = jax.random.PRNGKey(0)
    k_param, k_x = jax.random.split(key)

    num_classes = 5
    raw = init_params(k_param, cin=3, c0=8, expand=4, c_head=32,
                      num_classes=num_classes)
    prep = prepare_params(raw)

    # PyTorch conv input convention: NCHW
    x = jax.random.normal(k_x, (2, 3, 16, 16), dtype=jnp.float32)

    fwd = jax.jit(functools.partial(custom_efficientnet_forward,
                                    num_classes=num_classes, training=False))
    out = jax.block_until_ready(fwd(prep, x))

    assert out.shape == (2, num_classes), out.shape
    assert bool(jnp.all(jnp.isfinite(out))), "non-finite output"
    assert bool(jnp.all((out >= 0.0) & (out <= 1.0))), "sigmoid range violated"
    print("KERNEL_OK")
</pallas_src>

<mosaic_0001>
module attributes {stable_mosaic.version = 11 : i64} {
  func.func @_mm_kernel(%arg0: i32, %arg1: memref<128x32xbf16, #tpu.memory_space<vmem>>, %arg2: memref<32x8xbf16, #tpu.memory_space<vmem>>, %arg3: memref<1x8xf32, #tpu.memory_space<vmem>>, %arg4: memref<128x8xbf16, #tpu.memory_space<vmem>>) attributes {dimension_semantics = [#tpu.dimension_semantics<parallel>], iteration_bounds = array<i64: 1>, scalar_prefetch = 0 : i64, scratch_operands = 0 : i64, tpu.core_type = #tpu.core_type<tc>, window_params = [{transform_indices = @transform_0, window_bounds = array<i64: 128, 32>}, {pipeline_mode = #tpu.pipeline_mode<synchronous>, transform_indices = @transform_1, window_bounds = array<i64: 32, 8>}, {pipeline_mode = #tpu.pipeline_mode<synchronous>, transform_indices = @transform_2, window_bounds = array<i64: 1, 8>}, {transform_indices = @transform_3, window_bounds = array<i64: 128, 8>}]} {
    %c0 = arith.constant 0 : index
    %c0_0 = arith.constant 0 : index
    %0 = vector.load %arg1[%c0, %c0_0] : memref<128x32xbf16, #tpu.memory_space<vmem>>, vector<128x32xbf16>
    %c0_1 = arith.constant 0 : index
    %c0_2 = arith.constant 0 : index
    %1 = vector.load %arg2[%c0_1, %c0_2] : memref<32x8xbf16, #tpu.memory_space<vmem>>, vector<32x8xbf16>
    %cst = arith.constant dense<0.000000e+00> : vector<128x8xf32>
    %2 = tpu.matmul %0, %1, %cst {dimension_numbers = #tpu.dot_dimension_numbers<[1], [0], [0], [1], [0, 0, 1, 1], [], []>} : vector<128x32xbf16>, vector<32x8xbf16>, vector<128x8xf32> -> vector<128x8xf32>
    %c0_3 = arith.constant 0 : index
    %c0_4 = arith.constant 0 : index
    %3 = vector.load %arg3[%c0_3, %c0_4] : memref<1x8xf32, #tpu.memory_space<vmem>>, vector<1x8xf32>
    %4 = vector.broadcast %3 : vector<1x8xf32> to vector<128x8xf32>
    %5 = arith.addf %2, %4 : vector<128x8xf32>
    %6 = arith.negf %5 : vector<128x8xf32>
    %7 = math.exp %6 : vector<128x8xf32>
    %cst_5 = arith.constant 1.000000e+00 : f32
    %8 = vector.broadcast %cst_5 : f32 to vector<128x8xf32>
    %9 = arith.addf %8, %7 : vector<128x8xf32>
    %10 = arith.divf %8, %9 : vector<128x8xf32>
    %11 = arith.mulf %5, %10 : vector<128x8xf32>
    %12 = arith.truncf %11 : vector<128x8xf32> to vector<128x8xbf16>
    %c0_6 = arith.constant 0 : index
    %c0_7 = arith.constant 0 : index
    %13 = vector.load %arg4[%c0_6, %c0_7] : memref<128x8xbf16, #tpu.memory_space<vmem>>, vector<128x8xbf16>
    tpu.vector_store %arg4[%c0_6, %c0_7], %12 {strides = array<i32>} : memref<128x8xbf16, #tpu.memory_space<vmem>>, vector<128x8xbf16>,
    return
  }
  func.func @transform_0(%arg0: i32) -> (i32, i32) {
    %c0_i32 = arith.constant 0 : i32
    %c0_i32_0 = arith.constant 0 : i32
    return %arg0, %c0_i32 : i32, i32
  }
  func.func @transform_1(%arg0: i32) -> (i32, i32) {
    %c0_i32 = arith.constant 0 : i32
    %c0_i32_0 = arith.constant 0 : i32
    %c0_i32_1 = arith.constant 0 : i32
    return %c0_i32, %c0_i32_0 : i32, i32
  }
  func.func @transform_2(%arg0: i32) -> (i32, i32) {
    %c0_i32 = arith.constant 0 : i32
    %c0_i32_0 = arith.constant 0 : i32
    %c0_i32_1 = arith.constant 0 : i32
    return %c0_i32, %c0_i32_0 : i32, i32
  }
  func.func @transform_3(%arg0: i32) -> (i32, i32) {
    %c0_i32 = arith.constant 0 : i32
    %c0_i32_0 = arith.constant 0 : i32
    return %arg0, %c0_i32 : i32, i32
  }
}

module attributes {stable_mosaic.version = 11 : i64} {
  func.func @_mbconv_kernel(%arg0: i32, %arg1: memref<1x8x8x8xbf16, #tpu.memory_space<vmem>>, %arg2: memref<8x128xbf16, #tpu.memory_space<vmem>>, %arg3: memref<1x128xf32, #tpu.memory_space<vmem>>, %arg4: memref<3x3x128xf32, #tpu.memory_space<vmem>>, %arg5: memref<1x128xf32, #tpu.memory_space<vmem>>, %arg6: memref<128x128xbf16, #tpu.memory_space<vmem>>, %arg7: memref<1x128xf32, #tpu.memory_space<vmem>>, %arg8: memref<128x128xbf16, #tpu.memory_space<vmem>>, %arg9: memref<1x128xf32, #tpu.memory_space<vmem>>, %arg10: memref<128x8xbf16, #tpu.memory_space<vmem>>, %arg11: memref<1x8xf32, #tpu.memory_space<vmem>>, %arg12: memref<1x64x8xbf16, #tpu.memory_space<vmem>>, %arg13: memref<10x10x128xf32, #tpu.memory_space<vmem>>) attributes {dimension_semantics = [#tpu.dimension_semantics<parallel>], iteration_bounds = array<i64: 2>, scalar_prefetch = 0 : i64, scratch_operands = 1 : i64, tpu.core_type = #tpu.core_type<tc>, window_params = [{transform_indices = @transform_0, window_bounds = array<i64: 1, 8, 8, 8>}, {pipeline_mode = #tpu.pipeline_mode<synchronous>, transform_indices = @transform_1, window_bounds = array<i64: 8, 128>}, {pipeline_mode = #tpu.pipeline_mode<synchronous>, transform_indices = @transform_2, window_bounds = array<i64: 1, 128>}, {pipeline_mode = #tpu.pipeline_mode<synchronous>, transform_indices = @transform_3, window_bounds = array<i64: 3, 3, 128>}, {pipeline_mode = #tpu.pipeline_mode<synchronous>, transform_indices = @transform_4, window_bounds = array<i64: 1, 128>}, {pipeline_mode = #tpu.pipeline_mode<synchronous>, transform_indices = @transform_5, window_bounds = array<i64: 128, 128>}, {pipeline_mode = #tpu.pipeline_mode<synchronous>, transform_indices = @transform_6, window_bounds = array<i64: 1, 128>}, {pipeline_mode = #tpu.pipeline_mode<synchronous>, transform_indices = @transform_7, window_bounds = array<i64: 128, 128>}, {pipeline_mode = #tpu.pipeline_mode<synchronous>, transform_indices = @transform_8, window_bounds = array<i64: 1, 128>}, {pipeline_mode = #tpu.pipeline_mode<synchronous>, transform_indices = @transform_9, window_bounds = array<i64: 128, 8>}, {pipeline_mode = #tpu.pipeline_mode<synchronous>, transform_indices = @transform_10, window_bounds = array<i64: 1, 8>}, {transform_indices = @transform_11, window_bounds = array<i64: 1, 64, 8>}]} {
    %c0 = arith.constant 0 : index
    %c0_0 = arith.constant 0 : index
    %c0_1 = arith.constant 0 : index
    %c0_2 = arith.constant 0 : index
    %0 = vector.load %arg1[%c0, %c0_0, %c0_1, %c0_2] : memref<1x8x8x8xbf16, #tpu.memory_space<vmem>>, vector<1x8x8x8xbf16>
    %1 = vector.shape_cast %0 : vector<1x8x8x8xbf16> to vector<8x8x8xbf16>
    %2 = vector.shape_cast %1 : vector<8x8x8xbf16> to vector<64x8xbf16>
    %c0_3 = arith.constant 0 : index
    %c0_4 = arith.constant 0 : index
    %3 = vector.load %arg2[%c0_3, %c0_4] : memref<8x128xbf16, #tpu.memory_space<vmem>>, vector<8x128xbf16>
    %cst = arith.constant dense<0.000000e+00> : vector<64x128xf32>
    %4 = tpu.matmul %2, %3, %cst {dimension_numbers = #tpu.dot_dimension_numbers<[1], [0], [0], [1], [0, 0, 1, 1], [], []>} : vector<64x8xbf16>, vector<8x128xbf16>, vector<64x128xf32> -> vector<64x128xf32>
    %c0_5 = arith.constant 0 : index
    %c0_6 = arith.constant 0 : index
    %5 = vector.load %arg3[%c0_5, %c0_6] : memref<1x128xf32, #tpu.memory_space<vmem>>, vector<1x128xf32>
    %6 = vector.broadcast %5 : vector<1x128xf32> to vector<64x128xf32>
    %7 = arith.addf %4, %6 : vector<64x128xf32>
    %8 = arith.negf %7 : vector<64x128xf32>
    %9 = math.exp %8 : vector<64x128xf32>
    %cst_7 = arith.constant 1.000000e+00 : f32
    %10 = vector.broadcast %cst_7 : f32 to vector<64x128xf32>
    %11 = arith.addf %10, %9 : vector<64x128xf32>
    %12 = arith.divf %10, %11 : vector<64x128xf32>
    %13 = arith.mulf %7, %12 : vector<64x128xf32>
    %cst_8 = arith.constant 0.000000e+00 : f32
    %14 = vector.broadcast %cst_8 : f32 to vector<10x10x128xf32>
    %c0_9 = arith.constant 0 : index
    %c0_10 = arith.constant 0 : index
    %c0_11 = arith.constant 0 : index
    %15 = vector.load %arg13[%c0_9, %c0_10, %c0_11] : memref<10x10x128xf32, #tpu.memory_space<vmem>>, vector<10x10x128xf32>
    tpu.vector_store %arg13[%c0_9, %c0_10, %c0_11], %14 {strides = array<i32>} : memref<10x10x128xf32, #tpu.memory_space<vmem>>, vector<10x10x128xf32>,
    %16 = vector.shape_cast %13 : vector<64x128xf32> to vector<8x8x128xf32>
    %c1 = arith.constant 1 : index
    %c1_12 = arith.constant 1 : index
    %c0_13 = arith.constant 0 : index
    %17 = vector.load %arg13[%c1, %c1_12, %c0_13] : memref<10x10x128xf32, #tpu.memory_space<vmem>>, vector<8x8x128xf32>
    tpu.vector_store %arg13[%c1, %c1_12, %c0_13], %16 {strides = array<i32>} : memref<10x10x128xf32, #tpu.memory_space<vmem>>, vector<8x8x128xf32>,
    %c0_14 = arith.constant 0 : index
    %c0_15 = arith.constant 0 : index
    %c0_16 = arith.constant 0 : index
    %18 = vector.load %arg13[%c0_14, %c0_15, %c0_16] : memref<10x10x128xf32, #tpu.memory_space<vmem>>, vector<10x10x128xf32>
    %c0_17 = arith.constant 0 : index
    %c0_18 = arith.constant 0 : index
    %c0_19 = arith.constant 0 : index
    %19 = vector.load %arg4[%c0_17, %c0_18, %c0_19] : memref<3x3x128xf32, #tpu.memory_space<vmem>>, vector<3x3x128xf32>
    %cst_20 = arith.constant 0.000000e+00 : f32
    %20 = vector.broadcast %cst_20 : f32 to vector<8x8x128xf32>
    %21 = vector.extract_strided_slice %18 {offsets = [0, 0, 0], sizes = [8, 8, 128], strides = [1, 1, 1]} : vector<10x10x128xf32> to vector<8x8x128xf32>
    %22 = vector.extract_strided_slice %19 {offsets = [0, 0, 0], sizes = [1, 1, 128], strides = [1, 1, 1]} : vector<3x3x128xf32> to vector<1x1x128xf32>
    %23 = vector.shape_cast %22 : vector<1x1x128xf32> to vector<128xf32>
    %24 = vector.shape_cast %23 : vector<128xf32> to vector<1x1x128xf32>
    %25 = vector.broadcast %24 : vector<1x1x128xf32> to vector<8x8x128xf32>
    %26 = arith.mulf %21, %25 : vector<8x8x128xf32>
    %27 = arith.addf %20, %26 : vector<8x8x128xf32>
    %28 = vector.extract_strided_slice %18 {offsets = [0, 1, 0], sizes = [8, 8, 128], strides = [1, 1, 1]} : vector<10x10x128xf32> to vector<8x8x128xf32>
    %29 = vector.extract_strided_slice %19 {offsets = [0, 1, 0], sizes = [1, 1, 128], strides = [1, 1, 1]} : vector<3x3x128xf32> to vector<1x1x128xf32>
    %30 = vector.shape_cast %29 : vector<1x1x128xf32> to vector<128xf32>
    %31 = vector.shape_cast %30 : vector<128xf32> to vector<1x1x128xf32>
    %32 = vector.broadcast %31 : vector<1x1x128xf32> to vector<8x8x128xf32>
    %33 = arith.mulf %28, %32 : vector<8x8x128xf32>
    %34 = arith.addf %27, %33 : vector<8x8x128xf32>
    %35 = vector.extract_strided_slice %18 {offsets = [0, 2, 0], sizes = [8, 8, 128], strides = [1, 1, 1]} : vector<10x10x128xf32> to vector<8x8x128xf32>
    %36 = vector.extract_strided_slice %19 {offsets = [0, 2, 0], sizes = [1, 1, 128], strides = [1, 1, 1]} : vector<3x3x128xf32> to vector<1x1x128xf32>
    %37 = vector.shape_cast %36 : vector<1x1x128xf32> to vector<128xf32>
    %38 = vector.shape_cast %37 : vector<128xf32> to vector<1x1x128xf32>
    %39 = vector.broadcast %38 : vector<1x1x128xf32> to vector<8x8x128xf32>
    %40 = arith.mulf %35, %39 : vector<8x8x128xf32>
    %41 = arith.addf %34, %40 : vector<8x8x128xf32>
    %42 = vector.extract_strided_slice %18 {offsets = [1, 0, 0], sizes = [8, 8, 128], strides = [1, 1, 1]} : vector<10x10x128xf32> to vector<8x8x128xf32>
    %43 = vector.extract_strided_slice %19 {offsets = [1, 0, 0], sizes = [1, 1, 128], strides = [1, 1, 1]} : vector<3x3x128xf32> to vector<1x1x128xf32>
    %44 = vector.shape_cast %43 : vector<1x1x128xf32> to vector<128xf32>
    %45 = vector.shape_cast %44 : vector<128xf32> to vector<1x1x128xf32>
    %46 = vector.broadcast %45 : vector<1x1x128xf32> to vector<8x8x128xf32>
    %47 = arith.mulf %42, %46 : vector<8x8x128xf32>
    %48 = arith.addf %41, %47 : vector<8x8x128xf32>
    %49 = vector.extract_strided_slice %18 {offsets = [1, 1, 0], sizes = [8, 8, 128], strides = [1, 1, 1]} : vector<10x10x128xf32> to vector<8x8x128xf32>
    %50 = vector.extract_strided_slice %19 {offsets = [1, 1, 0], sizes = [1, 1, 128], strides = [1, 1, 1]} : vector<3x3x128xf32> to vector<1x1x128xf32>
    %51 = vector.shape_cast %50 : vector<1x1x128xf32> to vector<128xf32>
    %52 = vector.shape_cast %51 : vector<128xf32> to vector<1x1x128xf32>
    %53 = vector.broadcast %52 : vector<1x1x128xf32> to vector<8x8x128xf32>
    %54 = arith.mulf %49, %53 : vector<8x8x128xf32>
    %55 = arith.addf %48, %54 : vector<8x8x128xf32>
    %56 = vector.extract_strided_slice %18 {offsets = [1, 2, 0], sizes = [8, 8, 128], strides = [1, 1, 1]} : vector<10x10x128xf32> to vector<8x8x128xf32>
    %57 = vector.extract_strided_slice %19 {offsets = [1, 2, 0], sizes = [1, 1, 128], strides = [1, 1, 1]} : vector<3x3x128xf32> to vector<1x1x128xf32>
    %58 = vector.shape_cast %57 : vector<1x1x128xf32> to vector<128xf32>
    %59 = vector.shape_cast %58 : vector<128xf32> to vector<1x1x128xf32>
    %60 = vector.broadcast %59 : vector<1x1x128xf32> to vector<8x8x128xf32>
    %61 = arith.mulf %56, %60 : vector<8x8x128xf32>
    %62 = arith.addf %55, %61 : vector<8x8x128xf32>
    %63 = vector.extract_strided_slice %18 {offsets = [2, 0, 0], sizes = [8, 8, 128], strides = [1, 1, 1]} : vector<10x10x128xf32> to vector<8x8x128xf32>
    %64 = vector.extract_strided_slice %19 {offsets = [2, 0, 0], sizes = [1, 1, 128], strides = [1, 1, 1]} : vector<3x3x128xf32> to vector<1x1x128xf32>
    %65 = vector.shape_cast %64 : vector<1x1x128xf32> to vector<128xf32>
    %66 = vector.shape_cast %65 : vector<128xf32> to vector<1x1x128xf32>
    %67 = vector.broadcast %66 : vector<1x1x128xf32> to vector<8x8x128xf32>
    %68 = arith.mulf %63, %67 : vector<8x8x128xf32>
    %69 = arith.addf %62, %68 : vector<8x8x128xf32>
    %70 = vector.extract_strided_slice %18 {offsets = [2, 1, 0], sizes = [8, 8, 128], strides = [1, 1, 1]} : vector<10x10x128xf32> to vector<8x8x128xf32>
    %71 = vector.extract_strided_slice %19 {offsets = [2, 1, 0], sizes = [1, 1, 128], strides = [1, 1, 1]} : vector<3x3x128xf32> to vector<1x1x128xf32>
    %72 = vector.shape_cast %71 : vector<1x1x128xf32> to vector<128xf32>
    %73 = vector.shape_cast %72 : vector<128xf32> to vector<1x1x128xf32>
    %74 = vector.broadcast %73 : vector<1x1x128xf32> to vector<8x8x128xf32>
    %75 = arith.mulf %70, %74 : vector<8x8x128xf32>
    %76 = arith.addf %69, %75 : vector<8x8x128xf32>
    %77 = vector.extract_strided_slice %18 {offsets = [2, 2, 0], sizes = [8, 8, 128], strides = [1, 1, 1]} : vector<10x10x128xf32> to vector<8x8x128xf32>
    %78 = vector.extract_strided_slice %19 {offsets = [2, 2, 0], sizes = [1, 1, 128], strides = [1, 1, 1]} : vector<3x3x128xf32> to vector<1x1x128xf32>
    %79 = vector.shape_cast %78 : vector<1x1x128xf32> to vector<128xf32>
    %80 = vector.shape_cast %79 : vector<128xf32> to vector<1x1x128xf32>
    %81 = vector.broadcast %80 : vector<1x1x128xf32> to vector<8x8x128xf32>
    %82 = arith.mulf %77, %81 : vector<8x8x128xf32>
    %83 = arith.addf %76, %82 : vector<8x8x128xf32>
    %c0_21 = arith.constant 0 : index
    %c0_22 = arith.constant 0 : index
    %84 = vector.load %arg5[%c0_21, %c0_22] : memref<1x128xf32, #tpu.memory_space<vmem>>, vector<1x128xf32>
    %85 = vector.shape_cast %84 : vector<1x128xf32> to vector<1x1x128xf32>
    %86 = vector.broadcast %85 : vector<1x1x128xf32> to vector<8x8x128xf32>
    %87 = arith.addf %83, %86 : vector<8x8x128xf32>
    %88 = arith.negf %87 : vector<8x8x128xf32>
    %89 = math.exp %88 : vector<8x8x128xf32>
    %cst_23 = arith.constant 1.000000e+00 : f32
    %90 = vector.broadcast %cst_23 : f32 to vector<8x8x128xf32>
    %91 = arith.addf %90, %89 : vector<8x8x128xf32>
    %92 = arith.divf %90, %91 : vector<8x8x128xf32>
    %93 = arith.mulf %87, %92 : vector<8x8x128xf32>
    %94 = vector.shape_cast %93 : vector<8x8x128xf32> to vector<64x128xf32>
    %cst_24 = arith.constant dense<0.000000e+00> : vector<128xf32>
    %95 = vector.multi_reduction <add>, %94, %cst_24 [0] : vector<64x128xf32> to vector<128xf32>
    %96 = vector.shape_cast %95 : vector<128xf32> to vector<1x128xf32>
    %cst_25 = arith.constant 1.562500e-02 : f32
    %97 = vector.broadcast %cst_25 : f32 to vector<1x128xf32>
    %98 = arith.mulf %96, %97 : vector<1x128xf32>
    %99 = arith.truncf %98 : vector<1x128xf32> to vector<1x128xbf16>
    %c0_26 = arith.constant 0 : index
    %c0_27 = arith.constant 0 : index
    %100 = vector.load %arg6[%c0_26, %c0_27] : memref<128x128xbf16, #tpu.memory_space<vmem>>, vector<128x128xbf16>
    %cst_28 = arith.constant dense<0.000000e+00> : vector<1x128xf32>
    %101 = tpu.matmul %99, %100, %cst_28 {dimension_numbers = #tpu.dot_dimension_numbers<[1], [0], [0], [1], [0, 0, 1, 1], [], []>} : vector<1x128xbf16>, vector<128x128xbf16>, vector<1x128xf32> -> vector<1x128xf32>
    %c0_29 = arith.constant 0 : index
    %c0_30 = arith.constant 0 : index
    %102 = vector.load %arg7[%c0_29, %c0_30] : memref<1x128xf32, #tpu.memory_space<vmem>>, vector<1x128xf32>
    %103 = arith.addf %101, %102 : vector<1x128xf32>
    %104 = arith.negf %103 : vector<1x128xf32>
    %105 = math.exp %104 : vector<1x128xf32>
    %cst_31 = arith.constant 1.000000e+00 : f32
    %106 = vector.broadcast %cst_31 : f32 to vector<1x128xf32>
    %107 = arith.addf %106, %105 : vector<1x128xf32>
    %108 = arith.divf %106, %107 : vector<1x128xf32>
    %109 = arith.mulf %103, %108 : vector<1x128xf32>
    %110 = arith.truncf %109 : vector<1x128xf32> to vector<1x128xbf16>
    %c0_32 = arith.constant 0 : index
    %c0_33 = arith.constant 0 : index
    %111 = vector.load %arg8[%c0_32, %c0_33] : memref<128x128xbf16, #tpu.memory_space<vmem>>, vector<128x128xbf16>
    %cst_34 = arith.constant dense<0.000000e+00> : vector<1x128xf32>
    %112 = tpu.matmul %110, %111, %cst_34 {dimension_numbers = #tpu.dot_dimension_numbers<[1], [0], [0], [1], [0, 0, 1, 1], [], []>} : vector<1x128xbf16>, vector<128x128xbf16>, vector<1x128xf32> -> vector<1x128xf32>
    %c0_35 = arith.constant 0 : index
    %c0_36 = arith.constant 0 : index
    %113 = vector.load %arg9[%c0_35, %c0_36] : memref<1x128xf32, #tpu.memory_space<vmem>>, vector<1x128xf32>
    %114 = arith.addf %112, %113 : vector<1x128xf32>
    %115 = arith.negf %114 : vector<1x128xf32>
    %116 = math.exp %115 : vector<1x128xf32>
    %cst_37 = arith.constant 1.000000e+00 : f32
    %117 = vector.broadcast %cst_37 : f32 to vector<1x128xf32>
    %118 = arith.addf %117, %116 : vector<1x128xf32>
    %119 = arith.divf %117, %118 : vector<1x128xf32>
    %120 = vector.broadcast %119 : vector<1x128xf32> to vector<64x128xf32>
    %121 = arith.mulf %94, %120 : vector<64x128xf32>
    %122 = arith.truncf %121 : vector<64x128xf32> to vector<64x128xbf16>
    %c0_38 = arith.constant 0 : index
    %c0_39 = arith.constant 0 : index
    %123 = vector.load %arg10[%c0_38, %c0_39] : memref<128x8xbf16, #tpu.memory_space<vmem>>, vector<128x8xbf16>
    %cst_40 = arith.constant dense<0.000000e+00> : vector<64x8xf32>
    %124 = tpu.matmul %122, %123, %cst_40 {dimension_numbers = #tpu.dot_dimension_numbers<[1], [0], [0], [1], [0, 0, 1, 1], [], []>} : vector<64x128xbf16>, vector<128x8xbf16>, vector<64x8xf32> -> vector<64x8xf32>
    %c0_41 = arith.constant 0 : index
    %c0_42 = arith.constant 0 : index
    %125 = vector.load %arg11[%c0_41, %c0_42] : memref<1x8xf32, #tpu.memory_space<vmem>>, vector<1x8xf32>
    %126 = vector.broadcast %125 : vector<1x8xf32> to vector<64x8xf32>
    %127 = arith.addf %124, %126 : vector<64x8xf32>
    %128 = arith.extf %2 : vector<64x8xbf16> to vector<64x8xf32>
    %129 = arith.addf %127, %128 : vector<64x8xf32>
    %130 = arith.truncf %129 : vector<64x8xf32> to vector<64x8xbf16>
    %c0_43 = arith.constant 0 : index
    %c0_44 = arith.constant 0 : index
    %c0_45 = arith.constant 0 : index
    %131 = vector.load %arg12[%c0_43, %c0_44, %c0_45] : memref<1x64x8xbf16, #tpu.memory_space<vmem>>, vector<1x64x8xbf16>
    %132 = vector.shape_cast %131 : vector<1x64x8xbf16> to vector<64x8xbf16>
    %133 = vector.shape_cast %130 : vector<64x8xbf16> to vector<1x64x8xbf16>
    tpu.vector_store %arg12[%c0_43, %c0_44, %c0_45], %133 {strides = array<i32>} : memref<1x64x8xbf16, #tpu.memory_space<vmem>>, vector<1x64x8xbf16>,
    return
  }
  func.func @transform_0(%arg0: i32) -> (i32, i32, i32, i32) {
    %c0_i32 = arith.constant 0 : i32
    %c0_i32_0 = arith.constant 0 : i32
    %c0_i32_1 = arith.constant 0 : i32
    %c0_i32_2 = arith.constant 0 : i32
    return %arg0, %c0_i32, %c0_i32_0, %c0_i32_1 : i32, i32, i32, i32
  }
  func.func @transform_1(%arg0: i32) -> (i32, i32) {
    %c0_i32 = arith.constant 0 : i32
    %c0_i32_0 = arith.constant 0 : i32
    %c0_i32_1 = arith.constant 0 : i32
    return %c0_i32, %c0_i32_0 : i32, i32
  }
  func.func @transform_2(%arg0: i32) -> (i32, i32) {
    %c0_i32 = arith.constant 0 : i32
    %c0_i32_0 = arith.constant 0 : i32
    %c0_i32_1 = arith.constant 0 : i32
    return %c0_i32, %c0_i32_0 : i32, i32
  }
  func.func @transform_3(%arg0: i32) -> (i32, i32, i32) {
    %c0_i32 = arith.constant 0 : i32
    %c0_i32_0 = arith.constant 0 : i32
    %c0_i32_1 = arith.constant 0 : i32
    %c0_i32_2 = arith.constant 0 : i32
    return %c0_i32, %c0_i32_0, %c0_i32_1 : i32, i32, i32
  }
  func.func @transform_4(%arg0: i32) -> (i32, i32) {
    %c0_i32 = arith.constant 0 : i32
    %c0_i32_0 = arith.constant 0 : i32
    %c0_i32_1 = arith.constant 0 : i32
    return %c0_i32, %c0_i32_0 : i32, i32
  }
  func.func @transform_5(%arg0: i32) -> (i32, i32) {
    %c0_i32 = arith.constant 0 : i32
    %c0_i32_0 = arith.constant 0 : i32
    %c0_i32_1 = arith.constant 0 : i32
    return %c0_i32, %c0_i32_0 : i32, i32
  }
  func.func @transform_6(%arg0: i32) -> (i32, i32) {
    %c0_i32 = arith.constant 0 : i32
    %c0_i32_0 = arith.constant 0 : i32
    %c0_i32_1 = arith.constant 0 : i32
    return %c0_i32, %c0_i32_0 : i32, i32
  }
  func.func @transform_7(%arg0: i32) -> (i32, i32) {
    %c0_i32 = arith.constant 0 : i32
    %c0_i32_0 = arith.constant 0 : i32
    %c0_i32_1 = arith.constant 0 : i32
    return %c0_i32, %c0_i32_0 : i32, i32
  }
  func.func @transform_8(%arg0: i32) -> (i32, i32) {
    %c0_i32 = arith.constant 0 : i32
    %c0_i32_0 = arith.constant 0 : i32
    %c0_i32_1 = arith.constant 0 : i32
    return %c0_i32, %c0_i32_0 : i32, i32
  }
  func.func @transform_9(%arg0: i32) -> (i32, i32) {
    %c0_i32 = arith.constant 0 : i32
    %c0_i32_0 = arith.constant 0 : i32
    %c0_i32_1 = arith.constant 0 : i32
    return %c0_i32, %c0_i32_0 : i32, i32
  }
  func.func @transform_10(%arg0: i32) -> (i32, i32) {
    %c0_i32 = arith.constant 0 : i32
    %c0_i32_0 = arith.constant 0 : i32
    %c0_i32_1 = arith.constant 0 : i32
    return %c0_i32, %c0_i32_0 : i32, i32
  }
  func.func @transform_11(%arg0: i32) -> (i32, i32, i32) {
    %c0_i32 = arith.constant 0 : i32
    %c0_i32_0 = arith.constant 0 : i32
    %c0_i32_1 = arith.constant 0 : i32
    return %arg0, %c0_i32, %c0_i32_0 : i32, i32, i32
  }
}

module attributes {stable_mosaic.version = 11 : i64} {
  func.func @_head_pool_fc_kernel(%arg0: i32, %arg1: i32, %arg2: memref<1x64x8xbf16, #tpu.memory_space<vmem>>, %arg3: memref<8x128xbf16, #tpu.memory_space<vmem>>, %arg4: memref<1x128xf32, #tpu.memory_space<vmem>>, %arg5: memref<128x128xbf16, #tpu.memory_space<vmem>>, %arg6: memref<1x128xf32, #tpu.memory_space<vmem>>, %arg7: memref<1x1x128xf32, #tpu.memory_space<vmem>>, %arg8: memref<1x128xf32, #tpu.memory_space<vmem>>) attributes {dimension_semantics = [#tpu.dimension_semantics<parallel>, #tpu.dimension_semantics<arbitrary>], iteration_bounds = array<i64: 2, 1>, scalar_prefetch = 0 : i64, scratch_operands = 1 : i64, tpu.core_type = #tpu.core_type<tc>, window_params = [{transform_indices = @transform_0, window_bounds = array<i64: 1, 64, 8>}, {pipeline_mode = #tpu.pipeline_mode<synchronous>, transform_indices = @transform_1, window_bounds = array<i64: 8, 128>}, {pipeline_mode = #tpu.pipeline_mode<synchronous>, transform_indices = @transform_2, window_bounds = array<i64: 1, 128>}, {pipeline_mode = #tpu.pipeline_mode<synchronous>, transform_indices = @transform_3, window_bounds = array<i64: 128, 128>}, {pipeline_mode = #tpu.pipeline_mode<synchronous>, transform_indices = @transform_4, window_bounds = array<i64: 1, 128>}, {transform_indices = @transform_5, window_bounds = array<i64: 1, 1, 128>}]} {
    %c0_i32 = arith.constant 0 : i32
    %0 = arith.cmpi eq, %arg1, %c0_i32 : i32
    %1 = arith.extui %0 : i1 to i32
    %c0_i32_0 = arith.constant 0 : i32
    %2 = arith.cmpi ne, %1, %c0_i32_0 : i32
    scf.if %2 {
      %cst_17 = arith.constant 0.000000e+00 : f32
      %32 = vector.broadcast %cst_17 : f32 to vector<1x128xf32>
      %c0_18 = arith.constant 0 : index
      %c0_19 = arith.constant 0 : index
      %33 = vector.load %arg8[%c0_18, %c0_19] : memref<1x128xf32, #tpu.memory_space<vmem>>, vector<1x128xf32>
      tpu.vector_store %arg8[%c0_18, %c0_19], %32 {strides = array<i32>} : memref<1x128xf32, #tpu.memory_space<vmem>>, vector<1x128xf32>,
    } else {
    }
    %c0 = arith.constant 0 : index
    %c0_1 = arith.constant 0 : index
    %c0_2 = arith.constant 0 : index
    %3 = vector.load %arg2[%c0, %c0_1, %c0_2] : memref<1x64x8xbf16, #tpu.memory_space<vmem>>, vector<1x64x8xbf16>
    %4 = vector.shape_cast %3 : vector<1x64x8xbf16> to vector<64x8xbf16>
    %c0_3 = arith.constant 0 : index
    %c0_4 = arith.constant 0 : index
    %5 = vector.load %arg3[%c0_3, %c0_4] : memref<8x128xbf16, #tpu.memory_space<vmem>>, vector<8x128xbf16>
    %cst = arith.constant dense<0.000000e+00> : vector<64x128xf32>
    %6 = tpu.matmul %4, %5, %cst {dimension_numbers = #tpu.dot_dimension_numbers<[1], [0], [0], [1], [0, 0, 1, 1], [], []>} : vector<64x8xbf16>, vector<8x128xbf16>, vector<64x128xf32> -> vector<64x128xf32>
    %c0_5 = arith.constant 0 : index
    %c0_6 = arith.constant 0 : index
    %7 = vector.load %arg4[%c0_5, %c0_6] : memref<1x128xf32, #tpu.memory_space<vmem>>, vector<1x128xf32>
    %8 = vector.broadcast %7 : vector<1x128xf32> to vector<64x128xf32>
    %9 = arith.addf %6, %8 : vector<64x128xf32>
    %10 = arith.negf %9 : vector<64x128xf32>
    %11 = math.exp %10 : vector<64x128xf32>
    %cst_7 = arith.constant 1.000000e+00 : f32
    %12 = vector.broadcast %cst_7 : f32 to vector<64x128xf32>
    %13 = arith.addf %12, %11 : vector<64x128xf32>
    %14 = arith.divf %12, %13 : vector<64x128xf32>
    %15 = arith.mulf %9, %14 : vector<64x128xf32>
    %16 = tpu.iota {dimensions = array<i32: 0>} : vector<64x128xi32>
    %c64_i32 = arith.constant 64 : i32
    %17 = arith.muli %arg1, %c64_i32 : i32
    %18 = vector.broadcast %17 : i32 to vector<64x128xi32>
    %19 = arith.addi %16, %18 : vector<64x128xi32>
    %c64_i32_8 = arith.constant 64 : i32
    %20 = vector.broadcast %c64_i32_8 : i32 to vector<64x128xi32>
    %21 = arith.cmpi slt, %19, %20 : vector<64x128xi32>
    %cst_9 = arith.constant 0.000000e+00 : f32
    %22 = vector.broadcast %cst_9 : f32 to vector<64x128xf32>
    %23 = arith.select %21, %15, %22 : vector<64x128xi1>, vector<64x128xf32>
    %c0_10 = arith.constant 0 : index
    %c0_11 = arith.constant 0 : index
    %24 = vector.load %arg8[%c0_10, %c0_11] : memref<1x128xf32, #tpu.memory_space<vmem>>, vector<1x128xf32>
    %cst_12 = arith.constant dense<0.000000e+00> : vector<128xf32>
    %25 = vector.multi_reduction <add>, %23, %cst_12 [0] : vector<64x128xf32> to vector<128xf32>
    %26 = vector.shape_cast %25 : vector<128xf32> to vector<1x128xf32>
    %27 = arith.addf %24, %26 : vector<1x128xf32>
    %c0_13 = arith.constant 0 : index
    %c0_14 = arith.constant 0 : index
    %28 = vector.load %arg8[%c0_13, %c0_14] : memref<1x128xf32, #tpu.memory_space<vmem>>, vector<1x128xf32>
    tpu.vector_store %arg8[%c0_13, %c0_14], %27 {strides = array<i32>} : memref<1x128xf32, #tpu.memory_space<vmem>>, vector<1x128xf32>,
    %c0_i32_15 = arith.constant 0 : i32
    %29 = arith.cmpi eq, %arg1, %c0_i32_15 : i32
    %30 = arith.extui %29 : i1 to i32
    %c0_i32_16 = arith.constant 0 : i32
    %31 = arith.cmpi ne, %30, %c0_i32_16 : i32
    scf.if %31 {
      %c0_17 = arith.constant 0 : index
      %c0_18 = arith.constant 0 : index
      %32 = vector.load %arg8[%c0_17, %c0_18] : memref<1x128xf32, #tpu.memory_space<vmem>>, vector<1x128xf32>
      %cst_19 = arith.constant 1.562500e-02 : f32
      %33 = vector.broadcast %cst_19 : f32 to vector<1x128xf32>
      %34 = arith.mulf %32, %33 : vector<1x128xf32>
      %35 = arith.truncf %34 : vector<1x128xf32> to vector<1x128xbf16>
      %c0_20 = arith.constant 0 : index
      %c0_21 = arith.constant 0 : index
      %36 = vector.load %arg5[%c0_20, %c0_21] : memref<128x128xbf16, #tpu.memory_space<vmem>>, vector<128x128xbf16>
      %cst_22 = arith.constant dense<0.000000e+00> : vector<1x128xf32>
      %37 = tpu.matmul %35, %36, %cst_22 {dimension_numbers = #tpu.dot_dimension_numbers<[1], [0], [0], [1], [0, 0, 1, 1], [], []>} : vector<1x128xbf16>, vector<128x128xbf16>, vector<1x128xf32> -> vector<1x128xf32>
      %c0_23 = arith.constant 0 : index
      %c0_24 = arith.constant 0 : index
      %38 = vector.load %arg6[%c0_23, %c0_24] : memref<1x128xf32, #tpu.memory_space<vmem>>, vector<1x128xf32>
      %39 = arith.addf %37, %38 : vector<1x128xf32>
      %40 = arith.negf %39 : vector<1x128xf32>
      %41 = math.exp %40 : vector<1x128xf32>
      %cst_25 = arith.constant 1.000000e+00 : f32
      %42 = vector.broadcast %cst_25 : f32 to vector<1x128xf32>
      %43 = arith.addf %42, %41 : vector<1x128xf32>
      %44 = arith.divf %42, %43 : vector<1x128xf32>
      %c0_26 = arith.constant 0 : index
      %c0_27 = arith.constant 0 : index
      %c0_28 = arith.constant 0 : index
      %45 = vector.load %arg7[%c0_26, %c0_27, %c0_28] : memref<1x1x128xf32, #tpu.memory_space<vmem>>, vector<1x1x128xf32>
      %46 = vector.shape_cast %45 : vector<1x1x128xf32> to vector<1x128xf32>
      %47 = vector.shape_cast %44 : vector<1x128xf32> to vector<1x1x128xf32>
      tpu.vector_store %arg7[%c0_26, %c0_27, %c0_28], %47 {strides = array<i32>} : memref<1x1x128xf32, #tpu.memory_space<vmem>>, vector<1x1x128xf32>,
    } else {
    }
    return
  }
  func.func @transform_0(%arg0: i32, %arg1: i32) -> (i32, i32, i32) {
    %c0_i32 = arith.constant 0 : i32
    %c0_i32_0 = arith.constant 0 : i32
    return %arg0, %arg1, %c0_i32 : i32, i32, i32
  }
  func.func @transform_1(%arg0: i32, %arg1: i32) -> (i32, i32) {
    %c0_i32 = arith.constant 0 : i32
    %c0_i32_0 = arith.constant 0 : i32
    %c0_i32_1 = arith.constant 0 : i32
    return %c0_i32, %c0_i32_0 : i32, i32
  }
  func.func @transform_2(%arg0: i32, %arg1: i32) -> (i32, i32) {
    %c0_i32 = arith.constant 0 : i32
    %c0_i32_0 = arith.constant 0 : i32
    %c0_i32_1 = arith.constant 0 : i32
    return %c0_i32, %c0_i32_0 : i32, i32
  }
  func.func @transform_3(%arg0: i32, %arg1: i32) -> (i32, i32) {
    %c0_i32 = arith.constant 0 : i32
    %c0_i32_0 = arith.constant 0 : i32
    %c0_i32_1 = arith.constant 0 : i32
    return %c0_i32, %c0_i32_0 : i32, i32
  }
  func.func @transform_4(%arg0: i32, %arg1: i32) -> (i32, i32) {
    %c0_i32 = arith.constant 0 : i32
    %c0_i32_0 = arith.constant 0 : i32
    %c0_i32_1 = arith.constant 0 : i32
    return %c0_i32, %c0_i32_0 : i32, i32
  }
  func.func @transform_5(%arg0: i32, %arg1: i32) -> (i32, i32, i32) {
    %c0_i32 = arith.constant 0 : i32
    %c0_i32_0 = arith.constant 0 : i32
    %c0_i32_1 = arith.constant 0 : i32
    return %arg0, %c0_i32, %c0_i32_0 : i32, i32, i32
  }
}

</mosaic_0001>

<bundles_post_ra>
// kernel: custom_efficientnet_forward.3
= control target key start
LH: loop header
LB: loop body
LE: loop exit
PB: predicated region body
PF: predicated region fallthrough
CT: control target
= control target key end

     0   :  { %vm91_vm0 = vcmask 261120   ;;  %vm501_vm6 = vcmask 60416   ;;  %s1088_s1 = inlined_call_operand.vmem [shape: bf16[32,8], index: 1, kind: input, shape index: {}]   ;;  %s1089_s0 = inlined_call_operand.vmem [shape: bf16[128,32], index: 0, kind: input, shape index: {}]   ;;  %s1090_s2 = inlined_call_operand.vmem [shape: f32[1,8], index: 2, kind: input, shape index: {}]   ;;  %s1091_s3 = inlined_call_operand.vmem [shape: bf16[128,8], index: 3, kind: output, shape index: {}]  }
   0x1   :  { %v595_v0 = vld [vmem:[%s1088_s1 + $0x8] sm:$0xff]  ;;  %v594_v1 = vld [vmem:[%s1088_s1] sm:$0xff]  ;;  %v588_v3 = vld [vmem:[%s1089_s0 + $0x10] sm:$0xff] }
   0x2   :  { %122 = vmatpush.bf16.msra.mxu0 %v595_v0  ;;  %596 = vmatpush.bf16.msra.mxu1 %v595_v0  ;;  %v586_v2 = vld [vmem:[%s1089_s0] sm:$0xff]  ;;  %v592_v5 = vld [vmem:[%s1089_s0 + $0x30] sm:$0xff]  ;;  %v587_v6 = vld [vmem:[%s1089_s0 + $0x8] sm:$0xff] }
   0x3   :  { %597 = vmatpush.bf16.msra.mxu2 %v595_v0  ;;  %598 = vmatpush.bf16.msra.mxu3 %v595_v0  ;;  %v590_v4 = vld [vmem:[%s1089_s0 + $0x20] sm:$0xff]  ;;  %v589_v7 = vld [vmem:[%s1089_s0 + $0x18] sm:$0xff]  ;;  %v591_v8 = vld [vmem:[%s1089_s0 + $0x28] sm:$0xff] }
   0x4   :  { %v593_v9 = vld [vmem:[%s1089_s0 + $0x38] sm:$0xff]  ;;  %v728_v10 = vld [vmem:[%s1090_s2] ss:$0 sm:$0xff] }
   0x6   :  { %123 = vmatpush.bf16.msra.mxu0 %v594_v1  ;;  %599 = vmatpush.bf16.msra.mxu1 %v594_v1 }
   0x7   :  { %600 = vmatpush.bf16.msra.mxu2 %v594_v1  ;;  %601 = vmatpush.bf16.msra.mxu3 %v594_v1 }
   0x9   :  { %562 = vmatmul.msk.bf16.vlgmr.msra.gmra.mxu0 %vm91_vm0, %v586_v2  ;;  %564 = vmatmul.msk.bf16.vlgmr.msra.gmra.mxu1 %vm91_vm0, %v588_v3 }
   0xa   :  { %566 = vmatmul.msk.bf16.vlgmr.msra.gmra.mxu2 %vm91_vm0, %v590_v4  ;;  %568 = vmatmul.msk.bf16.vlgmr.msra.gmra.mxu3 %vm91_vm0, %v592_v5 }
  0x19   :  { %563 = vmatmul.msk.bf16.gmra.mxu0 %vm91_vm0, %v587_v6  ;;  %565 = vmatmul.msk.bf16.gmra.mxu1 %vm91_vm0, %v589_v7 }
  0x1a   :  { %567 = vmatmul.msk.bf16.gmra.mxu2 %vm91_vm0, %v591_v8  ;;  %569 = vmatmul.msk.bf16.gmra.mxu3 %vm91_vm0, %v593_v9 }
  0x86   :  { %v125_v11 = vpop.f32.mrf.mxu0  ;;  %v135_v12 = vpop.f32.mrf.mxu1 }
  0x87   :  { %v731_v13 = vadd.f32 %v728_v10, %v125_v11  ;;  %v734_v14 = vadd.f32 %v728_v10, %v135_v12 }
  0x89   :  { %v570_v15 = vmul.f32 -1.442695, %v731_v13  ;;  %v574_v16 = vmul.f32 -1.442695, %v734_v14 }
  0x8b   :  { %603 = vpow2.f32 %v570_v15 }
  0x8c   :  { %605 = vpow2.f32 %v574_v16 }
  0x8d   :  { %v145_v17 = vpop.f32.mrf.mxu2  ;;  %v155_v18 = vpop.f32.mrf.mxu3 }
  0x8e   :  { %v739_v19 = vadd.f32 %v728_v10, %v145_v17  ;;  %v742_v20 = vadd.f32 %v728_v10, %v155_v18  ;;  %v127_v21 = vpop.f32.mrf.mxu0  ;;  %v137_v22 = vpop.f32.mrf.mxu1 }
  0x8f   :  { %v745_v23 = vadd.f32 %v728_v10, %v127_v21  ;;  %v748_v24 = vadd.f32 %v728_v10, %v137_v22 }
  0x90   :  { %v578_v25 = vmul.f32 -1.442695, %v739_v19  ;;  %v582_v26 = vmul.f32 -1.442695, %v742_v20 }
  0x91   :  { %v604_v27 = vpop.eup %603  ;;  %v571_v30 = vmul.f32 -1.442695, %v745_v23  ;;  %v575_v32 = vmul.f32 -1.442695, %v748_v24 }
  0x92   :  { %v606_v28 = vpop.eup %605  ;;  %v752_v29 = vadd.f32 1.0, %v604_v27  ;;  %607 = vpow2.f32 %v578_v25 }
  0x93   :  { %v755_v31 = vadd.f32 1.0, %v606_v28  ;;  %609 = vpow2.f32 %v582_v26 }
  0x94   :  { %611 = vrcp.f32 %v752_v29  ;;  %v238_v37 = vand.u32 2147483647, %v752_v29  ;;  %v240_v38 = vand.u32 2147483648, %v752_v29  ;;  %vm234_vm1 = vweird.f32 %v752_v29 }
  0x95   :  { %613 = vrcp.f32 %v755_v31  ;;  %v147_v33 = vpop.f32.mrf.mxu2  ;;  %v157_v34 = vpop.f32.mrf.mxu3  ;;  %v298_v40 = vand.u32 2147483647, %v755_v31  ;;  %v300_v41 = vand.u32 2147483648, %v755_v31  ;;  %vm294_vm2 = vweird.f32 %v755_v31 }
  0x96   :  { %615 = vpow2.f32 %v571_v30  ;;  %v761_v35 = vadd.f32 %v728_v10, %v147_v33  ;;  %v130_v36 = vpop.f32.mrf.mxu0  ;;  %v769_v43 = vadd.f32 %v728_v10, %v157_v34  ;;  %v140_v49 = vpop.f32.mrf.mxu1  ;;  %vm781_vm3 = vcmp.eq.f32.partialorder %v238_v37, 8.507059e+37 }
  0x97   :  { %617 = vpow2.f32 %v575_v32  ;;  %v774_v46 = vadd.f32 %v728_v10, %v130_v36  ;;  %v241_v53 = vor.u32 1.1754944e-38, %v240_v38  ;;  %vm787_vm4 = vcmp.eq.f32.partialorder %v298_v40, 8.507059e+37 }
  0x98   :  { %v608_v39 = vpop.eup %607  ;;  %v579_v42 = vmul.f32 -1.442695, %v761_v35  ;;  %v301_v57 = vor.u32 1.1754944e-38, %v300_v41  ;;  %v583_v58 = vmul.f32 -1.442695, %v769_v43  ;;  %v797_v62 = vadd.f32 %v728_v10, %v140_v49 }
  0x99   :  { %v610_v44 = vpop.eup %609  ;;  %v771_v45 = vadd.f32 1.0, %v608_v39  ;;  %v794_v61 = vmul.f32 -1.442695, %v774_v46 }
  0x9a   :  { %v612_v47 = vpop.eup %611  ;;  %v778_v48 = vadd.f32 1.0, %v610_v44  ;;  %v810_v11 = vmul.f32 -1.442695, %v797_v62 }
  0x9b   :  { %v614_v50 = vpop.eup %613  ;;  %v230_v51 = vmul.f32 %v612_v47, %v752_v29  ;;  %619 = vrcp.f32 %v771_v45  ;;  %vm235_vm5 = vweird.f32 %v612_v47  ;;  %v358_v0 = vand.u32 2147483647, %v771_v45 }
  0x9c   :  { %v616_v54 = vpop.eup %615  ;;  %v290_v55 = vmul.f32 %v614_v50, %v755_v31  ;;  %621 = vpow2.f32 %v579_v42  ;;  %v360_v1 = vand.u32 2147483648, %v771_v45  ;;  %v420_v3 = vand.u32 2147483648, %v778_v48  ;;  %vm236_vm9 = vmor %vm234_vm1, %vm235_vm5 }
  0x9d   :  { %v618_v59 = vpop.eup %617  ;;  %v231_v60 = vsub.f32 1.0, %v230_v51  ;;  %623 = vrcp.f32 %v778_v48  ;;  %v802_v4 = vadd.f32 1.0, %v616_v54  ;;  %vm295_vm7 = vweird.f32 %v614_v50  ;;  %v150_v18 = vpop.f32.mrf.mxu2 }
  0x9e   :  { %v291_v63 = vsub.f32 1.0, %v290_v55  ;;  %v804_v5 = vadd.f32 1.0, %v618_v59  ;;  %v418_v7 = vand.u32 2147483647, %v778_v48  ;;  %625 = vpow2.f32 %v583_v58  ;;  %vm296_vm12 = vmor %vm294_vm2, %vm295_vm7 }
  0x9f   :  { %v232_v2 = vmul.f32 %v612_v47, %v231_v60  ;;  %vm354_vm8 = vweird.f32 %v771_v45  ;;  %627 = vrcp.f32 %v802_v4  ;;  %vm816_vm10 = vcmp.eq.f32.partialorder %v358_v0, 8.507059e+37 }
  0xa0   :  { %v292_v6 = vmul.f32 %v614_v50, %v291_v63  ;;  %vm414_vm11 = vweird.f32 %v778_v48  ;;  %v361_v25 = vor.u32 1.1754944e-38, %v360_v1  ;;  %v421_v26 = vor.u32 1.1754944e-38, %v420_v3 }
  0xa1   :  { %v620_v8 = vpop.eup %619  ;;  %v233_v9 = vadd.f32 %v612_v47, %v232_v2  ;;  %629 = vrcp.f32 %v804_v5  ;;  %vm828_vm13 = vcmp.eq.f32.partialorder %v418_v7, 8.507059e+37  ;;  %v253_v34 = vand.u32 2147483647, %v802_v4 }
  0xa2   :  { %v622_v12 = vpop.eup %621  ;;  %v293_v15 = vadd.f32 %v614_v50, %v292_v6  ;;  %v350_v16 = vmul.f32 %v620_v8, %v771_v45  ;;  %v837_v36 = vadd.f32 %v728_v10, %v150_v18  ;;  %vm355_vm14 = vweird.f32 %v620_v8 }
  0xa3   :  { %v624_v21 = vpop.eup %623  ;;  %v237_v22 = vsel %vm236_vm9, %v612_v47, %v233_v9  ;;  %vm249_vm15 = vweird.f32 %v802_v4  ;;  %v842_v44 = vadd.f32 1.0, %v622_v12  ;;  %vm356_vm1 = vmor %vm354_vm8, %vm355_vm14  ;;  %vm851_vm2 = vcmp.eq.f32.partialorder %v253_v34, 8.507059e+37 }
  0xa4   :  { %v242_v27 = vsel %vm781_vm3, %v241_v53, %v237_v22  ;;  %v297_v28 = vsel %vm296_vm12, %v614_v50, %v293_v15  ;;  %v351_v29 = vsub.f32 1.0, %v350_v16  ;;  %v410_v30 = vmul.f32 %v624_v21, %v778_v48  ;;  %v626_v37 = vpop.eup %625 }
  0xa5   :  { %v469_v33 = vmul.f32 %v242_v27, %v731_v13  ;;  %v302_v31 = vsel %vm787_vm4, %v301_v57, %v297_v28  ;;  %v628_v41 = vpop.eup %627  ;;  %vm415_vm0 = vweird.f32 %v624_v21  ;;  %v255_v13 = vand.u32 2147483648, %v802_v4 }
  0xa6   :  { %v473_v38 = vmul.f32 %v302_v31, %v734_v14  ;;  %v352_v39 = vmul.f32 %v620_v8, %v351_v29  ;;  %v411_v40 = vsub.f32 1.0, %v410_v30  ;;  %v245_v51 = vmul.f32 %v628_v41, %v802_v4  ;;  %vm416_vm4 = vmor %vm414_vm11, %vm415_vm0  ;;  %v160_v4 = vpop.f32.mrf.mxu3  ;;  %v142_v31 = vpop.f32.mrf.mxu1 }
  0xa7   :  { %v485_v42 = vpack.c.bf16 %v469_v33, %v469_v33  ;;  %v630_v52 = vpop.eup %629  ;;  %vm309_vm3 = vweird.f32 %v804_v5  ;;  %631 = vrcp.f32 %v842_v44  ;;  %v857_v53 = vadd.f32 1.0, %v626_v37 }
  0xa8   :  { %v489_v47 = vpack.c.bf16 %v473_v38, %v473_v38  ;;  %v353_v49 = vadd.f32 %v620_v8, %v352_v39  ;;  %v412_v50 = vmul.f32 %v624_v21, %v411_v40  ;;  %v246_v56 = vsub.f32 1.0, %v245_v51 }
  0xa9   :  { %502 = vst.msk [vmem:[%s1091_s3] sm:$0xf] %vm501_vm6, %v485_v42  ;;  %v305_v45 = vmul.f32 %v630_v52, %v804_v5  ;;  %vm250_vm5 = vweird.f32 %v628_v41  ;;  %v313_v58 = vand.u32 2147483647, %v804_v5  ;;  %v315_v59 = vand.u32 2147483648, %v804_v5  ;;  %v132_v5 = vpop.f32.mrf.mxu0 }
  0xaa   :  { %506 = vst.msk [vmem:[%s1091_s3 + $0x10] sm:$0xf] %vm501_vm6, %v489_v47  ;;  %v357_v54 = vsel %vm356_vm1, %v620_v8, %v353_v49  ;;  %v413_v55 = vadd.f32 %v624_v21, %v412_v50  ;;  %v247_v0 = vmul.f32 %v628_v41, %v246_v56  ;;  %vm310_vm7 = vweird.f32 %v630_v52  ;;  %vm251_vm8 = vmor %vm249_vm15, %vm250_vm5 }
  0xab   :  { %v362_v57 = vsel %vm816_vm10, %v361_v25, %v357_v54  ;;  %v306_v1 = vsub.f32 1.0, %v305_v45  ;;  %v373_v3 = vand.u32 2147483647, %v842_v44  ;;  %633 = vrcp.f32 %v857_v53  ;;  %vm311_vm11 = vmor %vm309_vm3, %vm310_vm7 }
  0xac   :  { %v477_v60 = vmul.f32 %v362_v57, %v739_v19  ;;  %v417_v63 = vsel %vm416_vm4, %v624_v21, %v413_v55  ;;  %v248_v7 = vadd.f32 %v628_v41, %v247_v0  ;;  %v256_v19 = vor.u32 1.1754944e-38, %v255_v13 }
  0xad   :  { %v422_v2 = vsel %vm828_vm13, %v421_v26, %v417_v63  ;;  %v307_v8 = vmul.f32 %v630_v52, %v306_v1  ;;  %v632_v9 = vpop.eup %631  ;;  %vm880_vm9 = vcmp.eq.f32.partialorder %v313_v58, 8.507059e+37  ;;  %v316_v15 = vor.u32 1.1754944e-38, %v315_v59 }
  0xae   :  { %v493_v48 = vpack.c.bf16 %v477_v60, %v477_v60  ;;  %v481_v6 = vmul.f32 %v422_v2, %v742_v20  ;;  %vm369_vm10 = vweird.f32 %v842_v44  ;;  %v252_v16 = vsel %vm251_vm8, %v628_v41, %v248_v7  ;;  %v162_v59 = vpop.f32.mrf.mxu3 }
  0xaf   :  { %v308_v17 = vadd.f32 %v630_v52, %v307_v8  ;;  %v365_v18 = vmul.f32 %v632_v9, %v842_v44  ;;  %v257_v21 = vsel %vm851_vm2, %v256_v19, %v252_v16  ;;  %vm370_vm12 = vweird.f32 %v632_v9 }
  0xb0   :  { %510 = vst.msk [vmem:[%s1091_s3 + $0x20] sm:$0xf] %vm501_vm6, %v493_v48  ;;  %v497_v20 = vpack.c.bf16 %v481_v6, %v481_v6  ;;  %vm895_vm13 = vcmp.eq.f32.partialorder %v373_v3, 8.507059e+37  ;;  %v375_v25 = vand.u32 2147483648, %v842_v44  ;;  %v470_v26 = vmul.f32 %v257_v21, %v745_v23  ;;  %vm371_vm14 = vmor %vm369_vm10, %vm370_vm12  ;;  %v152_v44 = vpop.f32.mrf.mxu2 }
  0xb1   :  { %v312_v27 = vsel %vm311_vm11, %v630_v52, %v308_v17  ;;  %v366_v28 = vsub.f32 1.0, %v365_v18  ;;  %635 = vpow2.f32 %v794_v61  ;;  %v634_v29 = vpop.eup %633  ;;  %v580_v32 = vmul.f32 -1.442695, %v837_v36 }
  0xb2   :  { %514 = vst.msk [vmem:[%s1091_s3 + $0x30] sm:$0xf] %vm501_vm6, %v497_v20  ;;  %v317_v30 = vsel %vm880_vm9, %v316_v15, %v312_v27  ;;  %637 = vpow2.f32 %v810_v11  ;;  %v911_v33 = vadd.f32 %v728_v10, %v160_v4  ;;  %v486_v34 = vpack.c.bf16 %v470_v26, %v470_v26 }
  0xb3   :  { %v474_v23 = vmul.f32 %v317_v30, %v748_v24  ;;  %v367_v37 = vmul.f32 %v632_v9, %v366_v28  ;;  %v425_v38 = vmul.f32 %v634_v29, %v857_v53  ;;  %v376_v61 = vor.u32 1.1754944e-38, %v375_v25 }
  0xb4   :  { %639 = vpow2.f32 %v580_v32  ;;  %v584_v39 = vmul.f32 -1.442695, %v911_v33  ;;  %v917_v40 = vadd.f32 %v728_v10, %v132_v5  ;;  %503 = vst.msk [vmem:[%s1091_s3 + $0x4] sm:$0xf] %vm501_vm6, %v486_v34  ;;  %v924_v24 = vadd.f32 %v728_v10, %v142_v31 }
  0xb5   :  { %v490_v11 = vpack.c.bf16 %v474_v23, %v474_v23  ;;  %v368_v41 = vadd.f32 %v632_v9, %v367_v37  ;;  %v426_v42 = vsub.f32 1.0, %v425_v38  ;;  %v433_v13 = vand.u32 2147483647, %v857_v53 }
  0xb6   :  { %v435_v47 = vand.u32 2147483648, %v857_v53  ;;  %641 = vpow2.f32 %v584_v39  ;;  %v573_v49 = vmul.f32 -1.442695, %v917_v40  ;;  %vm430_vm15 = vweird.f32 %v634_v29 }
  0xb7   :  { %v636_v50 = vpop.eup %635  ;;  %507 = vst.msk [vmem:[%s1091_s3 + $0x14] sm:$0xf] %vm501_vm6, %v490_v11  ;;  %v372_v51 = vsel %vm371_vm14, %v632_v9, %v368_v41  ;;  %v427_v52 = vmul.f32 %v634_v29, %v426_v42  ;;  %v577_v14 = vmul.f32 -1.442695, %v924_v24  ;;  %vm429_vm0 = vweird.f32 %v857_v53 }
  0xb8   :  { %v638_v54 = vpop.eup %637  ;;  %v377_v55 = vsel %vm895_vm13, %v376_v61, %v372_v51  ;;  %v940_v56 = vadd.f32 1.0, %v636_v50  ;;  %643 = vpow2.f32 %v573_v49  ;;  %vm431_vm1 = vmor %vm429_vm0, %vm430_vm15  ;;  %v436_v63 = vor.u32 1.1754944e-38, %v435_v47 }
  0xb9   :  { %v478_v45 = vmul.f32 %v377_v55, %v761_v35  ;;  %v428_v57 = vadd.f32 %v634_v29, %v427_v52  ;;  %v943_v58 = vadd.f32 1.0, %v638_v54  ;;  %645 = vpow2.f32 %v577_v14 }
  0xba   :  { %v640_v60 = vpop.eup %639  ;;  %647 = vrcp.f32 %v940_v56  ;;  %v947_v0 = vadd.f32 %v728_v10, %v152_v44  ;;  %vm434_vm2 = vcmp.eq.f32.partialorder %v433_v13, 8.507059e+37  ;;  %v268_v3 = vand.u32 2147483647, %v940_v56 }
  0xbb   :  { %v494_v1 = vpack.c.bf16 %v478_v45, %v478_v45  ;;  %v432_v53 = vsel %vm431_vm1, %v634_v29, %v428_v57  ;;  %649 = vrcp.f32 %v943_v58  ;;  %v952_v48 = vadd.f32 %v728_v10, %v162_v59 }
  0xbc   :  { %v642_v2 = vpop.eup %641  ;;  %v437_v35 = vsel %vm434_vm2, %v436_v63, %v432_v53  ;;  %v270_v7 = vand.u32 2147483648, %v940_v56  ;;  %v960_v8 = vadd.f32 1.0, %v640_v60  ;;  %v328_v12 = vand.u32 2147483647, %v943_v58 }
  0xbd   :  { %511 = vst.msk [vmem:[%s1091_s3 + $0x24] sm:$0xf] %vm501_vm6, %v494_v1  ;;  %v482_v6 = vmul.f32 %v437_v35, %v769_v43  ;;  %v962_v9 = vadd.f32 1.0, %v642_v2  ;;  %v330_v15 = vand.u32 2147483648, %v943_v58  ;;  %v581_v10 = vmul.f32 -1.442695, %v947_v0 }
  0xbe   :  { %v644_v19 = vpop.eup %643  ;;  %651 = vrcp.f32 %v960_v8  ;;  %vm264_vm3 = vweird.f32 %v940_v56  ;;  %v585_v43 = vmul.f32 -1.442695, %v952_v48  ;;  %vm976_vm4 = vcmp.eq.f32.partialorder %v268_v3, 8.507059e+37 }
  0xbf   :  { %v646_v20 = vpop.eup %645  ;;  %v498_v16 = vpack.c.bf16 %v482_v6, %v482_v6  ;;  %653 = vrcp.f32 %v962_v9  ;;  %v271_v22 = vor.u32 1.1754944e-38, %v270_v7  ;;  %vm324_vm5 = vweird.f32 %v943_v58 }
  0xc0   :  { %v648_v17 = vpop.eup %647  ;;  %vm982_vm7 = vcmp.eq.f32.partialorder %v328_v12, 8.507059e+37  ;;  %v331_v27 = vor.u32 1.1754944e-38, %v330_v15  ;;  %655 = vpow2.f32 %v581_v10  ;;  %v388_v5 = vand.u32 2147483647, %v960_v8 }
  0xc1   :  { %v650_v18 = vpop.eup %649  ;;  %515 = vst.msk [vmem:[%s1091_s3 + $0x34] sm:$0xf] %vm501_vm6, %v498_v16  ;;  %v260_v4 = vmul.f32 %v648_v17, %v940_v56  ;;  %v390_v29 = vand.u32 2147483648, %v960_v8  ;;  %v988_v30 = vadd.f32 1.0, %v644_v19  ;;  %vm265_vm8 = vweird.f32 %v648_v17 }
  0xc2   :  { %v320_v25 = vmul.f32 %v650_v18, %v943_v58  ;;  %v990_v31 = vadd.f32 1.0, %v646_v20  ;;  %657 = vpow2.f32 %v585_v43  ;;  %v448_v37 = vand.u32 2147483647, %v962_v9  ;;  %vm266_vm13 = vmor %vm264_vm3, %vm265_vm8 }
  0xc3   :  { %v261_v28 = vsub.f32 1.0, %v260_v4  ;;  %v450_v38 = vand.u32 2147483648, %v962_v9  ;;  %659 = vrcp.f32 %v988_v30  ;;  %vm325_vm9 = vweird.f32 %v650_v18 }
  0xc4   :  { %v321_v32 = vsub.f32 1.0, %v320_v25  ;;  %v652_v34 = vpop.eup %651  ;;  %vm384_vm10 = vweird.f32 %v960_v8  ;;  %vm997_vm11 = vcmp.eq.f32.partialorder %v388_v5, 8.507059e+37  ;;  %vm444_vm12 = vweird.f32 %v962_v9  ;;  %vm326_vm14 = vmor %vm324_vm5, %vm325_vm9 }
  0xc5   :  { %v262_v23 = vmul.f32 %v648_v17, %v261_v28  ;;  %v654_v61 = vpop.eup %653  ;;  %v380_v11 = vmul.f32 %v652_v34, %v960_v8  ;;  %v391_v51 = vor.u32 1.1754944e-38, %v390_v29  ;;  %661 = vrcp.f32 %v990_v31 }
  0xc6   :  { %v322_v39 = vmul.f32 %v650_v18, %v321_v32  ;;  %v440_v13 = vmul.f32 %v654_v61, %v962_v9  ;;  %v656_v47 = vpop.eup %655  ;;  %vm1009_vm15 = vcmp.eq.f32.partialorder %v448_v37, 8.507059e+37  ;;  %v451_v54 = vor.u32 1.1754944e-38, %v450_v38 }
  0xc7   :  { %v263_v41 = vadd.f32 %v648_v17, %v262_v23  ;;  %v381_v50 = vsub.f32 1.0, %v380_v11  ;;  %vm385_vm0 = vweird.f32 %v652_v34  ;;  %vm445_vm1 = vweird.f32 %v654_v61 }
  0xc8   :  { %v323_v49 = vadd.f32 %v650_v18, %v322_v39  ;;  %v441_v14 = vsub.f32 1.0, %v440_v13  ;;  %v658_v55 = vpop.eup %657  ;;  %v283_v35 = vand.u32 2147483647, %v988_v30  ;;  %vm386_vm2 = vmor %vm384_vm10, %vm385_vm0  ;;  %v285_v7 = vand.u32 2147483648, %v988_v30 }
  0xc9   :  { %v267_v52 = vsel %vm266_vm13, %v648_v17, %v263_v41  ;;  %v382_v57 = vmul.f32 %v652_v34, %v381_v50  ;;  %v660_v59 = vpop.eup %659  ;;  %vm446_vm3 = vmor %vm444_vm12, %vm445_vm1  ;;  %v1028_v10 = vadd.f32 1.0, %v658_v55  ;;  %vm279_vm5 = vweird.f32 %v988_v30 }
  0xca   :  { %v272_v56 = vsel %vm976_vm4, %v271_v22, %v267_v52  ;;  %v327_v45 = vsel %vm326_vm14, %v650_v18, %v323_v49  ;;  %v442_v63 = vmul.f32 %v654_v61, %v441_v14  ;;  %v275_v2 = vmul.f32 %v660_v59, %v988_v30 }
  0xcb   :  { %v471_v60 = vmul.f32 %v272_v56, %v774_v46  ;;  %v332_v58 = vsel %vm982_vm7, %v331_v27, %v327_v45  ;;  %v383_v53 = vadd.f32 %v652_v34, %v382_v57  ;;  %v1024_v46 = vadd.f32 1.0, %v656_v47  ;;  %v662_v19 = vpop.eup %661 }
  0xcc   :  { %v475_v1 = vmul.f32 %v332_v58, %v797_v62  ;;  %v443_v6 = vadd.f32 %v654_v61, %v442_v63  ;;  %v276_v62 = vsub.f32 1.0, %v275_v2  ;;  %vm280_vm4 = vweird.f32 %v660_v59 }
  0xcd   :  { %v487_v3 = vpack.c.bf16 %v471_v60, %v471_v60  ;;  %v387_v15 = vsel %vm386_vm2, %v652_v34, %v383_v53  ;;  %v335_v16 = vmul.f32 %v662_v19, %v990_v31  ;;  %663 = vrcp.f32 %v1024_v46  ;;  %vm281_vm7 = vmor %vm279_vm5, %vm280_vm4 }
  0xce   :  { %v491_v12 = vpack.c.bf16 %v475_v1, %v475_v1  ;;  %v392_v8 = vsel %vm997_vm11, %v391_v51, %v387_v15  ;;  %v447_v20 = vsel %vm446_vm3, %v654_v61, %v443_v6  ;;  %v277_v43 = vmul.f32 %v660_v59, %v276_v62 }
  0xcf   :  { %504 = vst.msk [vmem:[%s1091_s3 + $0x8] sm:$0xf] %vm501_vm6, %v487_v3  ;;  %v479_v9 = vmul.f32 %v392_v8, %v837_v36  ;;  %v452_v17 = vsel %vm1009_vm15, %v451_v54, %v447_v20  ;;  %v286_v4 = vor.u32 1.1754944e-38, %v285_v7  ;;  %v336_v21 = vsub.f32 1.0, %v335_v16 }
  0xd0   :  { %508 = vst.msk [vmem:[%s1091_s3 + $0x18] sm:$0xf] %vm501_vm6, %v491_v12  ;;  %v483_v18 = vmul.f32 %v452_v17, %v911_v33  ;;  %v278_v25 = vadd.f32 %v660_v59, %v277_v43  ;;  %v345_v26 = vand.u32 2147483648, %v990_v31  ;;  %665 = vrcp.f32 %v1028_v10 }
  0xd1   :  { %v495_v22 = vpack.c.bf16 %v479_v9, %v479_v9  ;;  %v337_v36 = vmul.f32 %v662_v19, %v336_v21  ;;  %vm340_vm8 = vweird.f32 %v662_v19  ;;  %v343_v28 = vand.u32 2147483647, %v990_v31 }
  0xd2   :  { %v499_v27 = vpack.c.bf16 %v483_v18, %v483_v18  ;;  %v282_v33 = vsel %vm281_vm7, %v660_v59, %v278_v25  ;;  %vm284_vm9 = vcmp.eq.f32.partialorder %v283_v35, 8.507059e+37  ;;  %vm339_vm10 = vweird.f32 %v990_v31 }
  0xd3   :  { %512 = vst.msk [vmem:[%s1091_s3 + $0x28] sm:$0xf] %vm501_vm6, %v495_v22  ;;  %v287_v5 = vsel %vm284_vm9, %v286_v4, %v282_v33  ;;  %v338_v29 = vadd.f32 %v662_v19, %v337_v36  ;;  %v664_v30 = vpop.eup %663  ;;  %vm341_vm11 = vmor %vm339_vm10, %vm340_vm8  ;;  %v346_v34 = vor.u32 1.1754944e-38, %v345_v26  ;;  %vm344_vm12 = vcmp.eq.f32.partialorder %v343_v28, 8.507059e+37 }
  0xd4   :  { %516 = vst.msk [vmem:[%s1091_s3 + $0x38] sm:$0xf] %vm501_vm6, %v499_v27  ;;  %v472_v32 = vmul.f32 %v287_v5, %v917_v40  ;;  %v395_v37 = vmul.f32 %v664_v30, %v1024_v46  ;;  %v403_v40 = vand.u32 2147483647, %v1024_v46  ;;  %v405_v31 = vand.u32 2147483648, %v1024_v46 }
  0xd5   :  { %v342_v23 = vsel %vm341_vm11, %v662_v19, %v338_v29  ;;  %vm400_vm13 = vweird.f32 %v664_v30  ;;  %vm399_vm14 = vweird.f32 %v1024_v46  ;;  %v463_v52 = vand.u32 2147483647, %v1028_v10 }
  0xd6   :  { %v666_v38 = vpop.eup %665  ;;  %v488_v61 = vpack.c.bf16 %v472_v32, %v472_v32  ;;  %v347_v39 = vsel %vm344_vm12, %v346_v34, %v342_v23  ;;  %v396_v41 = vsub.f32 1.0, %v395_v37  ;;  %vm401_vm0 = vmor %vm399_vm14, %vm400_vm13  ;;  %v406_v14 = vor.u32 1.1754944e-38, %v405_v31 }
  0xd7   :  { %v476_v11 = vmul.f32 %v347_v39, %v924_v24  ;;  %v455_v42 = vmul.f32 %v666_v38, %v1028_v10  ;;  %v465_v24 = vand.u32 2147483648, %v1028_v10  ;;  %vm460_vm15 = vweird.f32 %v666_v38 }
  0xd8   :  { %505 = vst.msk [vmem:[%s1091_s3 + $0xc] sm:$0xf] %vm501_vm6, %v488_v61  ;;  %v397_v47 = vmul.f32 %v664_v30, %v396_v41  ;;  %vm404_vm1 = vcmp.eq.f32.partialorder %v403_v40, 8.507059e+37  ;;  %vm459_vm2 = vweird.f32 %v1028_v10  ;;  %vm464_vm4 = vcmp.eq.f32.partialorder %v463_v52, 8.507059e+37 }
  0xd9   :  { %v492_v13 = vpack.c.bf16 %v476_v11, %v476_v11  ;;  %v456_v49 = vsub.f32 1.0, %v455_v42  ;;  %vm461_vm3 = vmor %vm459_vm2, %vm460_vm15  ;;  %v466_v56 = vor.u32 1.1754944e-38, %v465_v24 }
  0xda   :  { %v398_v50 = vadd.f32 %v664_v30, %v397_v47 }
  0xdb   :  { %509 = vst.msk [vmem:[%s1091_s3 + $0x1c] sm:$0xf] %vm501_vm6, %v492_v13  ;;  %v457_v51 = vmul.f32 %v666_v38, %v456_v49 }
  0xdc   :  { %v402_v44 = vsel %vm401_vm0, %v664_v30, %v398_v50 }
  0xdd   :  { %v458_v54 = vadd.f32 %v666_v38, %v457_v51  ;;  %v407_v55 = vsel %vm404_vm1, %v406_v14, %v402_v44 }
  0xde   :  { %v480_v45 = vmul.f32 %v407_v55, %v947_v0 }
  0xdf   :  { %v462_v57 = vsel %vm461_vm3, %v666_v38, %v458_v54 }
  0xe0   :  { %v467_v59 = vsel %vm464_vm4, %v466_v56, %v462_v57  ;;  %v496_v60 = vpack.c.bf16 %v480_v45, %v480_v45 }
  0xe1   :  { %v484_v58 = vmul.f32 %v467_v59, %v952_v48 }
  0xe2   :  { %513 = vst.msk [vmem:[%s1091_s3 + $0x2c] sm:$0xf] %vm501_vm6, %v496_v60 }
  0xe3   :  { %v500_v63 = vpack.c.bf16 %v484_v58, %v484_v58 }
  0xe5   :  { %517 = vst.msk [vmem:[%s1091_s3 + $0x3c] sm:$0xf] %vm501_vm6, %v500_v63 }

// kernel: custom_efficientnet_forward.5
= control target key start
LH: loop header
LB: loop body
LE: loop exit
PB: predicated region body
PF: predicated region fallthrough
CT: control target
= control target key end

     0   :  { %10 = vsyncpa [#allocation4], 0  ;;  %s1355_s0 = inlined_call_operand.vmem [shape: bf16[2,64,8], index: 0, kind: input, shape index: {}]   ;;  %s1356_s1 = inlined_call_operand.vmem [shape: bf16[8,128], index: 1, kind: input, shape index: {}]   ;;  %s1357_s2 = inlined_call_operand.vmem [shape: f32[1,128], index: 2, kind: input, shape index: {}]   ;;  %s1358_s3 = inlined_call_operand.vmem [shape: bf16[128,128], index: 3, kind: input, shape index: {}]   ;;  %s1359_s4 = inlined_call_operand.vmem [shape: f32[1,128], index: 4, kind: input, shape index: {}]   ;;  %s1360_s5 = inlined_call_operand.hbm [shape: f32[2,1,128], index: 5, kind: output, shape index: {}]  }
   0x1   :  { %12 = vsyncpa [#allocation4 + $0x1], 0  ;;  %s1020_s18 = smov 0   ;;  %s1022_s19 = smov 0  }
   0x2   :  { %s1024_s20 = smov 0   ;;  %s1026_s21 = smov 0  }
   0x3   :  { %s1028_s22 = smov 0   ;;  %s1030_s23 = smov 0  }
   0x4 LB: > { %s732_s24 = sadd.s32 4294967295, %s987_s23   ;;  %s733_s25 = sadd.s32 4294967294, %s987_s23   ;;  %s987_s23 = sphi %s1030_s23, %s18_s23   ;;  %s983_s22 = sphi %s1028_s22, %s1385_s22   ;;  %s979_s21 = sphi %s1026_s21, %s1384_s21   ;;  %s975_s20 = sphi %s1024_s20, %s1383_s20   ;;  %s971_s19 = sphi %s1022_s19, %s1382_s19   ;;  %s967_s18 = sphi %s1020_s18, %s1381_s18  }
   0x5   : > { %s30_s26 = sadd.s32 1, %s983_s22  ;;  %s149_s27 = sadd.s32 1, %s975_s20 }
   0x6   : > { %p32_p0 = scmp.ge.s32.totalorder %s30_s26, 2  ;;  %p159_p1 = scmp.ne.s32.totalorder %s975_s20, %s971_s19 }
   0x7   : > { %p160_p2 = scmp.eq.s32.totalorder %s732_s24, 1  ;;  %p165_p3 = scmp.ne.s32.totalorder %s971_s19, %s967_s18 }
   0x8   : > { %s1387_s26 = smov (%p32_p0, %s30_s26), 0  ;;  %p166_p5 = scmp.eq.s32.totalorder %s733_s25, 1 }
   0x9   : > { %p1060_p4 = por %p160_p2, %p159_p1  ;;  %s146_s29 = ssub.s32 %s983_s22, %s1387_s26 }
   0xa   : > { %p736_p6 = scmp.ge.s32.totalorder %s987_s23, 1  ;;  %p147_p7 = scmp.eq.s32.totalorder %s146_s29, 0 }
   0xb   : > { %p1067_p8 = por %p166_p5, %p165_p3  ;;  %p209_p9 = scmp.lt.s32.totalorder %s987_s23, 3 }
   0xc   : > { %s1073_s6 = scalar_select %p147_p7, %s975_s20, %s149_s27  }
   0xd   : > { %p210_p10 = pnand %p736_p6, %p209_p9 }
   0xe   : > { %p241_p11 = scmp.lt.s32.totalorder (!%p210_p10), %s979_s21, 1  ;;  %s238_s25 = sand.u32 (!%p210_p10), 1, %s971_s19  }
   0xf   : > { %213 = sbr.rel (%p210_p10) target bundleno = 404 (0x194), region = 40  ;;  %s659_s7 = scalar_lea.hbm (!%p210_p10), %s1360_s5, %s979_s21 }
  0x10   : > { %s239_s8 = scalar_lea.vmem (!%p210_p10), [#allocation3], %s238_s25  ;;  %s651_s11 = scalar_lea.sflag (!%p210_p10), [#allocation4], %s238_s25 }
  0x11   : > { %s929_s15 = scalar_lea.hbm (!%p210_p10), %s1360_s5, 2 }
  0x14   : > { %v264_v0 = vld [vmem:[%s1356_s1] sm:$0xf]  ;;  %vm302_vm0 = vcmask 1043456   ;;  %s242_s9 = scalar_select %p241_p11, %s979_s21, 1  ;;  %vm289_vm1 = vcmask 64512   ;;  %v989_v48 = vmov 0.0  }
  0x15   : > { %v304_v1 = vsel %vm302_vm0, %v264_v0, 0  ;;  %v872_v6 = vld [vmem:[%s1357_s2] ss:$0 sm:$0xff]  ;;  %255 = vst [vmem:[#allocation2] sm:$0x1] %v989_v48  ;;  %v814_v49 = vld [vmem:[%s1358_s3 + $0x38] sm:$0xff] }
  0x16   : > { %313 = vmatpush.bf16.msra.mxu0 %v304_v1  ;;  %815 = vmatpush.bf16.msra.mxu2 %v304_v1  ;;  %s802_s10 = sshll.u32 %s242_s9, 5  ;;  %v813_v62 = vld [vmem:[%s1358_s3 + $0x30] sm:$0xff]  ;;  %s661_s9 = sshll.u32 %s239_s8, 4  ;;  %s662_s9 = int_to_ptr.vmem [resolvable:$true] %s661_s9 }
  0x17   : > { %s248_s13 = scalar_lea.vmem %s1355_s0, %s802_s10  ;;  %617 = vmatpush.bf16.msra.mxu1 %v814_v49  ;;  %s663_s10 = sshll.u32 %s659_s7, 4  ;;  %s664_s10 = int_to_ptr.hbm [resolvable:$true] %s663_s10 }
  0x18   : > { %v803_v2 = vld [vmem:[%s248_s13] sm:$0xff]  ;;  %v805_v3 = vld [vmem:[%s248_s13 + $0x10] sm:$0xff]  ;;  %v804_v4 = vld [vmem:[%s248_s13 + $0x8] sm:$0xff]  ;;  %s923_s21 = sshra.s32 %s664_s10, 4  ;;  %s924_s21 = int_to_ptr.hbm [resolvable:$true] %s923_s21 }
  0x19   : > { %755 = vmatmul.msk.bf16.vlgmr.msra.gmra.mxu0 %vm289_vm1, %v803_v2  ;;  %757 = vmatmul.msk.bf16.vlgmr.msra.gmra.mxu2 %vm289_vm1, %v805_v3  ;;  %v806_v5 = vld [vmem:[%s248_s13 + $0x18] sm:$0xff]  ;;  %s925_s12 = scalar_lea.hbm %s924_s21, 1  ;;  %p930_p1 = scmp.lt.s32.totalorder %s924_s21, %s1360_s5 }
  0x1a   : > { %p926_p12 = scmp.ne.s32.totalorder %s924_s21, %s925_s12  ;;  %p931_p2 = scmp.lt.s32.totalorder %s929_s15, %s925_s12 }
  0x1b   : > { %618 = vmatpush.bf16.msra.mxu1 %v813_v62 }
  0x1c   : > { %p927_p13 = pnand %p926_p12, %p1060_p4  ;;  %p932_p3 = por %p931_p2, %p930_p1 }
  0x1e   : > { %p928_p0 = pneg %p927_p13 }
  0x20   : > { %p933_p5 = pnand %p932_p3, %p928_p0 }
  0x29   : > { %756 = vmatmul.msk.bf16.gmra.mxu0 %vm289_vm1, %v804_v4  ;;  %758 = vmatmul.msk.bf16.gmra.mxu2 %vm289_vm1, %v806_v5 }
  0x96   : > { %v315_v7 = vpop.f32.mrf.mxu0 }
  0x97   : > { %v1086_v8 = vadd.f32 %v872_v6, %v315_v7 }
  0x99   : > { %v759_v9 = vmul.f32 -1.442695, %v1086_v8 }
  0x9b   : > { %873 = vpow2.f32 %v759_v9 }
  0x9c   : > { %v325_v10 = vpop.f32.mrf.mxu2 }
  0x9d   : > { %v1089_v11 = vadd.f32 %v872_v6, %v325_v10 }
  0x9e   : > { %v317_v12 = vpop.f32.mrf.mxu0 }
  0x9f   : > { %v763_v13 = vmul.f32 -1.442695, %v1089_v11  ;;  %v1092_v14 = vadd.f32 %v872_v6, %v317_v12 }
  0xa1   : > { %v874_v15 = vpop.eup %873  ;;  %875 = vpow2.f32 %v763_v13  ;;  %v760_v16 = vmul.f32 -1.442695, %v1092_v14 }
  0xa2   : > { %v1095_v17 = vadd.f32 1.0, %v874_v15  ;;  %v812_v15 = vld [vmem:[%s1358_s3 + $0x28] sm:$0xff] }
  0xa3   : > { %877 = vpow2.f32 %v760_v16  ;;  %619 = vmatpush.bf16.msra.mxu1 %v812_v15 }
  0xa4   : > { %v327_v18 = vpop.f32.mrf.mxu2  ;;  %879 = vrcp.f32 %v1095_v17  ;;  %v376_v57 = vand.u32 2147483647, %v1095_v17  ;;  %v378_v58 = vand.u32 2147483648, %v1095_v17  ;;  %vm372_vm2 = vweird.f32 %v1095_v17 }
  0xa5   : > { %v1097_v19 = vadd.f32 %v872_v6, %v327_v18 }
  0xa6   : > { %v320_v20 = vpop.f32.mrf.mxu0  ;;  %vm1166_vm4 = vcmp.eq.f32.partialorder %v376_v57, 8.507059e+37  ;;  %v379_v7 = vor.u32 1.1754944e-38, %v378_v58  ;;  %v810_v57 = vld [vmem:[%s1358_s3 + $0x18] sm:$0xff] }
  0xa7   : > { %v876_v21 = vpop.eup %875  ;;  %v764_v22 = vmul.f32 -1.442695, %v1097_v19  ;;  %v1100_v23 = vadd.f32 %v872_v6, %v320_v20 }
  0xa8   : > { %v1103_v24 = vadd.f32 1.0, %v876_v21 }
  0xa9   : > { %v878_v25 = vpop.eup %877  ;;  %881 = vpow2.f32 %v764_v22  ;;  %v761_v26 = vmul.f32 -1.442695, %v1100_v23 }
  0xaa   : > { %v1106_v27 = vadd.f32 1.0, %v878_v25  ;;  %v1110_v29 = vpop.eup %879  ;;  %v436_v59 = vand.u32 2147483647, %v1103_v24  ;;  %vm432_vm5 = vweird.f32 %v1103_v24  ;;  %v438_v9 = vand.u32 2147483648, %v1103_v24 }
  0xab   : > { %883 = vpow2.f32 %v761_v26  ;;  %v368_v37 = vmul.f32 %v1110_v29, %v1095_v17  ;;  %vm373_vm3 = vweird.f32 %v1110_v29 }
  0xac   : > { %885 = vrcp.f32 %v1103_v24  ;;  %v330_v28 = vpop.f32.mrf.mxu2  ;;  %v393_v1 = vand.u32 2147483648, %v1106_v27  ;;  %vm1172_vm6 = vcmp.eq.f32.partialorder %v436_v59, 8.507059e+37  ;;  %vm1187_vm8 = vmor %vm372_vm2, %vm373_vm3  ;;  %vm387_vm10 = vweird.f32 %v1106_v27 }
  0xad   : > { %887 = vrcp.f32 %v1106_v27  ;;  %v1112_v30 = vadd.f32 %v872_v6, %v330_v28  ;;  %v369_v44 = vsub.f32 1.0, %v368_v37  ;;  %v391_v20 = vand.u32 2147483647, %v1106_v27 }
  0xae   : > { %v322_v31 = vpop.f32.mrf.mxu0  ;;  %v394_v21 = vor.u32 1.1754944e-38, %v393_v1  ;;  %v439_v48 = vor.u32 1.1754944e-38, %v438_v9 }
  0xaf   : > { %v882_v32 = vpop.eup %881  ;;  %v1114_v33 = vadd.f32 %v872_v6, %v322_v31  ;;  %v765_v35 = vmul.f32 -1.442695, %v1112_v30  ;;  %v370_v51 = vmul.f32 %v1110_v29, %v369_v44  ;;  %vm392_vm15 = vcmp.eq.f32.partialorder %v391_v20, 8.507059e+37 }
  0xb0   : > { %v1116_v34 = vadd.f32 1.0, %v882_v32 }
  0xb1   : > { %v884_v36 = vpop.eup %883  ;;  %889 = vpow2.f32 %v765_v35  ;;  %v762_v41 = vmul.f32 -1.442695, %v1114_v33  ;;  %v371_v0 = vadd.f32 %v1110_v29, %v370_v51 }
  0xb2   : > { %v1121_v38 = vpop.eup %885  ;;  %v1125_v40 = vadd.f32 1.0, %v884_v36  ;;  %891 = vrcp.f32 %v1116_v34  ;;  %vm447_vm1 = vweird.f32 %v1116_v34 }
  0xb3   : > { %v1123_v39 = vpop.eup %887  ;;  %v428_v45 = vmul.f32 %v1121_v38, %v1103_v24  ;;  %vm433_vm9 = vweird.f32 %v1121_v38  ;;  %v375_v25 = vsel %vm1187_vm8, %v1110_v29, %v371_v0 }
  0xb4   : > { %v383_v42 = vmul.f32 %v1123_v39, %v1106_v27  ;;  %v332_v43 = vpop.f32.mrf.mxu2  ;;  %893 = vrcp.f32 %v1125_v40  ;;  %vm388_vm7 = vweird.f32 %v1123_v39  ;;  %v453_v27 = vand.u32 2147483648, %v1116_v34  ;;  %vm1228_vm13 = vmor %vm432_vm5, %vm433_vm9 }
  0xb5   : > { %895 = vpow2.f32 %v762_v41  ;;  %v1134_v46 = vadd.f32 %v872_v6, %v332_v43  ;;  %v429_v54 = vsub.f32 1.0, %v428_v45  ;;  %vm1204_vm11 = vmor %vm387_vm10, %vm388_vm7  ;;  %v406_v36 = vand.u32 2147483647, %v1125_v40  ;;  %v811_v41 = vld [vmem:[%s1358_s3 + $0x20] sm:$0xff] }
  0xb6   : > { %v384_v47 = vsub.f32 1.0, %v383_v42  ;;  %v408_v37 = vand.u32 2147483648, %v1125_v40  ;;  %v380_v42 = vsel %vm1166_vm4, %v379_v7, %v375_v25  ;;  %vm402_vm14 = vweird.f32 %v1125_v40  ;;  %620 = vmatpush.bf16.msra.mxu1 %v811_v41 }
  0xb7   : > { %v890_v50 = vpop.eup %889  ;;  %v766_v52 = vmul.f32 -1.442695, %v1134_v46  ;;  %v430_v2 = vmul.f32 %v1121_v38, %v429_v54  ;;  %v487_v51 = vmul.f32 %v380_v42, %v1086_v8  ;;  %vm407_vm2 = vcmp.eq.f32.partialorder %v406_v36, 8.507059e+37 }
  0xb8   : > { %v1141_v53 = vpop.eup %891  ;;  %v1143_v55 = vadd.f32 1.0, %v890_v50  ;;  %v385_v60 = vmul.f32 %v1123_v39, %v384_v47  ;;  %v409_v54 = vor.u32 1.1754944e-38, %v408_v37 }
  0xb9   : > { %897 = vpow2.f32 %v766_v52  ;;  %v443_v3 = vmul.f32 %v1141_v53, %v1116_v34  ;;  %v431_v26 = vadd.f32 %v1121_v38, %v430_v2  ;;  %v454_v52 = vor.u32 1.1754944e-38, %v453_v27 }
  0xba   : > { %v1145_v56 = vpop.eup %893  ;;  %899 = vrcp.f32 %v1143_v55  ;;  %v386_v12 = vadd.f32 %v1123_v39, %v385_v60  ;;  %vm448_vm3 = vweird.f32 %v1141_v53  ;;  %621 = vmatpush.bf16.msra.mxu1 %v810_v57 }
  0xbb   : > { %v398_v61 = vmul.f32 %v1145_v56, %v1125_v40  ;;  %v896_v63 = vpop.eup %895  ;;  %v444_v17 = vsub.f32 1.0, %v443_v3  ;;  %vm403_vm12 = vweird.f32 %v1145_v56  ;;  %v435_v47 = vsel %vm1228_vm13, %v1121_v38, %v431_v26  ;;  %vm1277_vm9 = vmor %vm447_vm1, %vm448_vm3 }
  0xbc   : > { %v1164_v5 = vadd.f32 1.0, %v896_v63  ;;  %v390_v35 = vsel %vm1204_vm11, %v1123_v39, %v386_v12  ;;  %v451_v39 = vand.u32 2147483647, %v1116_v34  ;;  %vm1240_vm0 = vmor %vm402_vm14, %vm403_vm12  ;;  %v440_v58 = vsel %vm1172_vm6, %v439_v48, %v435_v47 }
  0xbd   : > { %v399_v4 = vsub.f32 1.0, %v398_v61  ;;  %v445_v49 = vmul.f32 %v1141_v53, %v444_v17  ;;  %v395_v50 = vsel %vm392_vm15, %v394_v21, %v390_v35  ;;  %vm462_vm6 = vweird.f32 %v1143_v55 }
  0xbe   : > { %901 = vrcp.f32 %v1164_v5  ;;  %vm1256_vm4 = vcmp.eq.f32.partialorder %v451_v39, 8.507059e+37  ;;  %v488_v61 = vmul.f32 %v395_v50, %v1092_v14  ;;  %v423_v0 = vand.u32 2147483648, %v1164_v5 }
  0xbf   : > { %v400_v13 = vmul.f32 %v1145_v56, %v399_v4  ;;  %v898_v16 = vpop.eup %897  ;;  %v446_v62 = vadd.f32 %v1141_v53, %v445_v49  ;;  %v421_v2 = vand.u32 2147483647, %v1164_v5  ;;  %v809_v4 = vld [vmem:[%s1358_s3 + $0x10] sm:$0xff]  ;;  %v466_v14 = vand.u32 2147483647, %v1143_v55 }
  0xc0   : > { %v1194_v22 = vpop.eup %899  ;;  %v1200_v28 = vadd.f32 1.0, %v898_v16  ;;  %vm417_vm8 = vweird.f32 %v1164_v5  ;;  %v424_v34 = vor.u32 1.1754944e-38, %v423_v0  ;;  %622 = vmatpush.bf16.msra.mxu1 %v809_v4  ;;  %v808_v16 = vld [vmem:[%s1358_s3 + $0x8] sm:$0xff] }
  0xc1   : > { %v401_v32 = vadd.f32 %v1145_v56, %v400_v13  ;;  %v458_v29 = vmul.f32 %v1194_v22, %v1143_v55  ;;  %vm463_vm7 = vweird.f32 %v1194_v22  ;;  %v531_v13 = vadd.f32 %v488_v61, %v487_v51 }
  0xc2   : > { %903 = vrcp.f32 %v1200_v28  ;;  %v450_v15 = vsel %vm1277_vm9, %v1141_v53, %v446_v62  ;;  %vm422_vm11 = vcmp.eq.f32.partialorder %v421_v2, 8.507059e+37  ;;  %vm1295_vm13 = vmor %vm462_vm6, %vm463_vm7  ;;  %vm477_vm14 = vweird.f32 %v1200_v28 }
  0xc3   : > { %v459_v44 = vsub.f32 1.0, %v458_v29  ;;  %v405_v40 = vsel %vm1240_vm0, %v1145_v56, %v401_v32  ;;  %v481_v21 = vand.u32 2147483647, %v1200_v28  ;;  %v483_v25 = vand.u32 2147483648, %v1200_v28  ;;  %v807_v29 = vld [vmem:[%s1358_s3] sm:$0xff] }
  0xc4   : > { %v902_v45 = vpop.eup %901  ;;  %v410_v63 = vsel %vm407_vm2, %v409_v54, %v405_v40  ;;  %623 = vmatpush.bf16.msra.mxu1 %v808_v16  ;;  %vm467_vm0 = vcmp.eq.f32.partialorder %v466_v14, 8.507059e+37  ;;  %v530_v40 = vld [vmem:[#allocation2] sm:$0x1] }
  0xc5   : > { %v413_v38 = vmul.f32 %v902_v45, %v1164_v5  ;;  %v460_v56 = vmul.f32 %v1194_v22, %v459_v44  ;;  %vm418_vm5 = vweird.f32 %v902_v45  ;;  %v489_v7 = vmul.f32 %v410_v63, %v1100_v23 }
  0xc6   : > { %v468_v5 = vand.u32 2147483648, %v1143_v55  ;;  %vm419_vm10 = vmor %vm417_vm8, %vm418_vm5  ;;  %v455_v55 = vsel %vm1256_vm4, %v454_v52, %v450_v15  ;;  %vm482_vm1 = vcmp.eq.f32.partialorder %v481_v21, 8.507059e+37 }
  0xc7   : > { %v414_v60 = vsub.f32 1.0, %v413_v38  ;;  %v461_v9 = vadd.f32 %v1194_v22, %v460_v56  ;;  %v532_v26 = vadd.f32 %v531_v13, %v489_v7 }
  0xc8   : > { %v904_v8 = vpop.eup %903  ;;  %v469_v32 = vor.u32 1.1754944e-38, %v468_v5  ;;  %624 = vmatpush.bf16.msra.mxu1 %v807_v29 }
  0xc9   : > { %v415_v1 = vmul.f32 %v902_v45, %v414_v60  ;;  %v473_v3 = vmul.f32 %v904_v8, %v1200_v28  ;;  %vm478_vm12 = vweird.f32 %v904_v8  ;;  %v465_v17 = vsel %vm1295_vm13, %v1194_v22, %v461_v9 }
  0xca   : > { %vm479_vm15 = vmor %vm477_vm14, %vm478_vm12  ;;  %v491_v28 = vmul.f32 %v440_v58, %v1089_v11  ;;  %v470_v37 = vsel %vm467_vm0, %v469_v32, %v465_v17  ;;  %v484_v22 = vor.u32 1.1754944e-38, %v483_v25 }
  0xcb   : > { %v416_v10 = vadd.f32 %v902_v45, %v415_v1  ;;  %v474_v12 = vsub.f32 1.0, %v473_v3  ;;  %v493_v43 = vmul.f32 %v470_v37, %v1112_v30  ;;  %v568_v30 = vld [vmem:[%s1359_s4] sm:$0x1] }
  0xcd   : > { %v420_v23 = vsel %vm419_vm10, %v902_v45, %v416_v10  ;;  %v475_v18 = vmul.f32 %v904_v8, %v474_v12 }
  0xce   : > { %v425_v20 = vsel %vm422_vm11, %v424_v34, %v420_v23 }
  0xcf   : > { %v490_v31 = vmul.f32 %v425_v20, %v1114_v33  ;;  %v476_v27 = vadd.f32 %v904_v8, %v475_v18  ;;  %v492_v33 = vmul.f32 %v455_v55, %v1097_v19 }
  0xd1   : > { %v533_v35 = vadd.f32 %v532_v26, %v490_v31  ;;  %v480_v36 = vsel %vm479_vm15, %v904_v8, %v476_v27 }
  0xd2   : > { %v485_v42 = vsel %vm482_vm1, %v484_v22, %v480_v36 }
  0xd3   : > { %v534_v41 = vadd.f32 %v533_v35, %v491_v28  ;;  %v494_v44 = vmul.f32 %v485_v42, %v1134_v46 }
  0xd5   : > { %v535_v39 = vadd.f32 %v534_v41, %v492_v33 }
  0xd7   : > { %v536_v45 = vadd.f32 %v535_v39, %v493_v43 }
  0xd9   : > { %v537_v47 = vadd.f32 %v536_v45, %v494_v44 }
  0xdb   : > { %v538_v48 = vrot.slane %v537_v47, 4 }
  0xdd   : > { %v539_v11 = vadd.f32 %v538_v48, %v537_v47 }
  0xdf   : > { %v540_v49 = vrot.slane %v539_v11, 2 }
  0xe1   : > { %v541_v24 = vadd.f32 %v540_v49, %v539_v11 }
  0xe3   : > { %v542_v50 = vrot.slane %v541_v24, 1 }
  0xe5   : > { %v543_v38 = vadd.f32 %v542_v50, %v541_v24 }
  0xe7   : > { %v544_v51 = vadd.f32 %v543_v38, %v530_v40 }
  0xe9   : > { %545 = vst [vmem:[#allocation2] sm:$0x1] %v544_v51 }
  0xf0   : > { %v549_v19 = vld [vmem:[#allocation2] sm:$0x1] }
  0xf1   : > { %v550_v52 = vmul.f32 0.015625, %v549_v19 }
  0xf3   : > { %v551_v54 = vpack.c.bf16 %v550_v52, %v550_v52 }
  0xf5   : > { %625 = vmatmul.bf16.vlgmr.msra.gmra.mxu1 %v551_v54 }
 0x172   : > { %v626_v46 = vpop.f32.mrf.mxu1 }
 0x173   : > { %v627_v57 = vadd.f32 %v626_v46, %v568_v30 }
 0x175   : > { %v799_v58 = vmul.f32 -1.442695, %v627_v57 }
 0x177   : > { %905 = vpow2.f32 %v799_v58 }
 0x17a   : > { %v628_v59 = vpop.f32.mrf.mxu1 }
 0x17d   : > { %v906_v56 = vpop.eup %905 }
 0x17e   : > { %v633_v60 = vadd.f32 1.0, %v906_v56 }
 0x180   : > { %907 = vrcp.f32 %v633_v60  ;;  %v645_v63 = vand.u32 2147483648, %v633_v60  ;;  %v643_v1 = vand.u32 2147483647, %v633_v60  ;;  %vm639_vm3 = vweird.f32 %v633_v60 }
 0x182   : > { %v646_v3 = vor.u32 1.1754944e-38, %v645_v63  ;;  %vm644_vm5 = vcmp.eq.f32.partialorder %v643_v1, 8.507059e+37 }
 0x186   : > { %v908_v8 = vpop.eup %907 }
 0x187   : > { %v635_v61 = vmul.f32 %v908_v8, %v633_v60  ;;  %vm640_vm2 = vweird.f32 %v908_v8 }
 0x188   : > { %vm641_vm4 = vmor %vm639_vm3, %vm640_vm2 }
 0x189   : > { %v636_v62 = vsub.f32 1.0, %v635_v61 }
 0x18b   : > { %v637_v0 = vmul.f32 %v908_v8, %v636_v62 }
 0x18d   : > { %v638_v2 = vadd.f32 %v908_v8, %v637_v0 }
 0x18f   : > { %v642_v4 = vsel %vm641_vm4, %v908_v8, %v638_v2 }
 0x190   : > { %v647_v14 = vsel %vm644_vm5, %v646_v3, %v642_v4 }
 0x191   : > { %649 = vst [vmem:[%s239_s8] sm:$0x1] %v647_v14 }
 0x192   : > { %936 = shalt.err (!%p933_p5)
}
 0x193   : > { %816 = dma.vmem_to_hbm [thread:$0]  (%p1060_p4), %s662_s9, 16, %s664_s10, %s651_s11  }
 0x194 PF: > { %p822_p6 = scmp.ge.s32.totalorder %s987_s23, 2  ;;  %s675_s24 = sand.u32 1, %s967_s18  }
 0x195   : > { %s676_s25 = scalar_lea.sflag [#allocation4], %s675_s24 }
 0x196   : > { %p819_p7 = pnand %p822_p6, %p1067_p8 }
 0x198   : > { %p820_p9 = pneg %p819_p7 }
 0x19a   : > { %962 = dma.done.wait (%p820_p9), %s676_s25, 16  }
 0x19b   : > { %964 = vsyncadd (%p820_p9), %s676_s25, 4294967280  ;;  %s18_s23 = sadd.s32 1, %s987_s23   ;;  %s1381_s18 = smov %s971_s19 }
 0x19c   : > { %p15_p10 = scmp.ge.s32.totalorder %s18_s23, 4   ;;  %s1382_s19 = smov %s975_s20 }
 0x19d   : > { %s1383_s20 = smov %s1073_s6  ;;  %s1384_s21 = smov %s983_s22 }
 0x19e   : > { %s1385_s22 = smov %s1387_s26  ;;  %17 = sbr.rel (!%p15_p10) target bundleno = 4 (0x4), region = 83 }
 0x1a3   :  { %681 = vsyncpa [#allocation4], 1 }
 0x1a4   :  { %683 = vsyncpa [#allocation4 + $0x1], 1 }

// kernel: custom_efficientnet_forward.4
= control target key start
LH: loop header
LB: loop body
LE: loop exit
PB: predicated region body
PF: predicated region fallthrough
CT: control target
= control target key end

     0   :  { %s2088_s17 = smov 0   ;;  %s2960_s0 = inlined_call_operand.vmem [shape: bf16[2,8,8,8], index: 0, kind: input, shape index: {}]   ;;  %s2961_s1 = inlined_call_operand.vmem [shape: bf16[8,128], index: 1, kind: input, shape index: {}]   ;;  %s2962_s2 = inlined_call_operand.vmem [shape: f32[1,128], index: 2, kind: input, shape index: {}]   ;;  %s2963_s3 = inlined_call_operand.vmem [shape: f32[3,3,128], index: 3, kind: input, shape index: {}]   ;;  %s2964_s4 = inlined_call_operand.vmem [shape: f32[1,128], index: 4, kind: input, shape index: {}]   ;;  %s2965_s5 = inlined_call_operand.vmem [shape: bf16[128,128], index: 5, kind: input, shape index: {}]   ;;  %s2966_s6 = inlined_call_operand.vmem [shape: f32[1,128], index: 6, kind: input, shape index: {}]   ;;  %s2967_s7 = inlined_call_operand.vmem [shape: bf16[128,128], index: 7, kind: input, shape index: {}]   ;;  %s2968_s8 = inlined_call_operand.vmem [shape: f32[1,128], index: 8, kind: input, shape index: {}]   ;;  %s2969_s9 = inlined_call_operand.vmem [shape: bf16[128,8], index: 9, kind: input, shape index: {}]   ;;  %s2970_s10 = inlined_call_operand.vmem [shape: f32[1,8], index: 10, kind: input, shape index: {}]   ;;  %s2971_s11 = inlined_call_operand.vmem [shape: bf16[2,64,8], index: 11, kind: output, shape index: {}]  }
   0x1 LB: > { %s1751_s18 = sadd.s32 4294967295, %s2025_s17   ;;  %p1755_p0 = scmp.ge.s32.totalorder %s2025_s17, 1  ;;  %s2025_s17 = sphi %s2088_s17, %s21_s17  }
   0x2   : > { %p337_p1 = scmp.lt.s32.totalorder %s2025_s17, 3 }
   0x4   : > { %p338_p2 = pnand %p1755_p0, %p337_p1 }
   0x5   : > { %p377_p3 = scmp.lt.s32.totalorder (!%p338_p2), %s1751_s18, 1 }
   0x6   : > { %341 = sbr.rel (%p338_p2) target bundleno = 857 (0x359), region = 64 }
   0xb   : > { %v396_v0 = vld [vmem:[%s2961_s1] sm:$0xf]  ;;  %vm434_vm0 = vcmask 1043456   ;;  %s3007_s18 = smov (!%p377_p3, %s1751_s18), 1  ;;  %vm421_vm1 = vcmask 64512   ;;  %v2027_v6 = vmov 0.0  }
   0xc   : > { %v436_v1 = vsel %vm434_vm0, %v396_v0, 0  ;;  %s1896_s21 = sshll.u32 %s3007_s18, 5  ;;  %629 = vst [vmem:[#allocation2 + $0x10] sm:$0xff] %v2027_v6  ;;  %v2116_v7 = vld [vmem:[%s2962_s2] ss:$0 sm:$0xff]  ;;  %vm729_vm5 = vcmask 1046528  }
   0xd   : > { %445 = vmatpush.bf16.msra.mxu0 %v436_v1  ;;  %s2107_s24 = scalar_lea.vmem %s2960_s0, %s1896_s21  ;;  %630 = vst [vmem:[#allocation2 + $0x18] sm:$0x3] %v2027_v6  ;;  %v676_v16 = vld [vmem:[%s2963_s3] sm:$0x7]  ;;  %vm803_vm9 = vcmask 1045504   ;;  %s2937_s12 = scalar_lea.vmem %s2971_s11, %s1896_s21 }
   0xe   : > { %v1898_v2 = vld [vmem:[%s2107_s24] sm:$0xff]  ;;  %v1899_v3 = vld [vmem:[%s2107_s24 + $0x8] sm:$0xff]  ;;  %v1900_v4 = vld [vmem:[%s2107_s24 + $0x10] sm:$0xff]  ;;  %627 = vst [vmem:[#allocation2] sm:$0xff] %v2027_v6  ;;  %v2132_v20 = vperm.slane %v676_v16, 1  ;;  %v2140_v34 = vperm.slane %v676_v16, 2 }
   0xf   : > { %v1901_v5 = vld [vmem:[%s2107_s24 + $0x18] sm:$0xff]  ;;  %628 = vst [vmem:[#allocation2 + $0x8] sm:$0x3] %v2027_v6  ;;  %v2142_v35 = vperm.slane %v676_v16, 0 }
  0x10   : > { %1776 = vmatmul.msk.bf16.vlgmr.msra.gmra.mxu0 %vm421_vm1, %v1898_v2  ;;  %631 = vst [vmem:[#allocation2 + $0x20] sm:$0xff] %v2027_v6  ;;  %v697_v27 = vmul.f32 0.0, %v2132_v20  ;;  %v771_v47 = vmul.f32 0.0, %v2140_v34 }
  0x11   : > { %632 = vst [vmem:[#allocation2 + $0x28] sm:$0x3] %v2027_v6  ;;  %v680_v53 = vmul.f32 0.0, %v2142_v35 }
  0x12   : > { %633 = vst [vmem:[#allocation2 + $0x30] sm:$0xff] %v2027_v6  ;;  %v730_v39 = vrot.slane %v697_v27, 1  ;;  %v804_v58 = vrot.slane %v771_v47, 2 }
  0x13   : > { %634 = vst [vmem:[#allocation2 + $0x38] sm:$0x3] %v2027_v6 }
  0x14   : > { %635 = vst [vmem:[#allocation2 + $0x40] sm:$0xff] %v2027_v6 }
  0x15   : > { %636 = vst [vmem:[#allocation2 + $0x48] sm:$0x3] %v2027_v6 }
  0x16   : > { %637 = vst [vmem:[#allocation2 + $0x50] sm:$0xff] %v2027_v6  ;;  %v657_v25 = vld [vmem:[#allocation2 + $0x8] sm:$0x3] }
  0x17   : > { %638 = vst [vmem:[#allocation2 + $0x58] sm:$0x3] %v2027_v6  ;;  %v698_v30 = vmul.f32 %v2132_v20, %v657_v25  ;;  %v772_v48 = vmul.f32 %v2140_v34, %v657_v25 }
  0x18   : > { %639 = vst [vmem:[#allocation2 + $0x60] sm:$0xff] %v2027_v6 }
  0x19   : > { %640 = vst [vmem:[#allocation2 + $0x68] sm:$0x3] %v2027_v6  ;;  %v731_v43 = vrot.slane %v698_v30, 1  ;;  %v805_v59 = vrot.slane %v772_v48, 2 }
  0x1a   : > { %641 = vst [vmem:[#allocation2 + $0x70] sm:$0xff] %v2027_v6 }
  0x1b   : > { %642 = vst [vmem:[#allocation2 + $0x78] sm:$0x3] %v2027_v6  ;;  %v732_v54 = vsel %vm729_vm5, %v730_v39, %v731_v43 }
  0x1c   : > { %643 = vst [vmem:[#allocation2 + $0x80] sm:$0xff] %v2027_v6  ;;  %v762_v2 = vadd.f32 %v732_v54, %v680_v53 }
  0x1d   : > { %644 = vst [vmem:[#allocation2 + $0x88] sm:$0x3] %v2027_v6 }
  0x1e   : > { %646 = vst [vmem:[#allocation2 + $0x98] sm:$0x3] %v2027_v6 }
  0x20   : > { %1777 = vmatmul.msk.bf16.gmra.mxu0 %vm421_vm1, %v1899_v3 }
  0x30   : > { %1778 = vmatmul.msk.bf16.gmra.mxu0 %vm421_vm1, %v1900_v4 }
  0x40   : > { %1779 = vmatmul.msk.bf16.gmra.mxu0 %vm421_vm1, %v1901_v5  ;;  %v2163_v5 = vld [vmem:[%s2963_s3 + $0x4] sm:$0x7] }
  0x8d   : > { %v447_v8 = vpop.f32.mrf.mxu0 }
  0x8e   : > { %v2119_v9 = vadd.f32 %v2116_v7, %v447_v8 }
  0x90   : > { %v1780_v10 = vmul.f32 -1.442695, %v2119_v9 }
  0x92   : > { %1946 = vpow2.f32 %v1780_v10 }
  0x95   : > { %v449_v11 = vpop.f32.mrf.mxu0 }
  0x96   : > { %v2123_v12 = vadd.f32 %v2116_v7, %v449_v11 }
  0x98   : > { %v1947_v13 = vpop.eup %1946  ;;  %v1781_v14 = vmul.f32 -1.442695, %v2123_v12 }
  0x99   : > { %v491_v15 = vadd.f32 1.0, %v1947_v13 }
  0x9a   : > { %1948 = vpow2.f32 %v1781_v14 }
  0x9b   : > { %1950 = vrcp.f32 %v491_v15  ;;  %v510_v28 = vand.u32 2147483648, %v491_v15  ;;  %v508_v32 = vand.u32 2147483647, %v491_v15  ;;  %vm504_vm3 = vweird.f32 %v491_v15 }
  0x9d   : > { %v452_v17 = vpop.f32.mrf.mxu0  ;;  %v511_v41 = vor.u32 1.1754944e-38, %v510_v28  ;;  %vm509_vm6 = vcmp.eq.f32.partialorder %v508_v32, 8.507059e+37 }
  0x9e   : > { %v2130_v18 = vadd.f32 %v2116_v7, %v452_v17  ;;  %v2175_v17 = vperm.slane %v2163_v5, 0 }
  0xa0   : > { %v1949_v19 = vpop.eup %1948  ;;  %v1782_v21 = vmul.f32 -1.442695, %v2130_v18 }
  0xa1   : > { %v1951_v22 = vpop.eup %1950  ;;  %v492_v23 = vadd.f32 1.0, %v1949_v19  ;;  %v2178_v19 = vperm.slane %v2163_v5, 1 }
  0xa2   : > { %v500_v24 = vmul.f32 %v1951_v22, %v491_v15  ;;  %1952 = vpow2.f32 %v1782_v21  ;;  %vm505_vm2 = vweird.f32 %v1951_v22 }
  0xa3   : > { %1954 = vrcp.f32 %v492_v23  ;;  %vm506_vm4 = vmor %vm504_vm3, %vm505_vm2  ;;  %v525_v51 = vand.u32 2147483648, %v492_v23  ;;  %v523_v56 = vand.u32 2147483647, %v492_v23  ;;  %vm519_vm8 = vweird.f32 %v492_v23 }
  0xa4   : > { %v501_v26 = vsub.f32 1.0, %v500_v24 }
  0xa5   : > { %v454_v29 = vpop.f32.mrf.mxu0  ;;  %v526_v0 = vor.u32 1.1754944e-38, %v525_v51  ;;  %vm524_vm11 = vcmp.eq.f32.partialorder %v523_v56, 8.507059e+37 }
  0xa6   : > { %v502_v31 = vmul.f32 %v1951_v22, %v501_v26  ;;  %v2138_v33 = vadd.f32 %v2116_v7, %v454_v29 }
  0xa8   : > { %v1953_v36 = vpop.eup %1952  ;;  %v503_v37 = vadd.f32 %v1951_v22, %v502_v31  ;;  %v1783_v38 = vmul.f32 -1.442695, %v2138_v33 }
  0xa9   : > { %v1955_v40 = vpop.eup %1954  ;;  %v2145_v42 = vadd.f32 1.0, %v1953_v36 }
  0xaa   : > { %v507_v44 = vsel %vm506_vm4, %v1951_v22, %v503_v37  ;;  %v515_v45 = vmul.f32 %v1955_v40, %v492_v23  ;;  %1956 = vpow2.f32 %v1783_v38  ;;  %vm520_vm7 = vweird.f32 %v1955_v40 }
  0xab   : > { %v512_v46 = vsel %vm509_vm6, %v511_v41, %v507_v44  ;;  %1958 = vrcp.f32 %v2145_v42  ;;  %vm521_vm10 = vmor %vm519_vm8, %vm520_vm7  ;;  %v538_v8 = vand.u32 2147483647, %v2145_v42  ;;  %v540_v13 = vand.u32 2147483648, %v2145_v42 }
  0xac   : > { %v619_v49 = vmul.f32 %v512_v46, %v2119_v9  ;;  %v516_v50 = vsub.f32 1.0, %v515_v45  ;;  %v806_v9 = vsel %vm803_vm9, %v804_v58, %v805_v59  ;;  %vm534_vm13 = vweird.f32 %v2145_v42 }
  0xad   : > { %v457_v52 = vpop.f32.mrf.mxu0  ;;  %vm2183_vm14 = vcmp.eq.f32.partialorder %v538_v8, 8.507059e+37  ;;  %v541_v28 = vor.u32 1.1754944e-38, %v540_v13 }
  0xae   : > { %648 = vst [vmem:[#allocation2 + $0x11] sm:$0xff] %v619_v49  ;;  %v517_v55 = vmul.f32 %v1955_v40, %v516_v50  ;;  %v2154_v57 = vadd.f32 %v2116_v7, %v457_v52 }
  0xb0   : > { %v1957_v60 = vpop.eup %1956  ;;  %v518_v61 = vadd.f32 %v1955_v40, %v517_v55  ;;  %v1784_v62 = vmul.f32 -1.442695, %v2154_v57 }
  0xb1   : > { %v1959_v63 = vpop.eup %1958  ;;  %v2157_v1 = vadd.f32 1.0, %v1957_v60 }
  0xb2   : > { %v522_v3 = vsel %vm521_vm10, %v1955_v40, %v518_v61  ;;  %v530_v4 = vmul.f32 %v1959_v63, %v2145_v42  ;;  %1960 = vpow2.f32 %v1784_v62  ;;  %vm535_vm12 = vweird.f32 %v1959_v63 }
  0xb3   : > { %v527_v6 = vsel %vm524_vm11, %v526_v0, %v522_v3  ;;  %1962 = vrcp.f32 %v2157_v1  ;;  %v553_v29 = vand.u32 2147483647, %v2157_v1  ;;  %v555_v30 = vand.u32 2147483648, %v2157_v1  ;;  %vm536_vm15 = vmor %vm534_vm13, %vm535_vm12 }
  0xb4   : > { %v620_v10 = vmul.f32 %v527_v6, %v2123_v12  ;;  %v531_v11 = vsub.f32 1.0, %v530_v4  ;;  %v836_v12 = vadd.f32 %v806_v9, %v762_v2  ;;  %vm549_vm0 = vweird.f32 %v2157_v1 }
  0xb5   : > { %v2170_v14 = vld [vmem:[#allocation2 + $0x10] sm:$0xff]  ;;  %v2172_v15 = vld [vmem:[#allocation2 + $0x18] sm:$0x3]  ;;  %v459_v16 = vpop.f32.mrf.mxu0  ;;  %vm2209_vm1 = vcmp.eq.f32.partialorder %v553_v29, 8.507059e+37  ;;  %v556_v51 = vor.u32 1.1754944e-38, %v555_v30 }
  0xb6   : > { %v700_v21 = vmul.f32 %v2132_v20, %v2172_v15  ;;  %649 = vst [vmem:[#allocation2 + $0x21] sm:$0xff] %v620_v10  ;;  %v532_v22 = vmul.f32 %v1959_v63, %v531_v11  ;;  %v2188_v24 = vadd.f32 %v2116_v7, %v459_v16  ;;  %v699_v25 = vmul.f32 %v2132_v20, %v2170_v14 }
  0xb7   : > { %v774_v32 = vmul.f32 %v2140_v34, %v2172_v15  ;;  %v773_v38 = vmul.f32 %v2140_v34, %v2170_v14  ;;  %v845_v44 = vmul.f32 %v2175_v17, %v2170_v14  ;;  %v681_v58 = vmul.f32 %v2142_v35, %v2170_v14 }
  0xb8   : > { %v1961_v26 = vpop.eup %1960  ;;  %v533_v27 = vadd.f32 %v1959_v63, %v532_v22  ;;  %v1785_v37 = vmul.f32 -1.442695, %v2188_v24  ;;  %v734_v39 = vrot.slane %v700_v21, 1  ;;  %v733_v42 = vrot.slane %v699_v25, 1 }
  0xb9   : > { %v1963_v31 = vpop.eup %1962  ;;  %v2196_v36 = vadd.f32 1.0, %v1961_v26  ;;  %v808_v48 = vrot.slane %v774_v32, 2  ;;  %v807_v53 = vrot.slane %v773_v38, 2  ;;  %v2228_v61 = vadd.f32 %v845_v44, %v836_v12 }
  0xba   : > { %v537_v40 = vsel %vm536_vm15, %v1959_v63, %v533_v27  ;;  %v545_v41 = vmul.f32 %v1963_v31, %v2157_v1  ;;  %vm550_vm2 = vweird.f32 %v1963_v31  ;;  %v735_v56 = vsel %vm729_vm5, %v733_v42, %v734_v39  ;;  %v1909_v39 = vld [vmem:[%s2965_s5 + $0x38] sm:$0xff] }
  0xbb   : > { %v542_v43 = vsel %vm2183_vm14, %v541_v28, %v537_v40  ;;  %1964 = vrcp.f32 %v2196_v36  ;;  %v568_v55 = vand.u32 2147483647, %v2196_v36  ;;  %vm564_vm3 = vweird.f32 %v2196_v36  ;;  %vm551_vm4 = vmor %vm549_vm0, %vm550_vm2  ;;  %1422 = vmatpush.bf16.msra.mxu1 %v1909_v39 }
  0xbc   : > { %v621_v45 = vmul.f32 %v542_v43, %v2130_v18  ;;  %v546_v46 = vsub.f32 1.0, %v545_v41  ;;  %1966 = vpow2.f32 %v1785_v37  ;;  %v570_v63 = vand.u32 2147483648, %v2196_v36 }
  0xbd   : > { %v2213_v49 = vld [vmem:[#allocation2 + $0x20] sm:$0xff]  ;;  %v2215_v50 = vld [vmem:[#allocation2 + $0x28] sm:$0x3]  ;;  %v462_v52 = vpop.f32.mrf.mxu0  ;;  %v763_v6 = vadd.f32 %v735_v56, %v681_v58  ;;  %v809_v8 = vsel %vm803_vm9, %v807_v53, %v808_v48  ;;  %vm2238_vm6 = vcmp.eq.f32.partialorder %v568_v55, 8.507059e+37  ;;  %v2244_v16 = vmul.f32 %v2178_v19, %v2170_v14 }
  0xbe   : > { %650 = vst [vmem:[#allocation2 + $0x31] sm:$0xff] %v621_v45  ;;  %v547_v54 = vmul.f32 %v1963_v31, %v546_v46  ;;  %v2219_v18 = vadd.f32 %v2116_v7, %v462_v52  ;;  %v701_v59 = vmul.f32 %v2132_v20, %v2213_v49  ;;  %v702_v60 = vmul.f32 %v2132_v20, %v2215_v50 }
  0xbf   : > { %v775_v22 = vmul.f32 %v2140_v34, %v2213_v49  ;;  %v776_v12 = vmul.f32 %v2140_v34, %v2215_v50  ;;  %v571_v26 = vor.u32 1.1754944e-38, %v570_v63  ;;  %v837_v32 = vadd.f32 %v809_v8, %v763_v6 }
  0xc0   : > { %v548_v62 = vadd.f32 %v1963_v31, %v547_v54  ;;  %v1786_v0 = vmul.f32 -1.442695, %v2219_v18  ;;  %v736_v3 = vrot.slane %v701_v59, 1  ;;  %v737_v4 = vrot.slane %v702_v60, 1 }
  0xc1   : > { %v1965_v2 = vpop.eup %1964  ;;  %v846_v37 = vmul.f32 %v2175_v17, %v2213_v49  ;;  %v810_v43 = vrot.slane %v775_v22, 2  ;;  %v811_v44 = vrot.slane %v776_v12, 2 }
  0xc2   : > { %v1967_v9 = vpop.eup %1966  ;;  %v552_v10 = vsel %vm551_vm4, %v1963_v31, %v548_v62  ;;  %v560_v11 = vmul.f32 %v1965_v2, %v2196_v36  ;;  %1968 = vpow2.f32 %v1786_v0  ;;  %v738_v27 = vsel %vm729_vm5, %v736_v3, %v737_v4  ;;  %v1907_v3 = vld [vmem:[%s2965_s5 + $0x28] sm:$0xff] }
  0xc3   : > { %v557_v1 = vsel %vm2209_vm1, %v556_v51, %v552_v10  ;;  %v2248_v21 = vadd.f32 1.0, %v1967_v9  ;;  %v682_v31 = vmul.f32 %v2142_v35, %v2213_v49  ;;  %vm565_vm7 = vweird.f32 %v1965_v2 }
  0xc4   : > { %v622_v23 = vmul.f32 %v557_v1, %v2138_v33  ;;  %v561_v25 = vsub.f32 1.0, %v560_v11  ;;  %vm566_vm8 = vmor %vm564_vm3, %vm565_vm7  ;;  %v2290_v55 = vadd.f32 %v846_v37, %v837_v32  ;;  %v812_v63 = vsel %vm803_vm9, %v810_v43, %v811_v44  ;;  %v1906_v37 = vld [vmem:[%s2965_s5 + $0x20] sm:$0xff] }
  0xc5   : > { %v2256_v28 = vld [vmem:[#allocation2 + $0x30] sm:$0xff]  ;;  %v2258_v29 = vld [vmem:[#allocation2 + $0x38] sm:$0x3]  ;;  %1970 = vrcp.f32 %v2248_v21  ;;  %v464_v30 = vpop.f32.mrf.mxu0  ;;  %v764_v42 = vadd.f32 %v738_v27, %v682_v31  ;;  %v583_v52 = vand.u32 2147483647, %v2248_v21  ;;  %v585_v53 = vand.u32 2147483648, %v2248_v21 }
  0xc6   : > { %651 = vst [vmem:[#allocation2 + $0x41] sm:$0xff] %v622_v23  ;;  %v562_v33 = vmul.f32 %v1965_v2, %v561_v25  ;;  %v2266_v38 = vadd.f32 %v2116_v7, %v464_v30  ;;  %v703_v40 = vmul.f32 %v2132_v20, %v2256_v28  ;;  %v704_v41 = vmul.f32 %v2132_v20, %v2258_v29  ;;  %v1908_v7 = vld [vmem:[%s2965_s5 + $0x30] sm:$0xff] }
  0xc7   : > { %v777_v48 = vmul.f32 %v2140_v34, %v2256_v28  ;;  %v778_v51 = vmul.f32 %v2140_v34, %v2258_v29  ;;  %vm579_vm10 = vweird.f32 %v2248_v21  ;;  %v683_v36 = vmul.f32 %v2142_v35, %v2256_v28  ;;  %1423 = vmatpush.bf16.msra.mxu1 %v1908_v7 }
  0xc8   : > { %v1969_v45 = vpop.eup %1968  ;;  %v563_v46 = vadd.f32 %v1965_v2, %v562_v33  ;;  %v1787_v47 = vmul.f32 -1.442695, %v2266_v38  ;;  %v739_v58 = vrot.slane %v703_v40, 1  ;;  %v740_v59 = vrot.slane %v704_v41, 1 }
  0xc9   : > { %v2288_v54 = vadd.f32 1.0, %v1969_v45  ;;  %v813_v4 = vrot.slane %v777_v48, 2  ;;  %v814_v6 = vrot.slane %v778_v51, 2  ;;  %vm2308_vm11 = vcmp.eq.f32.partialorder %v583_v52, 8.507059e+37 }
  0xca   : > { %v567_v56 = vsel %vm566_vm8, %v1965_v2, %v563_v46  ;;  %1972 = vpow2.f32 %v1787_v47  ;;  %v586_v11 = vor.u32 1.1754944e-38, %v585_v53  ;;  %v838_v13 = vadd.f32 %v812_v63, %v764_v42 }
  0xcb   : > { %v1971_v60 = vpop.eup %1970  ;;  %v572_v62 = vsel %vm2238_vm6, %v571_v26, %v567_v56  ;;  %1974 = vrcp.f32 %v2288_v54  ;;  %v598_v22 = vand.u32 2147483647, %v2288_v54  ;;  %v741_v23 = vsel %vm729_vm5, %v739_v58, %v740_v59  ;;  %1424 = vmatpush.bf16.msra.mxu1 %v1907_v3  ;;  %v1905_v59 = vld [vmem:[%s2965_s5 + $0x18] sm:$0xff] }
  0xcc   : > { %v623_v0 = vmul.f32 %v572_v62, %v2154_v57  ;;  %v575_v2 = vmul.f32 %v1971_v60, %v2248_v21  ;;  %v600_v57 = vand.u32 2147483648, %v2288_v54  ;;  %v847_v30 = vmul.f32 %v2175_v17, %v2256_v28 }
  0xcd   : > { %v2304_v8 = vld [vmem:[#allocation2 + $0x40] sm:$0xff]  ;;  %v2306_v9 = vld [vmem:[#allocation2 + $0x48] sm:$0x3]  ;;  %vm580_vm12 = vweird.f32 %v1971_v60  ;;  %vm594_vm13 = vweird.f32 %v2288_v54  ;;  %v815_v39 = vsel %vm803_vm9, %v813_v4, %v814_v6  ;;  %v765_v44 = vadd.f32 %v741_v23, %v683_v36 }
  0xce   : > { %652 = vst [vmem:[#allocation2 + $0x51] sm:$0xff] %v623_v0  ;;  %v576_v1 = vsub.f32 1.0, %v575_v2  ;;  %v705_v12 = vmul.f32 %v2132_v20, %v2304_v8  ;;  %v706_v25 = vmul.f32 %v2132_v20, %v2306_v9  ;;  %v779_v26 = vmul.f32 %v2140_v34, %v2304_v8  ;;  %vm581_vm15 = vmor %vm579_vm10, %vm580_vm12 }
  0xcf   : > { %v780_v27 = vmul.f32 %v2140_v34, %v2306_v9  ;;  %v601_v41 = vor.u32 1.1754944e-38, %v600_v57  ;;  %vm2333_vm14 = vcmp.eq.f32.partialorder %v598_v22, 8.507059e+37  ;;  %v684_v7 = vmul.f32 %v2142_v35, %v2304_v8  ;;  %1425 = vmatpush.bf16.msra.mxu1 %v1906_v37 }
  0xd0   : > { %v1973_v31 = vpop.eup %1972  ;;  %v577_v32 = vmul.f32 %v1971_v60, %v576_v1  ;;  %v742_v33 = vrot.slane %v705_v12, 1  ;;  %v743_v43 = vrot.slane %v706_v25, 1  ;;  %v848_v48 = vmul.f32 %v2175_v17, %v2304_v8 }
  0xd1   : > { %v1975_v40 = vpop.eup %1974  ;;  %v2330_v42 = vadd.f32 1.0, %v1973_v31  ;;  %v816_v51 = vrot.slane %v779_v26, 2  ;;  %v817_v52 = vrot.slane %v780_v27, 2  ;;  %v2345_v53 = vadd.f32 %v847_v30, %v838_v13 }
  0xd2   : > { %v578_v45 = vadd.f32 %v1971_v60, %v577_v32  ;;  %v590_v46 = vmul.f32 %v1975_v40, %v2288_v54  ;;  %vm595_vm0 = vweird.f32 %v1975_v40  ;;  %v744_v62 = vsel %vm729_vm5, %v742_v33, %v743_v43 }
  0xd3   : > { %1976 = vrcp.f32 %v2330_v42  ;;  %v615_v63 = vand.u32 2147483648, %v2330_v42  ;;  %v766_v2 = vadd.f32 %v744_v62, %v684_v7  ;;  %v613_v6 = vand.u32 2147483647, %v2330_v42  ;;  %1426 = vmatpush.bf16.msra.mxu1 %v1905_v59  ;;  %vm596_vm2 = vmor %vm594_vm13, %vm595_vm0 }
  0xd4   : > { %v582_v56 = vsel %vm581_vm15, %v1971_v60, %v578_v45  ;;  %v591_v58 = vsub.f32 1.0, %v590_v46  ;;  %v839_v60 = vadd.f32 %v815_v39, %v765_v44  ;;  %v818_v1 = vsel %vm803_vm9, %v816_v51, %v817_v52  ;;  %v1903_v51 = vld [vmem:[%s2965_s5 + $0x8] sm:$0xff] }
  0xd5   : > { %v2351_v36 = vld [vmem:[#allocation2 + $0x50] sm:$0xff]  ;;  %v587_v21 = vsel %vm2308_vm11, %v586_v11, %v582_v56  ;;  %v2356_v0 = vld [vmem:[#allocation2 + $0x58] sm:$0x3]  ;;  %vm609_vm1 = vweird.f32 %v2330_v42  ;;  %v840_v23 = vadd.f32 %v818_v1, %v766_v2  ;;  %v616_v27 = vor.u32 1.1754944e-38, %v615_v63 }
  0xd6   : > { %v624_v3 = vmul.f32 %v587_v21, %v2188_v24  ;;  %v592_v4 = vmul.f32 %v1975_v40, %v591_v58  ;;  %v707_v57 = vmul.f32 %v2132_v20, %v2351_v36  ;;  %v708_v13 = vmul.f32 %v2132_v20, %v2356_v0  ;;  %v1904_v24 = vld [vmem:[%s2965_s5 + $0x10] sm:$0xff] }
  0xd7   : > { %v781_v10 = vmul.f32 %v2140_v34, %v2351_v36  ;;  %v782_v11 = vmul.f32 %v2140_v34, %v2356_v0  ;;  %v849_v25 = vmul.f32 %v2175_v17, %v2351_v36  ;;  %vm2379_vm3 = vcmp.eq.f32.partialorder %v613_v6, 8.507059e+37  ;;  %1427 = vmatpush.bf16.msra.mxu1 %v1904_v24 }
  0xd8   : > { %653 = vst [vmem:[#allocation2 + $0x61] sm:$0xff] %v624_v3  ;;  %v593_v22 = vadd.f32 %v1975_v40, %v592_v4  ;;  %v745_v12 = vrot.slane %v707_v57, 1  ;;  %v746_v30 = vrot.slane %v708_v13, 1  ;;  %v685_v43 = vmul.f32 %v2142_v35, %v2351_v36  ;;  %v1902_v13 = vld [vmem:[%s2965_s5] sm:$0xff] }
  0xd9   : > { %v1977_v26 = vpop.eup %1976  ;;  %v819_v31 = vrot.slane %v781_v10, 2  ;;  %v820_v32 = vrot.slane %v782_v11, 2  ;;  %v2385_v44 = vadd.f32 %v848_v48, %v839_v60  ;;  %v2396_v48 = vadd.f32 %v849_v25, %v840_v23 }
  0xda   : > { %v597_v37 = vsel %vm596_vm2, %v1975_v40, %v593_v22  ;;  %v605_v33 = vmul.f32 %v1977_v26, %v2330_v42  ;;  %vm610_vm4 = vweird.f32 %v1977_v26  ;;  %v747_v45 = vsel %vm729_vm5, %v745_v12, %v746_v30 }
  0xdb   : > { %v602_v54 = vsel %vm2333_vm14, %v601_v41, %v597_v37  ;;  %v863_v40 = vmul.f32 %v2178_v19, %v2172_v15  ;;  %v767_v52 = vadd.f32 %v747_v45, %v685_v43  ;;  %v821_v47 = vsel %vm803_vm9, %v819_v31, %v820_v32  ;;  %1428 = vmatpush.bf16.msra.mxu1 %v1903_v51  ;;  %vm611_vm6 = vmor %vm609_vm1, %vm610_vm4 }
  0xdc   : > { %v625_v46 = vmul.f32 %v602_v54, %v2219_v18  ;;  %v606_v7 = vsub.f32 1.0, %v605_v33  ;;  %v2401_v41 = vmul.f32 %v2178_v19, %v2213_v49  ;;  %v2405_v56 = vmul.f32 %v2178_v19, %v2215_v50 }
  0xdd   : > { %v2409_v18 = vmul.f32 %v2178_v19, %v2256_v28  ;;  %v2413_v59 = vmul.f32 %v2178_v19, %v2258_v29  ;;  %v2417_v62 = vmul.f32 %v2178_v19, %v2304_v8  ;;  %v2421_v21 = vmul.f32 %v2178_v19, %v2306_v9 }
  0xde   : > { %654 = vst [vmem:[#allocation2 + $0x71] sm:$0xff] %v625_v46  ;;  %v607_v58 = vmul.f32 %v1977_v26, %v606_v7  ;;  %v841_v60 = vadd.f32 %v821_v47, %v767_v52  ;;  %v2429_v3 = vmul.f32 %v2178_v19, %v2351_v36  ;;  %v2433_v4 = vmul.f32 %v2178_v19, %v2356_v0 }
  0xdf   : > { %v2423_v63 = vld [vmem:[#allocation2 + $0x60] sm:$0xff]  ;;  %v2425_v2 = vld [vmem:[#allocation2 + $0x68] sm:$0x3]  ;;  %v894_v6 = vrot.slane %v2244_v16, 1  ;;  %v895_v1 = vrot.slane %v863_v40, 1  ;;  %v897_v12 = vrot.slane %v2401_v41, 1  ;;  %1429 = vmatpush.bf16.msra.mxu1 %v1902_v13 }
  0xe0   : > { %v608_v57 = vadd.f32 %v1977_v26, %v607_v58  ;;  %v709_v10 = vmul.f32 %v2132_v20, %v2423_v63  ;;  %v710_v11 = vmul.f32 %v2132_v20, %v2425_v2  ;;  %v783_v16 = vmul.f32 %v2140_v34, %v2423_v63 }
  0xe1   : > { %v784_v22 = vmul.f32 %v2140_v34, %v2425_v2  ;;  %v850_v24 = vmul.f32 %v2175_v17, %v2423_v63  ;;  %v686_v25 = vmul.f32 %v2142_v35, %v2423_v63  ;;  %v872_v33 = vmul.f32 %v2178_v19, %v2423_v63 }
  0xe2   : > { %v612_v23 = vsel %vm611_vm6, %v1977_v26, %v608_v57  ;;  %v748_v30 = vrot.slane %v709_v10, 1  ;;  %v749_v31 = vrot.slane %v710_v11, 1  ;;  %v822_v32 = vrot.slane %v783_v16, 2 }
  0xe3   : > { %v617_v42 = vsel %vm2379_vm3, %v616_v27, %v612_v23  ;;  %v823_v37 = vrot.slane %v784_v22, 2  ;;  %v858_v45 = vadd.f32 %v850_v24, %v841_v60  ;;  %v873_v26 = vmul.f32 %v2178_v19, %v2425_v2 }
  0xe4   : > { %v626_v43 = vmul.f32 %v617_v42, %v2266_v38  ;;  %v750_v54 = vsel %vm729_vm5, %v748_v30, %v749_v31  ;;  %v896_v7 = vsel %vm729_vm5, %v894_v6, %v895_v1  ;;  %v898_v51 = vrot.slane %v2405_v56, 1 }
  0xe5   : > { %v2463_v40 = vld [vmem:[#allocation2 + $0x70] sm:$0xff]  ;;  %v2465_v46 = vld [vmem:[#allocation2 + $0x78] sm:$0x3]  ;;  %v768_v39 = vadd.f32 %v750_v54, %v686_v25  ;;  %v824_v27 = vsel %vm803_vm9, %v822_v32, %v823_v37  ;;  %v900_v41 = vrot.slane %v2409_v18, 1  ;;  %v903_v22 = vrot.slane %v2417_v62, 1 }
  0xe6   : > { %655 = vst [vmem:[#allocation2 + $0x81] sm:$0xff] %v626_v43  ;;  %v711_v38 = vmul.f32 %v2132_v20, %v2463_v40  ;;  %v712_v52 = vmul.f32 %v2132_v20, %v2465_v46  ;;  %v785_v47 = vmul.f32 %v2140_v34, %v2463_v40  ;;  %v786_v58 = vmul.f32 %v2140_v34, %v2465_v46 }
  0xe7   : > { %v842_v60 = vadd.f32 %v824_v27, %v768_v39  ;;  %v851_v6 = vmul.f32 %v2175_v17, %v2463_v40  ;;  %v874_v56 = vmul.f32 %v2178_v19, %v2463_v40  ;;  %v875_v20 = vmul.f32 %v2178_v19, %v2465_v46  ;;  %v678_v27 = vld [vmem:[%s2963_s3 + $0x8] sm:$0x7] }
  0xe8   : > { %v751_v57 = vrot.slane %v711_v38, 1  ;;  %v752_v13 = vrot.slane %v712_v52, 1  ;;  %v825_v10 = vrot.slane %v785_v47, 2  ;;  %v687_v11 = vmul.f32 %v2142_v35, %v2463_v40 }
  0xe9   : > { %v826_v18 = vrot.slane %v786_v58, 2  ;;  %v859_v1 = vadd.f32 %v851_v6, %v842_v60  ;;  %v901_v34 = vrot.slane %v2413_v59, 1  ;;  %v904_v24 = vrot.slane %v2421_v21, 1 }
  0xea   : > { %v753_v16 = vsel %vm729_vm5, %v751_v57, %v752_v13  ;;  %v906_v23 = vrot.slane %v2429_v3, 1  ;;  %v899_v30 = vsel %vm729_vm5, %v897_v12, %v898_v51  ;;  %v907_v31 = vrot.slane %v2433_v4, 1 }
  0xeb   : > { %v769_v25 = vadd.f32 %v753_v16, %v687_v11  ;;  %v909_v42 = vrot.slane %v872_v33, 1  ;;  %v827_v35 = vsel %vm803_vm9, %v825_v10, %v826_v18  ;;  %v910_v32 = vrot.slane %v873_v26, 1 }
  0xec   : > { %v912_v37 = vrot.slane %v874_v56, 1  ;;  %v913_v43 = vrot.slane %v875_v20, 1  ;;  %v902_v21 = vsel %vm729_vm5, %v900_v41, %v901_v34  ;;  %v905_v3 = vsel %vm729_vm5, %v903_v22, %v904_v24 }
  0xed   : > { %v2495_v59 = vld [vmem:[#allocation2 + $0x80] sm:$0xff]  ;;  %v2497_v54 = vld [vmem:[#allocation2 + $0x88] sm:$0x3]  ;;  %v843_v62 = vadd.f32 %v827_v35, %v769_v25  ;;  %v908_v39 = vsel %vm729_vm5, %v906_v23, %v907_v31  ;;  %v911_v26 = vsel %vm729_vm5, %v909_v42, %v910_v32  ;;  %v926_v38 = vadd.f32 %v896_v7, %v2228_v61 }
  0xee   : > { %v852_v4 = vmul.f32 %v2175_v17, %v2495_v59  ;;  %v876_v12 = vmul.f32 %v2178_v19, %v2495_v59  ;;  %v877_v33 = vmul.f32 %v2178_v19, %v2497_v54  ;;  %v914_v51 = vsel %vm729_vm5, %v912_v37, %v913_v43 }
  0xef   : > { %v927_v52 = vadd.f32 %v899_v30, %v2290_v55  ;;  %v928_v41 = vadd.f32 %v902_v21, %v2345_v53  ;;  %v929_v58 = vadd.f32 %v905_v3, %v2385_v44  ;;  %v930_v19 = vadd.f32 %v908_v39, %v2396_v48 }
  0xf0   : > { %v915_v47 = vrot.slane %v876_v12, 1  ;;  %v916_v17 = vrot.slane %v877_v33, 1  ;;  %v860_v60 = vadd.f32 %v852_v4, %v843_v62  ;;  %v931_v6 = vadd.f32 %v911_v26, %v858_v45 }
  0xf1   : > { %v934_v56 = vperm.slane %v2163_v5, 2  ;;  %v932_v13 = vadd.f32 %v914_v51, %v859_v1  ;;  %v1007_v10 = vperm.slane %v678_v27, 0  ;;  %v2520_v20 = vperm.slane %v678_v27, 1 }
  0xf2   : > { %v917_v57 = vsel %vm729_vm5, %v915_v47, %v916_v17  ;;  %v2525_v7 = vperm.slane %v678_v27, 2 }
  0xf3   : > { %v935_v61 = vmul.f32 %v934_v56, %v2170_v14  ;;  %v936_v55 = vmul.f32 %v934_v56, %v2172_v15  ;;  %v937_v53 = vmul.f32 %v934_v56, %v2213_v49  ;;  %v938_v44 = vmul.f32 %v934_v56, %v2215_v50 }
  0xf4   : > { %v939_v48 = vmul.f32 %v934_v56, %v2256_v28  ;;  %v940_v5 = vmul.f32 %v934_v56, %v2258_v29  ;;  %v941_v45 = vmul.f32 %v934_v56, %v2304_v8  ;;  %v942_v11 = vmul.f32 %v934_v56, %v2306_v9 }
  0xf5   : > { %v943_v18 = vmul.f32 %v934_v56, %v2351_v36  ;;  %v944_v14 = vmul.f32 %v934_v56, %v2356_v0  ;;  %v945_v15 = vmul.f32 %v934_v56, %v2423_v63  ;;  %v946_v1 = vmul.f32 %v934_v56, %v2425_v2 }
  0xf6   : > { %v947_v34 = vmul.f32 %v934_v56, %v2463_v40  ;;  %v948_v16 = vmul.f32 %v934_v56, %v2465_v46  ;;  %v949_v22 = vmul.f32 %v934_v56, %v2495_v59  ;;  %v950_v24 = vmul.f32 %v934_v56, %v2497_v54 }
  0xf7   : > { %v967_v23 = vrot.slane %v935_v61, 2  ;;  %v968_v25 = vrot.slane %v936_v55, 2  ;;  %v970_v30 = vrot.slane %v937_v53, 2  ;;  %v971_v31 = vrot.slane %v938_v44, 2 }
  0xf8   : > { %v973_v42 = vrot.slane %v939_v48, 2  ;;  %v974_v35 = vrot.slane %v940_v5, 2  ;;  %v976_v32 = vrot.slane %v941_v45, 2  ;;  %v933_v37 = vadd.f32 %v917_v57, %v860_v60 }
  0xf9   : > { %v977_v43 = vrot.slane %v942_v11, 2  ;;  %v979_v62 = vrot.slane %v943_v18, 2  ;;  %v980_v21 = vrot.slane %v944_v14, 2  ;;  %v969_v3 = vsel %vm803_vm9, %v967_v23, %v968_v25 }
  0xfa   : > { %v972_v39 = vsel %vm803_vm9, %v970_v30, %v971_v31  ;;  %v982_v4 = vrot.slane %v945_v15, 2  ;;  %v983_v12 = vrot.slane %v946_v1, 2  ;;  %v975_v33 = vsel %vm803_vm9, %v973_v42, %v974_v35  ;;  %v675_v42 = vld [vmem:[#allocation2 + $0x98] sm:$0x3] }
  0xfb   : > { %v978_v26 = vsel %vm803_vm9, %v976_v32, %v977_v43  ;;  %v985_v27 = vrot.slane %v947_v34, 2  ;;  %v986_v51 = vrot.slane %v948_v16, 2  ;;  %v981_v47 = vsel %vm803_vm9, %v979_v62, %v980_v21 }
  0xfc   : > { %v984_v17 = vsel %vm803_vm9, %v982_v4, %v983_v12  ;;  %v988_v60 = vrot.slane %v949_v22, 2  ;;  %v989_v56 = vrot.slane %v950_v24, 2  ;;  %v999_v61 = vadd.f32 %v969_v3, %v926_v38 }
  0xfd   : > { %v987_v57 = vsel %vm803_vm9, %v985_v27, %v986_v51  ;;  %v1000_v55 = vadd.f32 %v972_v39, %v927_v52  ;;  %v1001_v53 = vadd.f32 %v975_v33, %v928_v41  ;;  %v1002_v48 = vadd.f32 %v978_v26, %v929_v58 }
  0xfe   : > { %v990_v44 = vsel %vm803_vm9, %v988_v60, %v989_v56  ;;  %v1003_v5 = vadd.f32 %v981_v47, %v930_v19  ;;  %v1004_v45 = vadd.f32 %v984_v17, %v931_v6  ;;  %v1005_v11 = vadd.f32 %v987_v57, %v932_v13 }
  0xff   : > { %v1008_v18 = vmul.f32 %v1007_v10, %v2213_v49  ;;  %v1009_v14 = vmul.f32 %v1007_v10, %v2256_v28  ;;  %v1010_v15 = vmul.f32 %v1007_v10, %v2304_v8  ;;  %v1011_v1 = vmul.f32 %v1007_v10, %v2351_v36 }
 0x100   : > { %v1012_v34 = vmul.f32 %v1007_v10, %v2423_v63  ;;  %v1013_v38 = vmul.f32 %v1007_v10, %v2463_v40  ;;  %v1014_v52 = vmul.f32 %v1007_v10, %v2495_v59  ;;  %v1006_v41 = vadd.f32 %v990_v44, %v933_v37 }
 0x101   : > { %v1015_v16 = vmul.f32 0.0, %v1007_v10  ;;  %v1016_v58 = vadd.f32 %v1008_v18, %v999_v61  ;;  %v1017_v19 = vadd.f32 %v1009_v14, %v1000_v55  ;;  %v1018_v6 = vadd.f32 %v1010_v15, %v1001_v53 }
 0x102   : > { %v1019_v13 = vadd.f32 %v1011_v1, %v1002_v48  ;;  %v1020_v22 = vadd.f32 %v1012_v34, %v1003_v5  ;;  %v1021_v24 = vadd.f32 %v1013_v38, %v1004_v45  ;;  %v1022_v23 = vadd.f32 %v1014_v52, %v1005_v11 }
 0x103   : > { %v1025_v25 = vmul.f32 %v2520_v20, %v2213_v49  ;;  %v1026_v30 = vmul.f32 %v2520_v20, %v2215_v50  ;;  %v1027_v31 = vmul.f32 %v2520_v20, %v2256_v28  ;;  %v1028_v10 = vmul.f32 %v2520_v20, %v2258_v29 }
 0x104   : > { %v1029_v35 = vmul.f32 %v2520_v20, %v2304_v8  ;;  %v1030_v32 = vmul.f32 %v2520_v20, %v2306_v9  ;;  %v1031_v37 = vmul.f32 %v2520_v20, %v2351_v36  ;;  %v1032_v43 = vmul.f32 %v2520_v20, %v2356_v0 }
 0x105   : > { %v1033_v62 = vmul.f32 %v2520_v20, %v2423_v63  ;;  %v1034_v21 = vmul.f32 %v2520_v20, %v2425_v2  ;;  %v1035_v3 = vmul.f32 %v2520_v20, %v2463_v40  ;;  %v1036_v39 = vmul.f32 %v2520_v20, %v2465_v46 }
 0x106   : > { %v1037_v4 = vmul.f32 %v2520_v20, %v2495_v59  ;;  %v1038_v12 = vmul.f32 %v2520_v20, %v2497_v54  ;;  %v1039_v33 = vmul.f32 0.0, %v2520_v20  ;;  %v1040_v26 = vmul.f32 %v2520_v20, %v675_v42 }
 0x107   : > { %v1057_v27 = vrot.slane %v1025_v25, 1  ;;  %v1058_v51 = vrot.slane %v1026_v30, 1  ;;  %v1060_v47 = vrot.slane %v1027_v31, 1  ;;  %v1061_v17 = vrot.slane %v1028_v10, 1 }
 0x108   : > { %v1063_v60 = vrot.slane %v1029_v35, 1  ;;  %v1064_v56 = vrot.slane %v1030_v32, 1  ;;  %v1066_v57 = vrot.slane %v1031_v37, 1  ;;  %v1067_v55 = vrot.slane %v1032_v43, 1 }
 0x109   : > { %v1059_v61 = vsel %vm729_vm5, %v1057_v27, %v1058_v51  ;;  %v1069_v53 = vrot.slane %v1033_v62, 1  ;;  %v1070_v44 = vrot.slane %v1034_v21, 1  ;;  %v1062_v48 = vsel %vm729_vm5, %v1060_v47, %v1061_v17 }
 0x10a   : > { %v1065_v5 = vsel %vm729_vm5, %v1063_v60, %v1064_v56  ;;  %v1072_v45 = vrot.slane %v1035_v3, 1  ;;  %v1073_v11 = vrot.slane %v1036_v39, 1  ;;  %v1068_v20 = vsel %vm729_vm5, %v1066_v57, %v1067_v55  ;;  %v1944_v60 = vld [vmem:[%s2964_s4] ss:$0 sm:$0xff] }
 0x10b   : > { %v1071_v18 = vsel %vm729_vm5, %v1069_v53, %v1070_v44  ;;  %v1075_v14 = vrot.slane %v1037_v4, 1  ;;  %v1076_v15 = vrot.slane %v1038_v12, 1  ;;  %v1023_v1 = vadd.f32 %v1015_v16, %v1006_v41 }
 0x10c   : > { %v1074_v34 = vsel %vm729_vm5, %v1072_v45, %v1073_v11  ;;  %v1078_v38 = vrot.slane %v1039_v33, 1  ;;  %v1079_v52 = vrot.slane %v1040_v26, 1  ;;  %v1089_v30 = vadd.f32 %v1059_v61, %v1016_v58 }
 0x10d   : > { %v1077_v25 = vsel %vm729_vm5, %v1075_v14, %v1076_v15  ;;  %v1090_v31 = vadd.f32 %v1062_v48, %v1017_v19  ;;  %v1091_v10 = vadd.f32 %v1065_v5, %v1018_v6  ;;  %v1092_v32 = vadd.f32 %v1068_v20, %v1019_v13 }
 0x10e   : > { %v1080_v35 = vsel %vm729_vm5, %v1078_v38, %v1079_v52  ;;  %v1093_v37 = vadd.f32 %v1071_v18, %v1020_v22  ;;  %v1094_v43 = vadd.f32 %v1074_v34, %v1021_v24  ;;  %v1095_v62 = vadd.f32 %v1077_v25, %v1022_v23  ;;  %v2018_v22 = vld [vmem:[#allocation2] sm:$0xff] }
 0x10f   : > { %v1098_v21 = vmul.f32 %v2525_v7, %v2213_v49  ;;  %v1099_v41 = vmul.f32 %v2525_v7, %v2215_v50  ;;  %v1100_v16 = vmul.f32 %v2525_v7, %v2256_v28  ;;  %v1101_v58 = vmul.f32 %v2525_v7, %v2258_v29 }
 0x110   : > { %v1102_v19 = vmul.f32 %v2525_v7, %v2304_v8  ;;  %v1103_v6 = vmul.f32 %v2525_v7, %v2306_v9  ;;  %v1104_v13 = vmul.f32 %v2525_v7, %v2351_v36  ;;  %v1105_v49 = vmul.f32 %v2525_v7, %v2356_v0 }
 0x111   : > { %v1106_v50 = vmul.f32 %v2525_v7, %v2423_v63  ;;  %v1107_v28 = vmul.f32 %v2525_v7, %v2425_v2  ;;  %v1108_v29 = vmul.f32 %v2525_v7, %v2463_v40  ;;  %v1109_v8 = vmul.f32 %v2525_v7, %v2465_v46 }
 0x112   : > { %v1110_v9 = vmul.f32 %v2525_v7, %v2495_v59  ;;  %v1111_v36 = vmul.f32 %v2525_v7, %v2497_v54  ;;  %v1112_v0 = vmul.f32 %v2018_v22, %v2525_v7  ;;  %v1113_v63 = vmul.f32 %v2525_v7, %v675_v42 }
 0x113   : > { %v1130_v24 = vrot.slane %v1098_v21, 2  ;;  %v1131_v23 = vrot.slane %v1099_v41, 2  ;;  %v1133_v2 = vrot.slane %v1100_v16, 2  ;;  %v1134_v3 = vrot.slane %v1101_v58, 2 }
 0x114   : > { %v1136_v39 = vrot.slane %v1102_v19, 2  ;;  %v1137_v40 = vrot.slane %v1103_v6, 2  ;;  %v1139_v4 = vrot.slane %v1104_v13, 2  ;;  %v1096_v12 = vadd.f32 %v1080_v35, %v1023_v1 }
 0x115   : > { %v1140_v46 = vrot.slane %v1105_v49, 2  ;;  %v1142_v33 = vrot.slane %v1106_v50, 2  ;;  %v1143_v26 = vrot.slane %v1107_v28, 2  ;;  %v1132_v59 = vsel %vm803_vm9, %v1130_v24, %v1131_v23 }
 0x116   : > { %v1135_v54 = vsel %vm803_vm9, %v1133_v2, %v1134_v3  ;;  %v1145_v27 = vrot.slane %v1108_v29, 2  ;;  %v1146_v51 = vrot.slane %v1109_v8, 2  ;;  %v1138_v47 = vsel %vm803_vm9, %v1136_v39, %v1137_v40 }
 0x117   : > { %v1141_v7 = vsel %vm803_vm9, %v1139_v4, %v1140_v46  ;;  %v1148_v42 = vrot.slane %v1110_v9, 2  ;;  %v1149_v17 = vrot.slane %v1111_v36, 2  ;;  %v1144_v56 = vsel %vm803_vm9, %v1142_v33, %v1143_v26 }
 0x118   : > { %v1151_v57 = vrot.slane %v1112_v0, 2  ;;  %v1152_v61 = vrot.slane %v1113_v63, 2  ;;  %v1162_v55 = vadd.f32 %v1132_v59, %v1089_v30  ;;  %v1147_v53 = vsel %vm803_vm9, %v1145_v27, %v1146_v51 }
 0x119   : > { %v1163_v44 = vadd.f32 %v1135_v54, %v1090_v31  ;;  %v1164_v48 = vadd.f32 %v1138_v47, %v1091_v10  ;;  %v1165_v5 = vadd.f32 %v1141_v7, %v1092_v32  ;;  %v1150_v45 = vsel %vm803_vm9, %v1148_v42, %v1149_v17 }
 0x11a   : > { %v1153_v11 = vsel %vm803_vm9, %v1151_v57, %v1152_v61  ;;  %v1166_v20 = vadd.f32 %v1144_v56, %v1093_v37  ;;  %v1167_v18 = vadd.f32 %v1147_v53, %v1094_v43  ;;  %v1168_v14 = vadd.f32 %v1150_v45, %v1095_v62 }
 0x11b   : > { %v2634_v15 = vadd.f32 %v1944_v60, %v1162_v55  ;;  %v2636_v1 = vadd.f32 %v1944_v60, %v1163_v44  ;;  %v2638_v34 = vadd.f32 %v1944_v60, %v1164_v48  ;;  %v2640_v38 = vadd.f32 %v1944_v60, %v1165_v5 }
 0x11c   : > { %v2642_v52 = vadd.f32 %v1944_v60, %v1166_v20  ;;  %v2644_v25 = vadd.f32 %v1944_v60, %v1167_v18  ;;  %v1169_v35 = vadd.f32 %v1153_v11, %v1096_v12  ;;  %v2650_v37 = vadd.f32 %v1944_v60, %v1168_v14 }
 0x11d   : > { %v1788_v30 = vmul.f32 -1.442695, %v2634_v15  ;;  %v1789_v31 = vmul.f32 -1.442695, %v2636_v1  ;;  %v1790_v10 = vmul.f32 -1.442695, %v2638_v34 }
 0x11e   : > { %v1791_v32 = vmul.f32 -1.442695, %v2640_v38  ;;  %v1792_v43 = vmul.f32 -1.442695, %v2642_v52  ;;  %v1793_v62 = vmul.f32 -1.442695, %v2644_v25  ;;  %v2654_v21 = vadd.f32 %v1944_v60, %v1169_v35 }
 0x11f   : > { %1978 = vpow2.f32 %v1788_v30  ;;  %v1794_v41 = vmul.f32 -1.442695, %v2650_v37 }
 0x120   : > { %1980 = vpow2.f32 %v1789_v31  ;;  %v1795_v19 = vmul.f32 -1.442695, %v2654_v21 }
 0x121   : > { %1982 = vpow2.f32 %v1790_v10 }
 0x122   : > { %1984 = vpow2.f32 %v1791_v32 }
 0x123   : > { %1986 = vpow2.f32 %v1792_v43 }
 0x124   : > { %1988 = vpow2.f32 %v1793_v62 }
 0x125   : > { %v1979_v16 = vpop.eup %1978  ;;  %1990 = vpow2.f32 %v1794_v41 }
 0x126   : > { %v1981_v58 = vpop.eup %1980  ;;  %v2658_v6 = vadd.f32 1.0, %v1979_v16 }
 0x127   : > { %v1983_v13 = vpop.eup %1982  ;;  %v1207_v49 = vadd.f32 1.0, %v1981_v58 }
 0x128   : > { %v1985_v50 = vpop.eup %1984  ;;  %v2660_v28 = vadd.f32 1.0, %v1983_v13  ;;  %1992 = vrcp.f32 %v2658_v6  ;;  %v1225_v22 = vand.u32 2147483648, %v2658_v6  ;;  %vm1219_vm5 = vweird.f32 %v2658_v6 }
 0x129   : > { %v1987_v29 = vpop.eup %1986  ;;  %v2663_v8 = vadd.f32 1.0, %v1985_v50  ;;  %1994 = vrcp.f32 %v1207_v49  ;;  %v1238_v3 = vand.u32 2147483647, %v1207_v49  ;;  %v1240_v39 = vand.u32 2147483648, %v1207_v49 }
 0x12a   : > { %v1989_v9 = vpop.eup %1988  ;;  %1996 = vpow2.f32 %v1795_v19  ;;  %v2665_v36 = vadd.f32 1.0, %v1987_v29  ;;  %v1223_v4 = vand.u32 2147483647, %v2658_v6  ;;  %v2681_v12 = vor.u32 1.1754944e-38, %v1225_v22 }
 0x12b   : > { %1998 = vrcp.f32 %v2660_v28  ;;  %v1991_v0 = vpop.eup %1990  ;;  %v2669_v63 = vadd.f32 1.0, %v1989_v9  ;;  %vm1234_vm9 = vweird.f32 %v1207_v49  ;;  %vm1249_vm7 = vweird.f32 %v2660_v28 }
 0x12c   : > { %2000 = vrcp.f32 %v2663_v8  ;;  %v1253_v59 = vand.u32 2147483647, %v2660_v28  ;;  %v2689_v54 = vadd.f32 1.0, %v1991_v0  ;;  %v1255_v47 = vand.u32 2147483648, %v2660_v28 }
 0x12d   : > { %2002 = vrcp.f32 %v2665_v36  ;;  %vm2699_vm8 = vcmp.eq.f32.partialorder %v1238_v3, 8.507059e+37  ;;  %v1241_v56 = vor.u32 1.1754944e-38, %v1240_v39  ;;  %vm1264_vm10 = vweird.f32 %v2663_v8 }
 0x12e   : > { %v2672_v24 = vpop.eup %1992  ;;  %2004 = vrcp.f32 %v2669_v63  ;;  %v1268_v44 = vand.u32 2147483647, %v2663_v8  ;;  %vm2711_vm12 = vcmp.eq.f32.partialorder %v1223_v4, 8.507059e+37  ;;  %vm2716_vm14 = vcmp.eq.f32.partialorder %v1253_v59, 8.507059e+37 }
 0x12f   : > { %v2675_v23 = vpop.eup %1994  ;;  %v1215_v2 = vmul.f32 %v2672_v24, %v2658_v6  ;;  %vm1220_vm11 = vweird.f32 %v2672_v24  ;;  %v1270_v45 = vand.u32 2147483648, %v2663_v8  ;;  %v1256_v14 = vor.u32 1.1754944e-38, %v1255_v47 }
 0x130   : > { %v1997_v40 = vpop.eup %1996  ;;  %v1230_v46 = vmul.f32 %v2675_v23, %v1207_v49  ;;  %vm1235_vm13 = vweird.f32 %v2675_v23  ;;  %2006 = vrcp.f32 %v2689_v54  ;;  %vm1279_vm1 = vweird.f32 %v2665_v36  ;;  %vm2743_vm2 = vmor %vm1219_vm5, %vm1220_vm11 }
 0x131   : > { %v2684_v33 = vpop.eup %1998  ;;  %v1216_v26 = vsub.f32 1.0, %v1215_v2  ;;  %v2696_v42 = vadd.f32 1.0, %v1997_v40  ;;  %vm2731_vm0 = vmor %vm1234_vm9, %vm1235_vm13  ;;  %v1283_v41 = vand.u32 2147483647, %v2665_v36  ;;  %vm2761_vm6 = vcmp.eq.f32.partialorder %v1268_v44, 8.507059e+37  ;;  %v1915_v2 = vld [vmem:[%s2967_s7 + $0x28] sm:$0xff] }
 0x132   : > { %v1231_v27 = vsub.f32 1.0, %v1230_v46  ;;  %v1245_v51 = vmul.f32 %v2684_v33, %v2660_v28  ;;  %v2694_v7 = vpop.eup %2000  ;;  %vm1250_vm15 = vweird.f32 %v2684_v33  ;;  %v1271_v29 = vor.u32 1.1754944e-38, %v1270_v45 }
 0x133   : > { %v1217_v17 = vmul.f32 %v2672_v24, %v1216_v26  ;;  %v2704_v57 = vpop.eup %2002  ;;  %v1260_v53 = vmul.f32 %v2694_v7, %v2663_v8  ;;  %vm1265_vm3 = vweird.f32 %v2694_v7  ;;  %vm2756_vm4 = vmor %vm1249_vm7, %vm1250_vm15  ;;  %v1285_v3 = vand.u32 2147483648, %v2665_v36 }
 0x134   : > { %v1232_v61 = vmul.f32 %v2675_v23, %v1231_v27  ;;  %v1246_v55 = vsub.f32 1.0, %v1245_v51  ;;  %v1275_v11 = vmul.f32 %v2704_v57, %v2665_v36  ;;  %v2725_v31 = vpop.eup %2004  ;;  %vm1280_vm5 = vweird.f32 %v2704_v57  ;;  %vm2777_vm9 = vmor %vm1264_vm10, %vm1265_vm3 }
 0x135   : > { %v1261_v30 = vsub.f32 1.0, %v1260_v53  ;;  %v1218_v10 = vadd.f32 %v2672_v24, %v1217_v17  ;;  %v1290_v13 = vmul.f32 %v2725_v31, %v2669_v63  ;;  %vm1294_vm7 = vweird.f32 %v2669_v63  ;;  %vm2802_vm10 = vmor %vm1279_vm1, %vm1280_vm5 }
 0x136   : > { %v1233_v20 = vadd.f32 %v2675_v23, %v1232_v61  ;;  %v1247_v18 = vmul.f32 %v2684_v33, %v1246_v55  ;;  %v1276_v35 = vsub.f32 1.0, %v1275_v11  ;;  %2008 = vrcp.f32 %v2696_v42 }
 0x137   : > { %v1262_v62 = vmul.f32 %v2694_v7, %v1261_v30  ;;  %v1222_v9 = vsel %vm2743_vm2, %v2672_v24, %v1218_v10  ;;  %v1291_v0 = vsub.f32 1.0, %v1290_v13  ;;  %v2007_v24 = vpop.eup %2006  ;;  %vm2787_vm11 = vcmp.eq.f32.partialorder %v1283_v41, 8.507059e+37 }
 0x138   : > { %v1248_v43 = vadd.f32 %v2684_v33, %v1247_v18  ;;  %v1237_v58 = vsel %vm2731_vm0, %v2675_v23, %v1233_v20  ;;  %v1277_v19 = vmul.f32 %v2704_v57, %v1276_v35  ;;  %v1227_v4 = vsel %vm2711_vm12, %v2681_v12, %v1222_v9 }
 0x139   : > { %v1263_v6 = vadd.f32 %v2694_v7, %v1262_v62  ;;  %v1242_v23 = vsel %vm2699_vm8, %v1241_v56, %v1237_v58  ;;  %v1292_v8 = vmul.f32 %v2725_v31, %v1291_v0  ;;  %vm1295_vm8 = vweird.f32 %v2725_v31 }
 0x13a   : > { %v1252_v28 = vsel %vm2756_vm4, %v2684_v33, %v1248_v43  ;;  %v1278_v22 = vadd.f32 %v2704_v57, %v1277_v19  ;;  %v1300_v26 = vand.u32 2147483648, %v2669_v63  ;;  %v1305_v59 = vmul.f32 %v2007_v24, %v2689_v54  ;;  %vm2820_vm12 = vmor %vm1294_vm7, %vm1295_vm8  ;;  %v1911_v33 = vld [vmem:[%s2967_s7 + $0x8] sm:$0xff] }
 0x13b   : > { %v1267_v39 = vsel %vm2777_vm9, %v2694_v7, %v1263_v6  ;;  %v1257_v46 = vsel %vm2716_vm14, %v1256_v14, %v1252_v28  ;;  %v1293_v12 = vadd.f32 %v2725_v31, %v1292_v8  ;;  %v1298_v51 = vand.u32 2147483647, %v2669_v63  ;;  %v1912_v8 = vld [vmem:[%s2967_s7 + $0x10] sm:$0xff] }
 0x13c   : > { %v1282_v27 = vsel %vm2802_vm10, %v2704_v57, %v1278_v22  ;;  %v2814_v47 = vmul.f32 %v1242_v23, %v2636_v1  ;;  %v1272_v36 = vsel %vm2761_vm6, %v1271_v29, %v1267_v39  ;;  %v1286_v7 = vor.u32 1.1754944e-38, %v1285_v3  ;;  %v2009_v63 = vpop.eup %2008  ;;  %v1917_v23 = vld [vmem:[%s2967_s7 + $0x38] sm:$0xff]  ;;  %v1914_v3 = vld [vmem:[%s2967_s7 + $0x20] sm:$0xff] }
 0x13d   : > { %v1306_v60 = vsub.f32 1.0, %v1305_v59  ;;  %v1313_v56 = vand.u32 2147483647, %v2689_v54  ;;  %v1297_v57 = vsel %vm2820_vm12, %v2725_v31, %v1293_v12  ;;  %v1315_v1 = vand.u32 2147483648, %v2689_v54  ;;  %1521 = vmatpush.bf16.msra.mxu2 %v1917_v23  ;;  %v1373_v39 = vld [vmem:[%s2966_s6] sm:$0x1] }
 0x13e   : > { %v2830_v61 = vmul.f32 %v1227_v4, %v2634_v15  ;;  %v2833_v55 = vmul.f32 %v1257_v46, %v2638_v34  ;;  %v1287_v53 = vsel %vm2787_vm11, %v1286_v7, %v1282_v27  ;;  %v1301_v44 = vor.u32 1.1754944e-38, %v1300_v26  ;;  %v1910_v59 = vld [vmem:[%s2967_s7] sm:$0xff] }
 0x13f   : > { %v1307_v48 = vmul.f32 %v2007_v24, %v1306_v60  ;;  %vm1310_vm13 = vweird.f32 %v2007_v24  ;;  %vm1299_vm14 = vcmp.eq.f32.partialorder %v1298_v51, 8.507059e+37  ;;  %v1320_v5 = vmul.f32 %v2009_v63, %v2696_v42 }
 0x140   : > { %v2839_v45 = vmul.f32 %v1272_v36, %v2640_v38  ;;  %v1342_v15 = vadd.f32 %v2814_v47, %v2830_v61  ;;  %v1302_v11 = vsel %vm1299_vm14, %v1301_v44, %v1297_v57  ;;  %vm1309_vm15 = vweird.f32 %v2689_v54 }
 0x141   : > { %v1308_v20 = vadd.f32 %v2007_v24, %v1307_v48  ;;  %vm1314_vm0 = vcmp.eq.f32.partialorder %v1313_v56, 8.507059e+37  ;;  %vm1311_vm1 = vmor %vm1309_vm15, %vm1310_vm13  ;;  %v1316_v34 = vor.u32 1.1754944e-38, %v1315_v1  ;;  %v1321_v18 = vsub.f32 1.0, %v1320_v5  ;;  %v1472_v5 = vld [vmem:[%s2968_s8] sm:$0x1] }
 0x142   : > { %v2845_v14 = vmul.f32 %v1287_v53, %v2642_v52  ;;  %v1343_v30 = vadd.f32 %v1342_v15, %v2833_v55  ;;  %vm1325_vm2 = vweird.f32 %v2009_v63  ;;  %v1328_v38 = vand.u32 2147483647, %v2696_v42  ;;  %v1925_v15 = vld [vmem:[%s2969_s9 + $0x38] sm:$0xff] }
 0x143   : > { %v1312_v31 = vsel %vm1311_vm1, %v2007_v24, %v1308_v20  ;;  %v1330_v10 = vand.u32 2147483648, %v2696_v42  ;;  %v1322_v32 = vmul.f32 %v2009_v63, %v1321_v18  ;;  %v2851_v43 = vmul.f32 %v1302_v11, %v2644_v25  ;;  %v1913_v24 = vld [vmem:[%s2967_s7 + $0x18] sm:$0xff]  ;;  %1634 = vmatpush.bf16.msrb.mxu1 %v1925_v15  ;;  %1926 = vmatpush.bf16.msra.mxu3 %v1925_v15 }
 0x144   : > { %v1317_v35 = vsel %vm1314_vm0, %v1316_v34, %v1312_v31  ;;  %v1344_v54 = vadd.f32 %v1343_v30, %v2839_v45  ;;  %vm1324_vm3 = vweird.f32 %v2696_v42  ;;  %vm1329_vm6 = vcmp.eq.f32.partialorder %v1328_v38, 8.507059e+37  ;;  %v1924_v34 = vld [vmem:[%s2969_s9 + $0x30] sm:$0xff]  ;;  %v1923_v30 = vld [vmem:[%s2969_s9 + $0x28] sm:$0xff]  ;;  %v1922_v38 = vld [vmem:[%s2969_s9 + $0x20] sm:$0xff] }
 0x145   : > { %v1323_v62 = vadd.f32 %v2009_v63, %v1322_v32  ;;  %v2856_v52 = vmul.f32 %v1317_v35, %v2650_v37  ;;  %vm1326_vm4 = vmor %vm1324_vm3, %vm1325_vm2  ;;  %v1331_v16 = vor.u32 1.1754944e-38, %v1330_v10  ;;  %v1921_v32 = vld [vmem:[%s2969_s9 + $0x18] sm:$0xff]  ;;  %vm1687_vm14 = vcmask 60416  }
 0x146   : > { %v1345_v41 = vadd.f32 %v1344_v54, %v2845_v14  ;;  %v1920_v54 = vld [vmem:[%s2969_s9 + $0x10] sm:$0xff] }
 0x147   : > { %v1327_v58 = vsel %vm1326_vm4, %v2009_v63, %v1323_v62  ;;  %1635 = vmatpush.bf16.msrb.mxu1 %v1924_v34  ;;  %1927 = vmatpush.bf16.msra.mxu3 %v1924_v34 }
 0x148   : > { %v1346_v19 = vadd.f32 %v1345_v41, %v2851_v43  ;;  %v1332_v13 = vsel %vm1329_vm6, %v1331_v16, %v1327_v58  ;;  %v1919_v16 = vld [vmem:[%s2969_s9 + $0x8] sm:$0xff] }
 0x149   : > { %v2861_v25 = vmul.f32 %v1332_v13, %v2654_v21  ;;  %v1916_v21 = vld [vmem:[%s2967_s7 + $0x30] sm:$0xff] }
 0x14a   : > { %v1347_v49 = vadd.f32 %v1346_v19, %v2856_v52  ;;  %1522 = vmatpush.bf16.msra.mxu2 %v1916_v21 }
 0x14b   : > { %1636 = vmatpush.bf16.msrb.mxu1 %v1923_v30  ;;  %1928 = vmatpush.bf16.msra.mxu3 %v1923_v30 }
 0x14c   : > { %v1348_v6 = vadd.f32 %v1347_v49, %v2861_v25 }
 0x14e   : > { %v1349_v42 = vrot.slane %v1348_v6, 4  ;;  %1523 = vmatpush.bf16.msra.mxu2 %v1915_v2 }
 0x14f   : > { %1637 = vmatpush.bf16.msrb.mxu1 %v1922_v38  ;;  %1929 = vmatpush.bf16.msra.mxu3 %v1922_v38 }
 0x150   : > { %v1350_v50 = vadd.f32 %v1349_v42, %v1348_v6  ;;  %v1918_v6 = vld [vmem:[%s2969_s9] sm:$0xff] }
 0x152   : > { %v1351_v37 = vrot.slane %v1350_v50, 2  ;;  %1524 = vmatpush.bf16.msra.mxu2 %v1914_v3 }
 0x153   : > { %1638 = vmatpush.bf16.msrb.mxu1 %v1921_v32  ;;  %1930 = vmatpush.bf16.msra.mxu3 %v1921_v32 }
 0x154   : > { %v1352_v29 = vadd.f32 %v1351_v37, %v1350_v50 }
 0x156   : > { %v1353_v9 = vrot.slane %v1352_v29, 1  ;;  %1525 = vmatpush.bf16.msra.mxu2 %v1913_v24 }
 0x157   : > { %1639 = vmatpush.bf16.msrb.mxu1 %v1920_v54  ;;  %1931 = vmatpush.bf16.msra.mxu3 %v1920_v54 }
 0x158   : > { %v1354_v28 = vadd.f32 %v1353_v9, %v1352_v29 }
 0x15a   : > { %v1355_v22 = vmul.f32 0.015625, %v1354_v28  ;;  %1526 = vmatpush.bf16.msra.mxu2 %v1912_v8 }
 0x15b   : > { %1640 = vmatpush.bf16.msrb.mxu1 %v1919_v16  ;;  %1932 = vmatpush.bf16.msra.mxu3 %v1919_v16 }
 0x15c   : > { %v1356_v0 = vpack.c.bf16 %v1355_v22, %v1355_v22 }
 0x15e   : > { %1430 = vmatmul.bf16.vlgmr.msra.gmra.mxu1 %v1356_v0  ;;  %1527 = vmatpush.bf16.msra.mxu2 %v1911_v33  ;;  %v390_v33 = vld [vmem:[%s2107_s24 + $0x8] sm:$0xff]  }
 0x15f   : > { %1641 = vmatpush.bf16.msrb.mxu1 %v1918_v6  ;;  %1933 = vmatpush.bf16.msra.mxu3 %v1918_v6 }
 0x162   : > { %1528 = vmatpush.bf16.msra.mxu2 %v1910_v59 }
 0x1db   : > { %v1431_v40 = vpop.f32.mrf.mxu1 }
 0x1dc   : > { %v1432_v4 = vadd.f32 %v1431_v40, %v1373_v39 }
 0x1de   : > { %v1828_v46 = vmul.f32 -1.442695, %v1432_v4 }
 0x1e0   : > { %2010 = vpow2.f32 %v1828_v46 }
 0x1e3   : > { %v1433_v26 = vpop.f32.mrf.mxu1 }
 0x1e6   : > { %v2011_v27 = vpop.eup %2010 }
 0x1e7   : > { %v1438_v12 = vadd.f32 1.0, %v2011_v27 }
 0x1e9   : > { %2012 = vrcp.f32 %v1438_v12  ;;  %v1450_v17 = vand.u32 2147483648, %v1438_v12  ;;  %v1448_v56 = vand.u32 2147483647, %v1438_v12  ;;  %vm1444_vm9 = vweird.f32 %v1438_v12 }
 0x1eb   : > { %v1451_v1 = vor.u32 1.1754944e-38, %v1450_v17  ;;  %vm1449_vm11 = vcmp.eq.f32.partialorder %v1448_v56, 8.507059e+37 }
 0x1ef   : > { %v2013_v51 = vpop.eup %2012 }
 0x1f0   : > { %v1440_v36 = vmul.f32 %v2013_v51, %v1438_v12  ;;  %vm1445_vm5 = vweird.f32 %v2013_v51 }
 0x1f1   : > { %vm1446_vm7 = vmor %vm1444_vm9, %vm1445_vm5 }
 0x1f2   : > { %v1441_v7 = vsub.f32 1.0, %v1440_v36 }
 0x1f4   : > { %v1442_v60 = vmul.f32 %v2013_v51, %v1441_v7 }
 0x1f6   : > { %v1443_v57 = vadd.f32 %v2013_v51, %v1442_v60  ;;  %v1666_v60 = vunpack.c.h.bf16 %v390_v33 }
 0x1f8   : > { %v1447_v63 = vsel %vm1446_vm7, %v2013_v51, %v1443_v57 }
 0x1f9   : > { %v1452_v53 = vsel %vm1449_vm11, %v1451_v1, %v1447_v63  ;;  %v392_v63 = vld [vmem:[%s2107_s24 + $0x10] sm:$0xff]  }
 0x1fa   : > { %v1454_v44 = vmul.f32 %v1452_v53, %v1432_v4 }
 0x1fc   : > { %v1455_v48 = vpack.c.bf16 %v1454_v44, %v1454_v44  ;;  %v1667_v44 = vunpack.c.l.bf16 %v392_v63 }
 0x1fe   : > { %1529 = vmatmul.bf16.vlgmr.msra.gmra.mxu2 %v1455_v48 }
 0x281   : > { %v1530_v11 = vpop.f32.mrf.mxu2 }
 0x282   : > { %v1531_v20 = vadd.f32 %v1530_v11, %v1472_v5 }
 0x284   : > { %v1861_v18 = vmul.f32 -1.442695, %v1531_v20  ;;  %v1668_v20 = vunpack.c.h.bf16 %v392_v63 }
 0x286   : > { %2014 = vpow2.f32 %v1861_v18 }
 0x289   : > { %v1532_v31 = vpop.f32.mrf.mxu2 }
 0x28a   : > { %v394_v31 = vld [vmem:[%s2107_s24 + $0x18] sm:$0xff]  }
 0x28c   : > { %v2015_v10 = vpop.eup %2014 }
 0x28d   : > { %v1537_v35 = vadd.f32 1.0, %v2015_v10  ;;  %v1669_v10 = vunpack.c.l.bf16 %v394_v31 }
 0x28f   : > { %2016 = vrcp.f32 %v1537_v35  ;;  %v1549_v19 = vand.u32 2147483648, %v1537_v35  ;;  %v1547_v49 = vand.u32 2147483647, %v1537_v35  ;;  %vm1543_vm10 = vweird.f32 %v1537_v35 }
 0x291   : > { %v1550_v50 = vor.u32 1.1754944e-38, %v1549_v19  ;;  %vm1548_vm13 = vcmp.eq.f32.partialorder %v1547_v49, 8.507059e+37 }
 0x295   : > { %v2017_v62 = vpop.eup %2016 }
 0x296   : > { %v1539_v41 = vmul.f32 %v2017_v62, %v1537_v35  ;;  %vm1544_vm8 = vweird.f32 %v2017_v62 }
 0x297   : > { %vm1545_vm12 = vmor %vm1543_vm10, %vm1544_vm8 }
 0x298   : > { %v1540_v58 = vsub.f32 1.0, %v1539_v41  ;;  %v1670_v41 = vunpack.c.h.bf16 %v394_v31 }
 0x29a   : > { %v1541_v13 = vmul.f32 %v2017_v62, %v1540_v58 }
 0x29c   : > { %v1542_v42 = vadd.f32 %v2017_v62, %v1541_v13 }
 0x29e   : > { %v1546_v37 = vsel %vm1545_vm12, %v2017_v62, %v1542_v42 }
 0x29f   : > { %v1551_v29 = vsel %vm1548_vm13, %v1550_v50, %v1546_v37 }
 0x2a0   : > { %v1553_v9 = vperm.slane %v1551_v29, 0 }
 0x2a2   : > { %v1554_v28 = vmul.f32 %v1553_v9, %v2830_v61  ;;  %v1555_v22 = vmul.f32 %v1553_v9, %v2814_v47  ;;  %v1556_v0 = vmul.f32 %v1553_v9, %v2833_v55  ;;  %v1557_v23 = vmul.f32 %v1553_v9, %v2839_v45  ;;  %v388_v55 = vld [vmem:[%s2107_s24] sm:$0xff]  }
 0x2a3   : > { %v1558_v3 = vmul.f32 %v1553_v9, %v2845_v14  ;;  %v1559_v24 = vmul.f32 %v1553_v9, %v2851_v43  ;;  %v1560_v61 = vmul.f32 %v1553_v9, %v2856_v52  ;;  %v1561_v47 = vmul.f32 %v1553_v9, %v2861_v25  ;;  %v1945_v45 = vld [vmem:[%s2970_s10] ss:$0 sm:$0xff] }
 0x2a4   : > { %v1562_v21 = vpack.c.bf16 %v1555_v22, %v1554_v28  ;;  %v1563_v2 = vpack.c.bf16 %v1557_v23, %v1556_v0  ;;  %v1663_v8 = vunpack.c.l.bf16 %v388_v55  ;;  %v1665_v52 = vunpack.c.l.bf16 %v390_v33 }
 0x2a5   : > { %v1564_v39 = vpack.c.bf16 %v1559_v24, %v1558_v3  ;;  %v1565_v40 = vpack.c.bf16 %v1561_v47, %v1560_v61  ;;  %v1664_v59 = vunpack.c.h.bf16 %v388_v55 }
 0x2a6   : > { %1642 = vmatmul.bf16.vlgmr.msrb.gmra.mxu1 %v1562_v21  ;;  %1647 = vmatmul.bf16.vlgmr.msra.gmra.mxu3 %v1563_v2 }
 0x2b6   : > { %1652 = vmatmul.bf16.gmra.mxu3 %v1564_v39 }
 0x2c6   : > { %1657 = vmatmul.bf16.gmra.mxu3 %v1565_v40 }
 0x323   : > { %v1643_v4 = vpop.f32.mrf.mxu1 }
 0x324   : > { %v1644_v46 = vadd.f32 %v1945_v45, %v1643_v4 }
 0x326   : > { %v1671_v14 = vadd.f32 %v1663_v8, %v1644_v46 }
 0x328   : > { %v1679_v43 = vpack.c.bf16 %v1671_v14, %v1671_v14 }
 0x329   : > { %v1648_v25 = vpop.f32.mrf.mxu3 }
 0x32a   : > { %1688 = vst.msk [vmem:[%s2937_s12] sm:$0xf] %vm1687_vm14, %v1679_v43  ;;  %v1649_v26 = vadd.f32 %v1945_v45, %v1648_v25 }
 0x32b   : > { %v1645_v27 = vpop.f32.mrf.mxu1 }
 0x32c   : > { %v1673_v12 = vadd.f32 %v1665_v52, %v1649_v26  ;;  %v1646_v51 = vadd.f32 %v1945_v45, %v1645_v27 }
 0x32e   : > { %v1681_v36 = vpack.c.bf16 %v1673_v12, %v1673_v12  ;;  %v1672_v7 = vadd.f32 %v1664_v59, %v1646_v51 }
 0x330   : > { %1690 = vst.msk [vmem:[%s2937_s12 + $0x8] sm:$0xf] %vm1687_vm14, %v1681_v36  ;;  %v1680_v17 = vpack.c.bf16 %v1672_v7, %v1672_v7 }
 0x331   : > { %v1650_v56 = vpop.f32.mrf.mxu3 }
 0x332   : > { %1689 = vst.msk [vmem:[%s2937_s12 + $0x4] sm:$0xf] %vm1687_vm14, %v1680_v17  ;;  %v1651_v57 = vadd.f32 %v1945_v45, %v1650_v56 }
 0x334   : > { %v1674_v1 = vadd.f32 %v1666_v60, %v1651_v57 }
 0x336   : > { %v1682_v53 = vpack.c.bf16 %v1674_v1, %v1674_v1 }
 0x338   : > { %1691 = vst.msk [vmem:[%s2937_s12 + $0xc] sm:$0xf] %vm1687_vm14, %v1682_v53 }
 0x339   : > { %v1653_v48 = vpop.f32.mrf.mxu3 }
 0x33a   : > { %v1654_v5 = vadd.f32 %v1945_v45, %v1653_v48 }
 0x33c   : > { %v1675_v15 = vadd.f32 %v1667_v44, %v1654_v5 }
 0x33e   : > { %v1683_v11 = vpack.c.bf16 %v1675_v15, %v1675_v15 }
 0x340   : > { %1692 = vst.msk [vmem:[%s2937_s12 + $0x10] sm:$0xf] %vm1687_vm14, %v1683_v11 }
 0x341   : > { %v1655_v34 = vpop.f32.mrf.mxu3 }
 0x342   : > { %v1656_v18 = vadd.f32 %v1945_v45, %v1655_v34 }
 0x344   : > { %v1676_v30 = vadd.f32 %v1668_v20, %v1656_v18 }
 0x346   : > { %v1684_v38 = vpack.c.bf16 %v1676_v30, %v1676_v30 }
 0x348   : > { %1693 = vst.msk [vmem:[%s2937_s12 + $0x14] sm:$0xf] %vm1687_vm14, %v1684_v38 }
 0x349   : > { %v1658_v35 = vpop.f32.mrf.mxu3 }
 0x34a   : > { %v1659_v32 = vadd.f32 %v1945_v45, %v1658_v35 }
 0x34c   : > { %v1677_v54 = vadd.f32 %v1669_v10, %v1659_v32 }
 0x34e   : > { %v1685_v62 = vpack.c.bf16 %v1677_v54, %v1677_v54 }
 0x350   : > { %1694 = vst.msk [vmem:[%s2937_s12 + $0x18] sm:$0xf] %vm1687_vm14, %v1685_v62 }
 0x351   : > { %v1660_v16 = vpop.f32.mrf.mxu3 }
 0x352   : > { %v1661_v58 = vadd.f32 %v1945_v45, %v1660_v16 }
 0x354   : > { %v1678_v19 = vadd.f32 %v1670_v41, %v1661_v58 }
 0x356   : > { %v1686_v13 = vpack.c.bf16 %v1678_v19, %v1678_v19 }
 0x358   : > { %1695 = vst.msk [vmem:[%s2937_s12 + $0x1c] sm:$0xf] %vm1687_vm14, %v1686_v13 }
 0x359 PF: > { %s21_s17 = sadd.s32 1, %s2025_s17  }
 0x35a   : > { %p18_p4 = scmp.ge.s32.totalorder %s21_s17, 4  }
 0x35c   :  { %20 = sbr.rel (!%p18_p4) target bundleno = 1 (0x1), region = 95 }

</bundles_post_ra>
